<compile_context>
chip_gen: v7x
topology: tpu7x:2x2x1
jax: 0.10.0
libtpu: 0.0.40
codegen_flags: <defaults>
</compile_context>

<pallas_src>
import jax
import jax.numpy as jnp
from jax.experimental import pallas as pl
from jax.experimental.pallas import tpu as pltpu


# ------------------------------ kernel ---------------------------------------

def _basic_block_kernel(x_ref, a1_ref, b1_ref, a2_ref, b2_ref, out_ref):
    # x_ref:   (N, H, W*Cp) bf16          a*_ref: (3, W*Cp, W*Cp) bf16
    # b*_ref:  (1, W*Cp)    f32           out_ref: (N, H, W*Cp)   f32
    nimg, nrow, lanes = out_ref.shape
    nh = nimg * nrow

    # Single read of x: feeds the conv1 band GEMMs and the residual add.
    x = x_ref[...].reshape(nh, lanes)                       # bf16 (N*H, W*Cp)

    # Per-image H-boundary masks for the banded-conv row shifts (this is the
    # 'same' zero padding in H).  Row r = n*H + h  =>  h = r % H.
    h_idx = jax.lax.broadcasted_iota(jnp.int32, (nh, lanes), 0) % nrow
    top = h_idx == 0
    bot = h_idx == nrow - 1

    def conv3x3_band(inp, a_ref):
        # out[h] = inp[h-1] @ A0 + inp[h] @ A1 + inp[h+1] @ A2, with zero rows
        # outside each image.  3 lane-dense MXU GEMMs (K = N = W*Cp = 128);
        # the row realignment is done on the f32 results with XLU sublane rolls
        # + a VPU mask instead of building zero-halo'd input copies.
        p = [jnp.dot(inp, a_ref[i], preferred_element_type=jnp.float32)
             for i in range(3)]                             # static unroll
        down = jnp.where(top, 0.0, pltpu.roll(p[0], shift=1, axis=0))      # p0[h-1]
        up = jnp.where(bot, 0.0, pltpu.roll(p[2], shift=nh - 1, axis=0))   # p2[h+1]
        return down + p[1] + up

    # ---- conv1 (BN1 scale folded into a1) + bias + ReLU ----------------------
    y = jnp.maximum(conv3x3_band(x, a1_ref) + b1_ref[...], 0.0)
    y = y.astype(jnp.bfloat16)                              # stays VMEM/vreg-resident

    # ---- conv2 (BN2 folded) + bias + residual + ReLU --------------------------
    out = conv3x3_band(y, a2_ref) + b2_ref[...] + x.astype(jnp.float32)
    out_ref[...] = jnp.maximum(out, 0.0).reshape(nimg, nrow, lanes).astype(out_ref.dtype)


# --------------------------- wrapper / weight prep ---------------------------

def _padded_channels(c, w):
    """Smallest multiple of 8 >= c such that w*c is a multiple of 128 (lane-dense)."""
    cp = -(-c // 8) * 8
    while (w * cp) % 128:
        cp += 8
    return cp


def _band_weight_matrices(w_hwio, w):
    """Fold the W-direction taps of a 3x3 kernel (BN scale already folded in)
    into banded matrices A: (3, W*Cin, W*Cout) with
        A[i][(w_in, ci), (w_out, co)] = w[i, w_in - w_out + 1, ci, co]
    for |w_in - w_out| <= 1 and 0 elsewhere, so that
        out_row[h] = sum_i x_row[h + i - 1] @ A[i]
    reproduces the 'same'-padded conv (W-boundary taps vanish automatically).
    Requires W >= 3."""
    _, _, cin, cout = w_hwio.shape
    mats = []
    for i in range(3):
        ki = w_hwio[i]                                      # (3, Cin, Cout): W-taps j=0,1,2
        # Toeplitz trick: band[w_out, w_in] = vec[(w_in - w_out) mod (W+1)]
        vec = jnp.concatenate(
            [ki[1:3], jnp.zeros((w - 2, cin, cout), w_hwio.dtype), ki[0:1]], axis=0)
        band = jnp.tile(vec, (w, 1, 1))[: w * w].reshape(w, w, cin, cout)
        mats.append(band.transpose(1, 2, 0, 3).reshape(w * cin, w * cout))
    return jnp.stack(mats, axis=0)                          # (3, W*Cin, W*Cout)


@jax.jit
def basic_block_forward(x_nchw, w1, w2, bn1, bn2, eps=1e-5):
    """BasicBlock forward (eval-mode BN). x_nchw: (N, C, H, W) float32."""
    n, c, h, w = x_nchw.shape
    cout = w1.shape[0]
    g1, bt1, m1, v1 = bn1
    g2, bt2, m2, v2 = bn2

    cp = _padded_channels(max(c, cout), w)                  # 4 -> 8 here
    lanes = w * cp                                          # 128: lane-dense last dim

    # NCHW -> channels-last rows (N, H, W*Cp); padded channels are exact zeros.
    x_rows = jnp.transpose(x_nchw, (0, 2, 3, 1)).astype(jnp.float32)
    x_rows = jnp.pad(x_rows, ((0, 0), (0, 0), (0, 0), (0, cp - c)))
    x_rows = x_rows.reshape(n, h, lanes).astype(jnp.bfloat16)

    # Fold eval-mode BN into the convs in f32, pad channels, band, cast bf16.
    s1 = g1 / jnp.sqrt(v1 + eps)
    s2 = g2 / jnp.sqrt(v2 + eps)

    def prep_w(wt, s, cin):
        w_hwio = jnp.transpose(wt, (2, 3, 1, 0)).astype(jnp.float32) * s[None, None, None, :]
        w_hwio = jnp.pad(w_hwio, ((0, 0), (0, 0), (0, cp - cin), (0, cp - cout)))
        return _band_weight_matrices(w_hwio, w).astype(jnp.bfloat16)

    def prep_b(bt, m, s):
        b = jnp.pad((bt - m * s).astype(jnp.float32), (0, cp - cout))
        return jnp.tile(b, w)[None, :]                      # (1, W*Cp) f32

    a1 = prep_w(w1, s1, c)                                  # (3, W*Cp, W*Cp) bf16
    a2 = prep_w(w2, s2, cout)
    b1 = prep_b(bt1, m1, s1)
    b2 = prep_b(bt2, m2, s2)

    out_rows = pl.pallas_call(
        _basic_block_kernel,
        out_shape=jax.ShapeDtypeStruct((n, h, lanes), jnp.float32),
        grid=(1,),                                          # batch folded into GEMM M dim
        in_specs=[
            pl.BlockSpec((n, h, lanes), lambda i: (0, 0, 0)),
            pl.BlockSpec((3, lanes, lanes), lambda i: (0, 0, 0)),
            pl.BlockSpec((1, lanes), lambda i: (0, 0)),
            pl.BlockSpec((3, lanes, lanes), lambda i: (0, 0, 0)),
            pl.BlockSpec((1, lanes), lambda i: (0, 0)),
        ],
        out_specs=pl.BlockSpec((n, h, lanes), lambda i: (0, 0, 0)),
        compiler_params=pltpu.CompilerParams(
            dimension_semantics=("arbitrary",)),
    )(x_rows, a1, b1, a2, b2)

    out = out_rows.reshape(n, h, w, cp)[:, :, :, :cout]     # drop padded channels
    return jnp.transpose(out, (0, 3, 1, 2))                 # NCHW


# ------------------------------- references ----------------------------------

def _ref_basic_block(x, w1, w2, bn1, bn2, eps=1e-5):
    """Exact f32 BasicBlock forward (mirrors the PyTorch module)."""
    def conv(xv, wv):
        return jax.lax.conv_general_dilated(
            xv, wv, window_strides=(1, 1), padding=((1, 1), (1, 1)),
            dimension_numbers=("NCHW", "OIHW", "NCHW"))

    def bn(xv, p):
        g, b, m, v = p
        return ((xv - m[None, :, None, None]) / jnp.sqrt(v[None, :, None, None] + eps)
                * g[None, :, None, None] + b[None, :, None, None])

    out = jax.nn.relu(bn(conv(x, w1), bn1))
    out = bn(conv(out, w2), bn2)
    return jax.nn.relu(out + x)


def _ref_basic_block_bf16(x, w1, w2, bn1, bn2, eps=1e-5):
    """Same math with the kernel's numerics: BN folded into the weights in f32,
    bf16 MXU inputs, f32 accumulation, bf16 intermediate activation/residual."""
    g1, bt1, m1, v1 = bn1
    g2, bt2, m2, v2 = bn2
    s1 = g1 / jnp.sqrt(v1 + eps)
    s2 = g2 / jnp.sqrt(v2 + eps)
    w1f = (w1 * s1[:, None, None, None]).astype(jnp.bfloat16)
    w2f = (w2 * s2[:, None, None, None]).astype(jnp.bfloat16)
    b1 = (bt1 - m1 * s1)[None, :, None, None]
    b2 = (bt2 - m2 * s2)[None, :, None, None]
    xq = x.astype(jnp.bfloat16)

    def conv(xv, wv):
        return jax.lax.conv_general_dilated(
            xv, wv, window_strides=(1, 1), padding=((1, 1), (1, 1)),
            dimension_numbers=("NCHW", "OIHW", "NCHW"),
            preferred_element_type=jnp.float32)

    y = jax.nn.relu(conv(xq, w1f) + b1).astype(jnp.bfloat16)
    out = conv(y, w2f) + b2 + xq.astype(jnp.float32)
    return jax.nn.relu(out)


# --------------------------------- main ---------------------------------------

if __name__ == "__main__":
    key = jax.random.PRNGKey(0)
    N, C, H, W = 2, 4, 16, 16          # in_channel = out_channel = 4, stride=1
    ks = jax.random.split(key, 11)

    x = jax.random.normal(ks[0], (N, C, H, W), jnp.float32)
    w1 = jax.random.normal(ks[1], (C, C, 3, 3), jnp.float32) * 0.2    # conv1 weight (OIHW)
    w2 = jax.random.normal(ks[2], (C, C, 3, 3), jnp.float32) * 0.2    # conv2 weight (OIHW)

    bn1 = (jax.random.uniform(ks[3], (C,), jnp.float32, 0.5, 1.5),    # gamma
           jax.random.normal(ks[4], (C,), jnp.float32) * 0.1,         # beta
           jax.random.normal(ks[5], (C,), jnp.float32) * 0.1,         # running_mean
           jax.random.uniform(ks[6], (C,), jnp.float32, 0.5, 1.5))    # running_var
    bn2 = (jax.random.uniform(ks[7], (C,), jnp.float32, 0.5, 1.5),
           jax.random.normal(ks[8], (C,), jnp.float32) * 0.1,
           jax.random.normal(ks[9], (C,), jnp.float32) * 0.1,
           jax.random.uniform(ks[10], (C,), jnp.float32, 0.5, 1.5))

    out = jax.block_until_ready(basic_block_forward(x, w1, w2, bn1, bn2))
    assert out.shape == (N, C, H, W), out.shape

    # Strict check against the matched-precision (bf16-input / f32-accum)
    # reference: validates banding, H-boundary handling, BN fold, residual, layout.
    ref_bf16 = jax.block_until_ready(_ref_basic_block_bf16(x, w1, w2, bn1, bn2))
    assert jnp.allclose(out, ref_bf16, atol=2e-3, rtol=2e-3), \
        float(jnp.max(jnp.abs(out - ref_bf16)))

    # Loose sanity bound against the exact f32 module reference; the residual
    # difference is purely bf16 input/activation rounding on the MXU path.
    ref_f32 = jax.block_until_ready(_ref_basic_block(x, w1, w2, bn1, bn2))
    assert float(jnp.max(jnp.abs(out - ref_f32))) < 1e-1, \
        float(jnp.max(jnp.abs(out - ref_f32)))

    print("KERNEL_OK")
</pallas_src>

<mosaic_0001>
module attributes {stable_mosaic.version = 11 : i64} {
  func.func @_basic_block_kernel(%arg0: i32, %arg1: memref<2x16x128xbf16, #tpu.memory_space<vmem>>, %arg2: memref<3x128x128xbf16, #tpu.memory_space<vmem>>, %arg3: memref<1x128xf32, #tpu.memory_space<vmem>>, %arg4: memref<3x128x128xbf16, #tpu.memory_space<vmem>>, %arg5: memref<1x128xf32, #tpu.memory_space<vmem>>, %arg6: memref<2x16x128xf32, #tpu.memory_space<vmem>>) attributes {dimension_semantics = [#tpu.dimension_semantics<arbitrary>], iteration_bounds = array<i64: 1>, scalar_prefetch = 0 : i64, scratch_operands = 0 : i64, tpu.core_type = #tpu.core_type<tc>, window_params = [{pipeline_mode = #tpu.pipeline_mode<synchronous>, transform_indices = @transform_0, window_bounds = array<i64: 2, 16, 128>}, {pipeline_mode = #tpu.pipeline_mode<synchronous>, transform_indices = @transform_1, window_bounds = array<i64: 3, 128, 128>}, {pipeline_mode = #tpu.pipeline_mode<synchronous>, transform_indices = @transform_2, window_bounds = array<i64: 1, 128>}, {pipeline_mode = #tpu.pipeline_mode<synchronous>, transform_indices = @transform_3, window_bounds = array<i64: 3, 128, 128>}, {pipeline_mode = #tpu.pipeline_mode<synchronous>, transform_indices = @transform_4, window_bounds = array<i64: 1, 128>}, {pipeline_mode = #tpu.pipeline_mode<synchronous>, transform_indices = @transform_5, window_bounds = array<i64: 2, 16, 128>}]} {
    %c0 = arith.constant 0 : index
    %c0_0 = arith.constant 0 : index
    %c0_1 = arith.constant 0 : index
    %0 = vector.load %arg1[%c0, %c0_0, %c0_1] : memref<2x16x128xbf16, #tpu.memory_space<vmem>>, vector<2x16x128xbf16>
    %1 = vector.shape_cast %0 : vector<2x16x128xbf16> to vector<32x128xbf16>
    %2 = tpu.iota {dimensions = array<i32: 0>} : vector<32x128xi32>
    %c16_i32 = arith.constant 16 : i32
    %c0_i32 = arith.constant 0 : i32
    %3 = arith.cmpi eq, %c16_i32, %c0_i32 : i32
    %c1_i32 = arith.constant 1 : i32
    %4 = arith.select %3, %c1_i32, %c16_i32 : i32
    %5 = vector.broadcast %4 : i32 to vector<32x128xi32>
    %6 = arith.remsi %2, %5 : vector<32x128xi32>
    %c0_i32_2 = arith.constant 0 : i32
    %7 = vector.broadcast %c0_i32_2 : i32 to vector<32x128xi32>
    %8 = arith.cmpi ne, %6, %7 : vector<32x128xi32>
    %c0_i32_3 = arith.constant 0 : i32
    %9 = vector.broadcast %c0_i32_3 : i32 to vector<32x128xi32>
    %10 = arith.cmpi slt, %6, %9 : vector<32x128xi32>
    %c0_i32_4 = arith.constant 0 : i32
    %11 = arith.cmpi slt, %4, %c0_i32_4 : i32
    %12 = vector.broadcast %11 : i1 to vector<32x128xi1>
    %13 = vector.broadcast %12 : vector<32x128xi1> to vector<32x128xi1>
    %14 = arith.xori %10, %13 : vector<32x128xi1>
    %15 = arith.andi %14, %8 : vector<32x128xi1>
    %16 = vector.broadcast %4 : i32 to vector<32x128xi32>
    %17 = arith.addi %6, %16 : vector<32x128xi32>
    %18 = arith.select %15, %17, %6 : vector<32x128xi1>, vector<32x128xi32>
    %c0_i32_5 = arith.constant 0 : i32
    %19 = vector.broadcast %c0_i32_5 : i32 to vector<32x128xi32>
    %20 = arith.cmpi eq, %18, %19 : vector<32x128xi32>
    %c15_i32 = arith.constant 15 : i32
    %21 = vector.broadcast %c15_i32 : i32 to vector<32x128xi32>
    %22 = arith.cmpi eq, %18, %21 : vector<32x128xi32>
    %c0_6 = arith.constant 0 : index
    %c0_7 = arith.constant 0 : index
    %c0_8 = arith.constant 0 : index
    %23 = vector.load %arg2[%c0_6, %c0_7, %c0_8] : memref<3x128x128xbf16, #tpu.memory_space<vmem>>, vector<1x128x128xbf16>
    %24 = vector.shape_cast %23 : vector<1x128x128xbf16> to vector<128x128xbf16>
    %cst = arith.constant dense<0.000000e+00> : vector<32x128xf32>
    %25 = tpu.matmul %1, %24, %cst {dimension_numbers = #tpu.dot_dimension_numbers<[1], [0], [0], [1], [0, 0, 1, 1], [], []>} : vector<32x128xbf16>, vector<128x128xbf16>, vector<32x128xf32> -> vector<32x128xf32>
    %c1 = arith.constant 1 : index
    %c0_9 = arith.constant 0 : index
    %c0_10 = arith.constant 0 : index
    %26 = vector.load %arg2[%c1, %c0_9, %c0_10] : memref<3x128x128xbf16, #tpu.memory_space<vmem>>, vector<1x128x128xbf16>
    %27 = vector.shape_cast %26 : vector<1x128x128xbf16> to vector<128x128xbf16>
    %cst_11 = arith.constant dense<0.000000e+00> : vector<32x128xf32>
    %28 = tpu.matmul %1, %27, %cst_11 {dimension_numbers = #tpu.dot_dimension_numbers<[1], [0], [0], [1], [0, 0, 1, 1], [], []>} : vector<32x128xbf16>, vector<128x128xbf16>, vector<32x128xf32> -> vector<32x128xf32>
    %c2 = arith.constant 2 : index
    %c0_12 = arith.constant 0 : index
    %c0_13 = arith.constant 0 : index
    %29 = vector.load %arg2[%c2, %c0_12, %c0_13] : memref<3x128x128xbf16, #tpu.memory_space<vmem>>, vector<1x128x128xbf16>
    %30 = vector.shape_cast %29 : vector<1x128x128xbf16> to vector<128x128xbf16>
    %cst_14 = arith.constant dense<0.000000e+00> : vector<32x128xf32>
    %31 = tpu.matmul %1, %30, %cst_14 {dimension_numbers = #tpu.dot_dimension_numbers<[1], [0], [0], [1], [0, 0, 1, 1], [], []>} : vector<32x128xbf16>, vector<128x128xbf16>, vector<32x128xf32> -> vector<32x128xf32>
    %c1_i32_15 = arith.constant 1 : i32
    %32 = tpu.dynamic_rotate %25 by %c1_i32_15 dim 0 : vector<32x128xf32>, i32 -> vector<32x128xf32>
    %cst_16 = arith.constant 0.000000e+00 : f32
    %33 = vector.broadcast %cst_16 : f32 to vector<32x128xf32>
    %34 = arith.select %20, %33, %32 : vector<32x128xi1>, vector<32x128xf32>
    %c31_i32 = arith.constant 31 : i32
    %35 = tpu.dynamic_rotate %31 by %c31_i32 dim 0 : vector<32x128xf32>, i32 -> vector<32x128xf32>
    %cst_17 = arith.constant 0.000000e+00 : f32
    %36 = vector.broadcast %cst_17 : f32 to vector<32x128xf32>
    %37 = arith.select %22, %36, %35 : vector<32x128xi1>, vector<32x128xf32>
    %38 = arith.addf %34, %28 : vector<32x128xf32>
    %39 = arith.addf %38, %37 : vector<32x128xf32>
    %c0_18 = arith.constant 0 : index
    %c0_19 = arith.constant 0 : index
    %40 = vector.load %arg3[%c0_18, %c0_19] : memref<1x128xf32, #tpu.memory_space<vmem>>, vector<1x128xf32>
    %41 = vector.broadcast %40 : vector<1x128xf32> to vector<32x128xf32>
    %42 = arith.addf %39, %41 : vector<32x128xf32>
    %cst_20 = arith.constant 0.000000e+00 : f32
    %43 = vector.broadcast %cst_20 : f32 to vector<32x128xf32>
    %44 = arith.maximumf %42, %43 : vector<32x128xf32>
    %45 = arith.truncf %44 : vector<32x128xf32> to vector<32x128xbf16>
    %c0_21 = arith.constant 0 : index
    %c0_22 = arith.constant 0 : index
    %c0_23 = arith.constant 0 : index
    %46 = vector.load %arg4[%c0_21, %c0_22, %c0_23] : memref<3x128x128xbf16, #tpu.memory_space<vmem>>, vector<1x128x128xbf16>
    %47 = vector.shape_cast %46 : vector<1x128x128xbf16> to vector<128x128xbf16>
    %cst_24 = arith.constant dense<0.000000e+00> : vector<32x128xf32>
    %48 = tpu.matmul %45, %47, %cst_24 {dimension_numbers = #tpu.dot_dimension_numbers<[1], [0], [0], [1], [0, 0, 1, 1], [], []>} : vector<32x128xbf16>, vector<128x128xbf16>, vector<32x128xf32> -> vector<32x128xf32>
    %c1_25 = arith.constant 1 : index
    %c0_26 = arith.constant 0 : index
    %c0_27 = arith.constant 0 : index
    %49 = vector.load %arg4[%c1_25, %c0_26, %c0_27] : memref<3x128x128xbf16, #tpu.memory_space<vmem>>, vector<1x128x128xbf16>
    %50 = vector.shape_cast %49 : vector<1x128x128xbf16> to vector<128x128xbf16>
    %cst_28 = arith.constant dense<0.000000e+00> : vector<32x128xf32>
    %51 = tpu.matmul %45, %50, %cst_28 {dimension_numbers = #tpu.dot_dimension_numbers<[1], [0], [0], [1], [0, 0, 1, 1], [], []>} : vector<32x128xbf16>, vector<128x128xbf16>, vector<32x128xf32> -> vector<32x128xf32>
    %c2_29 = arith.constant 2 : index
    %c0_30 = arith.constant 0 : index
    %c0_31 = arith.constant 0 : index
    %52 = vector.load %arg4[%c2_29, %c0_30, %c0_31] : memref<3x128x128xbf16, #tpu.memory_space<vmem>>, vector<1x128x128xbf16>
    %53 = vector.shape_cast %52 : vector<1x128x128xbf16> to vector<128x128xbf16>
    %cst_32 = arith.constant dense<0.000000e+00> : vector<32x128xf32>
    %54 = tpu.matmul %45, %53, %cst_32 {dimension_numbers = #tpu.dot_dimension_numbers<[1], [0], [0], [1], [0, 0, 1, 1], [], []>} : vector<32x128xbf16>, vector<128x128xbf16>, vector<32x128xf32> -> vector<32x128xf32>
    %c1_i32_33 = arith.constant 1 : i32
    %55 = tpu.dynamic_rotate %48 by %c1_i32_33 dim 0 : vector<32x128xf32>, i32 -> vector<32x128xf32>
    %cst_34 = arith.constant 0.000000e+00 : f32
    %56 = vector.broadcast %cst_34 : f32 to vector<32x128xf32>
    %57 = arith.select %20, %56, %55 : vector<32x128xi1>, vector<32x128xf32>
    %c31_i32_35 = arith.constant 31 : i32
    %58 = tpu.dynamic_rotate %54 by %c31_i32_35 dim 0 : vector<32x128xf32>, i32 -> vector<32x128xf32>
    %cst_36 = arith.constant 0.000000e+00 : f32
    %59 = vector.broadcast %cst_36 : f32 to vector<32x128xf32>
    %60 = arith.select %22, %59, %58 : vector<32x128xi1>, vector<32x128xf32>
    %61 = arith.addf %57, %51 : vector<32x128xf32>
    %62 = arith.addf %61, %60 : vector<32x128xf32>
    %c0_37 = arith.constant 0 : index
    %c0_38 = arith.constant 0 : index
    %63 = vector.load %arg5[%c0_37, %c0_38] : memref<1x128xf32, #tpu.memory_space<vmem>>, vector<1x128xf32>
    %64 = vector.broadcast %63 : vector<1x128xf32> to vector<32x128xf32>
    %65 = arith.addf %62, %64 : vector<32x128xf32>
    %66 = arith.extf %1 : vector<32x128xbf16> to vector<32x128xf32>
    %67 = arith.addf %65, %66 : vector<32x128xf32>
    %cst_39 = arith.constant 0.000000e+00 : f32
    %68 = vector.broadcast %cst_39 : f32 to vector<32x128xf32>
    %69 = arith.maximumf %67, %68 : vector<32x128xf32>
    %70 = vector.shape_cast %69 : vector<32x128xf32> to vector<2x16x128xf32>
    %c0_40 = arith.constant 0 : index
    %c0_41 = arith.constant 0 : index
    %c0_42 = arith.constant 0 : index
    %71 = vector.load %arg6[%c0_40, %c0_41, %c0_42] : memref<2x16x128xf32, #tpu.memory_space<vmem>>, vector<2x16x128xf32>
    tpu.vector_store %arg6[%c0_40, %c0_41, %c0_42], %70 {strides = array<i32>} : memref<2x16x128xf32, #tpu.memory_space<vmem>>, vector<2x16x128xf32>,
    return
  }
  func.func @transform_0(%arg0: i32) -> (i32, i32, i32) {
    %c0_i32 = arith.constant 0 : i32
    %c0_i32_0 = arith.constant 0 : i32
    %c0_i32_1 = arith.constant 0 : i32
    %c0_i32_2 = arith.constant 0 : i32
    return %c0_i32, %c0_i32_0, %c0_i32_1 : i32, i32, i32
  }
  func.func @transform_1(%arg0: i32) -> (i32, i32, i32) {
    %c0_i32 = arith.constant 0 : i32
    %c0_i32_0 = arith.constant 0 : i32
    %c0_i32_1 = arith.constant 0 : i32
    %c0_i32_2 = arith.constant 0 : i32
    return %c0_i32, %c0_i32_0, %c0_i32_1 : i32, i32, i32
  }
  func.func @transform_2(%arg0: i32) -> (i32, i32) {
    %c0_i32 = arith.constant 0 : i32
    %c0_i32_0 = arith.constant 0 : i32
    %c0_i32_1 = arith.constant 0 : i32
    return %c0_i32, %c0_i32_0 : i32, i32
  }
  func.func @transform_3(%arg0: i32) -> (i32, i32, i32) {
    %c0_i32 = arith.constant 0 : i32
    %c0_i32_0 = arith.constant 0 : i32
    %c0_i32_1 = arith.constant 0 : i32
    %c0_i32_2 = arith.constant 0 : i32
    return %c0_i32, %c0_i32_0, %c0_i32_1 : i32, i32, i32
  }
  func.func @transform_4(%arg0: i32) -> (i32, i32) {
    %c0_i32 = arith.constant 0 : i32
    %c0_i32_0 = arith.constant 0 : i32
    %c0_i32_1 = arith.constant 0 : i32
    return %c0_i32, %c0_i32_0 : i32, i32
  }
  func.func @transform_5(%arg0: i32) -> (i32, i32, i32) {
    %c0_i32 = arith.constant 0 : i32
    %c0_i32_0 = arith.constant 0 : i32
    %c0_i32_1 = arith.constant 0 : i32
    %c0_i32_2 = arith.constant 0 : i32
    return %c0_i32, %c0_i32_0, %c0_i32_1 : i32, i32, i32
  }
}

</mosaic_0001>

<bundles_post_ra>
// kernel: tile.0
= control target key start
LH: loop header
LB: loop body
LE: loop exit
PB: predicated region body
PF: predicated region fallthrough
CT: control target
= control target key end

     0   :  { %s6562_s18 = smov 3  ;;  %s6564_s19 = smov 12  ;;  %vm2053_vm0 = vcmask 1043458   ;;  %vm2057_vm1 = vcmask 1045508   ;;  %vm2061_vm2 = vcmask 1047558   ;;  %vm2248_vm3 = vcmask 7168   ;;  %s7918_s0 = inlined_call_operand.vmem [shape: bf16[16,17,8,8], index: 0, kind: input, shape index: {}]   ;;  %s7919_s1 = inlined_call_operand.vmem [shape: bf16[272,8,8], index: 1, kind: output, shape index: {}]  }
   0x1   :  { %v6532_v0 = vld [vmem:[%s7918_s0 + $0x1b8] sm:$0xff]   ;;  %v6537_v1 = vld [vmem:[%s7918_s0 + $0x1b0] sm:$0xff]   ;;  %v6542_v2 = vld [vmem:[%s7918_s0 + $0x1a8] sm:$0xff]   ;;  %s6582_s26 = smov 48  ;;  %s6584_s27 = smov 192  ;;  %vm2616_vm4 = vcmask 72704  }
   0x2   :  { %v5834_v3 = vunpack.c.h.bf16 %v6532_v0  ;;  %v5838_v4 = vunpack.c.h.bf16 %v6537_v1  ;;  %v5842_v5 = vunpack.c.h.bf16 %v6542_v2  ;;  %v6550_v6 = vld [vmem:[%s7918_s0 + $0x1a0] sm:$0xff]   ;;  %v6555_v7 = vld [vmem:[%s7918_s0 + $0x198] sm:$0xff]   ;;  %v6560_v8 = vld [vmem:[%s7918_s0 + $0x190] sm:$0xff]   ;;  %s6599_s5 = smov 3  ;;  %s6601_s6 = smov 12  ;;  %v5833_v0 = vunpack.c.l.bf16 %v6532_v0 }
   0x3   :  { %v5846_v9 = vunpack.c.h.bf16 %v6550_v6  ;;  %v5850_v10 = vunpack.c.h.bf16 %v6555_v7  ;;  %v5854_v11 = vunpack.c.h.bf16 %v6560_v8  ;;  %v6572_v12 = vld [vmem:[%s7918_s0 + $0x188] sm:$0xff]   ;;  %v6577_v13 = vld [vmem:[%s7918_s0 + $0x180] sm:$0xff]   ;;  %v6131_v14 = vld [vmem:[%s7918_s0 + $0x178] sm:$0xff]   ;;  %s6619_s13 = smov 48  ;;  %s6621_s14 = smov 192  ;;  %v5837_v1 = vunpack.c.l.bf16 %v6537_v1 }
   0x4   :  { %276 = vst [vmem:[#allocation1 + $0x378] sm:$0xff] %v5834_v3  ;;  %308 = vst [vmem:[#allocation1 + $0x368] sm:$0xff] %v5838_v4  ;;  %v5858_v15 = vunpack.c.h.bf16 %v6572_v12  ;;  %v5862_v16 = vunpack.c.h.bf16 %v6577_v13  ;;  %v5866_v17 = vunpack.c.h.bf16 %v6131_v14  ;;  %v6132_v18 = vld [vmem:[%s7918_s0 + $0x170] sm:$0xff]   ;;  %v6133_v19 = vld [vmem:[%s7918_s0 + $0x168] sm:$0xff]   ;;  %v5865_v21 = vunpack.c.l.bf16 %v6131_v14  ;;  %s6641_s23 = smov 3  ;;  %s6661_s3 = smov 12 }
   0x5   :  { %340 = vst [vmem:[#allocation1 + $0x358] sm:$0xff] %v5842_v5  ;;  %v6597_v20 = vld [vmem:[%s7918_s0 + $0x160] sm:$0xff]   ;;  %372 = vst [vmem:[#allocation1 + $0x348] sm:$0xff] %v5846_v9  ;;  %v5870_v22 = vunpack.c.h.bf16 %v6132_v18  ;;  %v5874_v23 = vunpack.c.h.bf16 %v6133_v19  ;;  %v6607_v25 = vld [vmem:[%s7918_s0 + $0x158] sm:$0xff]   ;;  %v5869_v28 = vunpack.c.l.bf16 %v6132_v18  ;;  %v5873_v35 = vunpack.c.l.bf16 %v6133_v19  ;;  %s6663_s4 = smov 48  ;;  %s6684_s15 = smov 192 }
   0x6   :  { %404 = vst [vmem:[#allocation1 + $0x338] sm:$0xff] %v5850_v10  ;;  %436 = vst [vmem:[#allocation1 + $0x328] sm:$0xff] %v5854_v11  ;;  %v5878_v24 = vunpack.c.h.bf16 %v6597_v20  ;;  %v6612_v26 = vld [vmem:[%s7918_s0 + $0x150] sm:$0xff]   ;;  %v6617_v27 = vld [vmem:[%s7918_s0 + $0x148] sm:$0xff]   ;;  %v5882_v29 = vunpack.c.h.bf16 %v6607_v25  ;;  %v5877_v42 = vunpack.c.l.bf16 %v6597_v20  ;;  %s6686_s16 = smov 3  ;;  %v5881_v49 = vunpack.c.l.bf16 %v6607_v25  ;;  %s6707_s28 = smov 12 }
   0x7   :  { %468 = vst [vmem:[#allocation1 + $0x318] sm:$0xff] %v5858_v15  ;;  %500 = vst [vmem:[#allocation1 + $0x308] sm:$0xff] %v5862_v16  ;;  %v5886_v30 = vunpack.c.h.bf16 %v6612_v26  ;;  %v5890_v31 = vunpack.c.h.bf16 %v6617_v27  ;;  %v6629_v32 = vld [vmem:[%s7918_s0 + $0x140] sm:$0xff]   ;;  %v6634_v33 = vld [vmem:[%s7918_s0 + $0xb8] sm:$0xff]   ;;  %s6709_s29 = smov 48  ;;  %v5885_v56 = vunpack.c.l.bf16 %v6612_v26  ;;  %s6730_s11 = smov 192  ;;  %v5889_v63 = vunpack.c.l.bf16 %v6617_v27 }
   0x8   :  { %532 = vst [vmem:[#allocation1 + $0x2f8] sm:$0xff] %v5866_v17  ;;  %v6639_v34 = vld [vmem:[%s7918_s0 + $0xb0] sm:$0xff]   ;;  %548 = vst [vmem:[#allocation1 + $0x2f0] sm:$0xff] %v5865_v21  ;;  %v5894_v36 = vunpack.c.h.bf16 %v6629_v32  ;;  %v5962_v37 = vunpack.c.h.bf16 %v6634_v33  ;;  %v6649_v39 = vld [vmem:[%s7918_s0 + $0xa8] sm:$0xff]   ;;  %s6732_s12 = smov 3  ;;  %s6753_s30 = smov 12  ;;  %v5893_v14 = vunpack.c.l.bf16 %v6629_v32  ;;  %v5841_v2 = vunpack.c.l.bf16 %v6542_v2 }
   0x9   :  { %564 = vst [vmem:[#allocation1 + $0x2e8] sm:$0xff] %v5870_v22  ;;  %596 = vst [vmem:[#allocation1 + $0x2d8] sm:$0xff] %v5874_v23  ;;  %v5966_v38 = vunpack.c.h.bf16 %v6639_v34  ;;  %v6654_v40 = vld [vmem:[%s7918_s0 + $0xa0] sm:$0xff]   ;;  %v6659_v41 = vld [vmem:[%s7918_s0 + $0x98] sm:$0xff]   ;;  %v5970_v43 = vunpack.c.h.bf16 %v6649_v39  ;;  %s6755_s2 = smov 48  ;;  %s6776_s21 = smov 192  ;;  %v5845_v6 = vunpack.c.l.bf16 %v6550_v6  ;;  %v5849_v7 = vunpack.c.l.bf16 %v6555_v7 }
   0xa   :  { %628 = vst [vmem:[#allocation1 + $0x2c8] sm:$0xff] %v5878_v24  ;;  %580 = vst [vmem:[#allocation1 + $0x2e0] sm:$0xff] %v5869_v28  ;;  %v5974_v44 = vunpack.c.h.bf16 %v6654_v40  ;;  %v5978_v45 = vunpack.c.h.bf16 %v6659_v41  ;;  %v6672_v46 = vld [vmem:[%s7918_s0 + $0x90] sm:$0xff]   ;;  %v6677_v47 = vld [vmem:[%s7918_s0 + $0x88] sm:$0xff]   ;;  %s6778_s22 = smov 3  ;;  %s6800_s24 = smov 12  ;;  %v5853_v8 = vunpack.c.l.bf16 %v6560_v8  ;;  %v5857_v12 = vunpack.c.l.bf16 %v6572_v12 }
   0xb   :  { %660 = vst [vmem:[#allocation1 + $0x2b8] sm:$0xff] %v5882_v29  ;;  %692 = vst [vmem:[#allocation1 + $0x2a8] sm:$0xff] %v5886_v30  ;;  %v6682_v48 = vld [vmem:[%s7918_s0 + $0x80] sm:$0xff]   ;;  %v5982_v50 = vunpack.c.h.bf16 %v6672_v46  ;;  %v5986_v51 = vunpack.c.h.bf16 %v6677_v47  ;;  %v6695_v53 = vld [vmem:[%s7918_s0 + $0x78] sm:$0xff]   ;;  %s6802_s25 = smov 48  ;;  %s6861_s7 = smov 192  ;;  %v5861_v13 = vunpack.c.l.bf16 %v6577_v13  ;;  %v5961_v33 = vunpack.c.l.bf16 %v6634_v33 }
   0xc   :  { %724 = vst [vmem:[#allocation1 + $0x298] sm:$0xff] %v5890_v31  ;;  %612 = vst [vmem:[#allocation1 + $0x2d0] sm:$0xff] %v5873_v35  ;;  %v5990_v52 = vunpack.c.h.bf16 %v6682_v48  ;;  %v6700_v54 = vld [vmem:[%s7918_s0 + $0x70] sm:$0xff]   ;;  %v6705_v55 = vld [vmem:[%s7918_s0 + $0x68] sm:$0xff]   ;;  %v5994_v57 = vunpack.c.h.bf16 %v6695_v53  ;;  %v5993_v21 = vunpack.c.l.bf16 %v6695_v53  ;;  %s6863_s8 = smov 3  ;;  %s6947_s9 = smov 192  ;;  %v5965_v34 = vunpack.c.l.bf16 %v6639_v34 }
   0xd   :  { %756 = vst [vmem:[#allocation1 + $0x288] sm:$0xff] %v5894_v36  ;;  %1300 = vst [vmem:[#allocation1 + $0x178] sm:$0xff] %v5962_v37  ;;  %v5998_v58 = vunpack.c.h.bf16 %v6700_v54  ;;  %v6002_v59 = vunpack.c.h.bf16 %v6705_v55  ;;  %v6718_v60 = vld [vmem:[%s7918_s0 + $0x60] sm:$0xff]   ;;  %v6723_v61 = vld [vmem:[%s7918_s0 + $0x58] sm:$0xff]   ;;  %v5997_v28 = vunpack.c.l.bf16 %v6700_v54  ;;  %v6001_v35 = vunpack.c.l.bf16 %v6705_v55  ;;  %s6949_s10 = smov 3  ;;  %s6983_s17 = smov 192 }
   0xe   :  { %1332 = vst [vmem:[#allocation1 + $0x168] sm:$0xff] %v5966_v38  ;;  %644 = vst [vmem:[#allocation1 + $0x2c0] sm:$0xff] %v5877_v42  ;;  %v6728_v62 = vld [vmem:[%s7918_s0 + $0x50] sm:$0xff]   ;;  %v6006_v3 = vunpack.c.h.bf16 %v6718_v60  ;;  %v6010_v4 = vunpack.c.h.bf16 %v6723_v61  ;;  %v6741_v9 = vld [vmem:[%s7918_s0 + $0x48] sm:$0xff]   ;;  %v6005_v36 = vunpack.c.l.bf16 %v6718_v60  ;;  %v6009_v37 = vunpack.c.l.bf16 %v6723_v61  ;;  %s6985_s20 = smov 3 }
   0xf   :  { %1364 = vst [vmem:[#allocation1 + $0x158] sm:$0xff] %v5970_v43  ;;  %1396 = vst [vmem:[#allocation1 + $0x148] sm:$0xff] %v5974_v44  ;;  %v6014_v5 = vunpack.c.h.bf16 %v6728_v62  ;;  %v6746_v10 = vld [vmem:[%s7918_s0 + $0x40] sm:$0xff]   ;;  %v6751_v11 = vld [vmem:[%s7918_s0 + $0x1f8] sm:$0xff]   ;;  %v6018_v15 = vunpack.c.h.bf16 %v6741_v9  ;;  %v5969_v39 = vunpack.c.l.bf16 %v6649_v39  ;;  %v5973_v40 = vunpack.c.l.bf16 %v6654_v40 }
  0x10   :  { %1428 = vst [vmem:[#allocation1 + $0x138] sm:$0xff] %v5978_v45  ;;  %676 = vst [vmem:[#allocation1 + $0x2b0] sm:$0xff] %v5881_v49  ;;  %v6022_v16 = vunpack.c.h.bf16 %v6746_v10  ;;  %v5802_v17 = vunpack.c.h.bf16 %v6751_v11  ;;  %v6764_v18 = vld [vmem:[%s7918_s0 + $0x1f0] sm:$0xff]   ;;  %v6769_v19 = vld [vmem:[%s7918_s0 + $0x1e8] sm:$0xff]   ;;  %v5801_v11 = vunpack.c.l.bf16 %v6751_v11  ;;  %v5977_v41 = vunpack.c.l.bf16 %v6659_v41 }
  0x11   :  { %1460 = vst [vmem:[#allocation1 + $0x128] sm:$0xff] %v5982_v50  ;;  %1492 = vst [vmem:[#allocation1 + $0x118] sm:$0xff] %v5986_v51  ;;  %v6774_v20 = vld [vmem:[%s7918_s0 + $0x1e0] sm:$0xff]   ;;  %v2260_v22 = vld [vmem:[#allocation1 + $0x30f] ss:$16 sm:%s6641_s23]   ;;  %v5806_v25 = vunpack.c.h.bf16 %v6764_v18  ;;  %v5810_v26 = vunpack.c.h.bf16 %v6769_v19  ;;  %s6823_s23 = smov 192  ;;  %v6013_v50 = vunpack.c.l.bf16 %v6728_v62  ;;  %v5805_v18 = vunpack.c.l.bf16 %v6764_v18 }
  0x12   :  { %1524 = vst [vmem:[#allocation1 + $0x108] sm:$0xff] %v5990_v52  ;;  %708 = vst [vmem:[#allocation1 + $0x2a0] sm:$0xff] %v5885_v56  ;;  %v2263_v23 = vld [vmem:[#allocation1 + $0x30f] ss:$16 sm:%s6661_s3]   ;;  %v5814_v27 = vunpack.c.h.bf16 %v6774_v20  ;;  %v6798_v32 = vld [vmem:[%s7918_s0 + $0x1d0] sm:$0xff]   ;;  %s6825_s3 = smov 3  ;;  %v5809_v19 = vunpack.c.l.bf16 %v6769_v19  ;;  %v5813_v20 = vunpack.c.l.bf16 %v6774_v20  ;;  %v5981_v46 = vunpack.c.l.bf16 %v6672_v46 }
  0x13   :  { %1556 = vst [vmem:[#allocation1 + $0xf8] sm:$0xff] %v5994_v57  ;;  %1588 = vst [vmem:[#allocation1 + $0xe8] sm:$0xff] %v5998_v58  ;;  %v2268_v24 = vld [vmem:[#allocation1 + $0x30f] ss:$16 sm:%s6663_s4]   ;;  %v2265_v29 = vsel %vm2053_vm0, %v2263_v23, %v2260_v22  ;;  %v5822_v43 = vunpack.c.h.bf16 %v6798_v32  ;;  %v6818_v45 = vld [vmem:[%s7918_s0 + $0x1c0] sm:$0xff]   ;;  %s6842_s4 = smov 12  ;;  %v5821_v32 = vunpack.c.l.bf16 %v6798_v32  ;;  %v5985_v47 = vunpack.c.l.bf16 %v6677_v47 }
  0x14   :  { %1620 = vst [vmem:[#allocation1 + $0xd8] sm:$0xff] %v6002_v59  ;;  %740 = vst [vmem:[#allocation1 + $0x290] sm:$0xff] %v5889_v63  ;;  %v2273_v30 = vld [vmem:[#allocation1 + $0x30f] ss:$16 sm:%s6684_s15]   ;;  %v2270_v38 = vsel %vm2057_vm1, %v2268_v24, %v2265_v29  ;;  %v5830_v56 = vunpack.c.h.bf16 %v6818_v45  ;;  %v6140_v60 = vld [vmem:[%s7918_s0 + $0x130] sm:$0xff]   ;;  %s6844_s15 = smov 48  ;;  %v6017_v63 = vunpack.c.l.bf16 %v6741_v9  ;;  %v5829_v45 = vunpack.c.l.bf16 %v6818_v45 }
  0x15   :  { %1652 = vst [vmem:[#allocation1 + $0xc8] sm:$0xff] %v6006_v3  ;;  %1684 = vst [vmem:[#allocation1 + $0xb8] sm:$0xff] %v6010_v4  ;;  %v6793_v31 = vld [vmem:[%s7918_s0 + $0x1d8] sm:$0xff]   ;;  %v6813_v44 = vld [vmem:[%s7918_s0 + $0x1c8] sm:$0xff]   ;;  %v2275_v51 = vsel %vm2061_vm2, %v2273_v30, %v2270_v38  ;;  %v6021_v3 = vunpack.c.l.bf16 %v6746_v10  ;;  %v5989_v48 = vunpack.c.l.bf16 %v6682_v48  ;;  %vm2252_vm5 = vcmask 130048  }
  0x16   :  { %1716 = vst [vmem:[#allocation1 + $0xa8] sm:$0xff] %v6014_v5  ;;  %772 = vst [vmem:[#allocation1 + $0x280] sm:$0xff] %v5893_v14  ;;  %v5818_v42 = vunpack.c.h.bf16 %v6793_v31  ;;  %v6139_v49 = vld [vmem:[%s7918_s0 + $0x138] sm:$0xff]   ;;  %v5826_v55 = vunpack.c.h.bf16 %v6813_v44  ;;  %v6141_v61 = vld [vmem:[%s7918_s0 + $0x128] sm:$0xff]   ;;  %v5902_v14 = vunpack.c.h.bf16 %v6140_v60  ;;  %v5817_v31 = vunpack.c.l.bf16 %v6793_v31 }
  0x17   :  { %1748 = vst [vmem:[#allocation1 + $0x98] sm:$0xff] %v6018_v15  ;;  %1780 = vst [vmem:[#allocation1 + $0x88] sm:$0xff] %v6022_v16  ;;  %v2278_v52 = vld [vmem:[#allocation1 + $0x28f] ss:$16 sm:%s6686_s16]   ;;  %v5898_v57 = vunpack.c.h.bf16 %v6139_v49  ;;  %v5897_v62 = vunpack.c.l.bf16 %v6139_v49  ;;  %v5906_v15 = vunpack.c.h.bf16 %v6141_v61  ;;  %v5901_v16 = vunpack.c.l.bf16 %v6140_v60  ;;  %v6142_v23 = vld [vmem:[%s7918_s0 + $0x120] sm:$0xff]   ;;  %s6924_s16 = smov 12 }
  0x18   :  { %20 = vst [vmem:[#allocation1 + $0x3f8] sm:$0xff] %v5802_v17  ;;  %1572 = vst [vmem:[#allocation1 + $0xf0] sm:$0xff] %v5993_v21  ;;  %v2281_v53 = vld [vmem:[#allocation1 + $0x28f] ss:$16 sm:%s6707_s28]   ;;  %v6144_v30 = vld [vmem:[%s7918_s0 + $0x110] sm:$0xff]   ;;  %s6926_s28 = smov 48  ;;  %v5825_v44 = vunpack.c.l.bf16 %v6813_v44 }
  0x19   :  { %52 = vst [vmem:[#allocation1 + $0x3e8] sm:$0xff] %v5806_v25  ;;  %84 = vst [vmem:[#allocation1 + $0x3d8] sm:$0xff] %v5810_v26  ;;  %v2286_v54 = vld [vmem:[#allocation1 + $0x28f] ss:$16 sm:%s6709_s29]   ;;  %v2283_v58 = vsel %vm2053_vm0, %v2281_v53, %v2278_v52  ;;  %v5905_v25 = vunpack.c.l.bf16 %v6141_v61  ;;  %s6881_s29 = smov 12  ;;  %v5918_v49 = vunpack.c.h.bf16 %v6144_v30  ;;  %vm2255_vm6 = vcmask 1048568  }
  0x1a   :  { %116 = vst [vmem:[#allocation1 + $0x3c8] sm:$0xff] %v5814_v27  ;;  %1604 = vst [vmem:[#allocation1 + $0xe0] sm:$0xff] %v5997_v28  ;;  %v2291_v59 = vld [vmem:[#allocation1 + $0x28f] ss:$16 sm:%s6730_s11]   ;;  %v2288_v10 = vsel %vm2057_vm1, %v2286_v54, %v2283_v58  ;;  %v5910_v28 = vunpack.c.h.bf16 %v6142_v23  ;;  %s6883_s11 = smov 48  ;;  %v5917_v58 = vunpack.c.l.bf16 %v6144_v30  ;;  %vm2620_vm7 = vcmask 64512  }
  0x1b   :  { %1636 = vst [vmem:[#allocation1 + $0xd0] sm:$0xff] %v6001_v35  ;;  %1668 = vst [vmem:[#allocation1 + $0xc0] sm:$0xff] %v6005_v36  ;;  %v2214_v4 = vld [vmem:[#allocation1 + $0x10f] ss:$16 sm:%s6562_s18]   ;;  %v2293_v22 = vsel %vm2061_vm2, %v2291_v59, %v2288_v10  ;;  %v6879_v36 = vld [vmem:[%s7918_s0 + $0x100] sm:$0xff]   ;;  %s6902_s18 = smov 192 }
  0x1c   :  { %1700 = vst [vmem:[#allocation1 + $0xb0] sm:$0xff] %v6009_v37  ;;  %148 = vst [vmem:[#allocation1 + $0x3b8] sm:$0xff] %v5818_v42  ;;  %v2217_v5 = vld [vmem:[#allocation1 + $0x10f] ss:$16 sm:%s6564_s19]   ;;  %v6868_v27 = vsel %vm2248_vm3, %v2293_v22, %v2275_v51  ;;  %v5926_v51 = vunpack.c.h.bf16 %v6879_v36  ;;  %s6904_s19 = smov 3  ;;  %v5925_v36 = vunpack.c.l.bf16 %v6879_v36  ;;  %vm2967_vm8 = vcmask 1040240  }
  0x1d   :  { %180 = vst [vmem:[#allocation1 + $0x3a8] sm:$0xff] %v5822_v43  ;;  %1732 = vst [vmem:[#allocation1 + $0xa0] sm:$0xff] %v6013_v50  ;;  %v2222_v9 = vld [vmem:[#allocation1 + $0x10f] ss:$16 sm:%s6582_s26]   ;;  %v2219_v17 = vsel %vm2053_vm0, %v2217_v5, %v2214_v4  ;;  %s6966_s26 = smov 12  ;;  %vm3334_vm9 = vcmask 900840  }
  0x1e   :  { %212 = vst [vmem:[#allocation1 + $0x398] sm:$0xff] %v5826_v55  ;;  %244 = vst [vmem:[#allocation1 + $0x388] sm:$0xff] %v5830_v56  ;;  %v2227_v21 = vld [vmem:[#allocation1 + $0x10f] ss:$16 sm:%s6584_s27]   ;;  %v2224_v26 = vsel %vm2057_vm1, %v2222_v9, %v2219_v17  ;;  %v6900_v55 = vld [vmem:[%s7918_s0 + $0xf0] sm:$0xff]   ;;  %v5909_v56 = vunpack.c.l.bf16 %v6142_v23  ;;  %s6968_s27 = smov 48 }
  0x1f   :  { %788 = vst [vmem:[#allocation1 + $0x278] sm:$0xff] %v5898_v57  ;;  %v6143_v24 = vld [vmem:[%s7918_s0 + $0x118] sm:$0xff]   ;;  %804 = vst [vmem:[#allocation1 + $0x270] sm:$0xff] %v5897_v62  ;;  %v6145_v35 = vld [vmem:[%s7918_s0 + $0x108] sm:$0xff]   ;;  %v2229_v37 = vsel %vm2061_vm2, %v2227_v21, %v2224_v26  ;;  %v5934_v61 = vunpack.c.h.bf16 %v6900_v55  ;;  %v5933_v55 = vunpack.c.l.bf16 %v6900_v55  ;;  %vm2063_vm10 = vcmask 138240  }
  0x20   :  { %1764 = vst [vmem:[#allocation1 + $0x90] sm:$0xff] %v6017_v63  ;;  %1796 = vst [vmem:[#allocation1 + $0x80] sm:$0xff] %v6021_v3  ;;  %v5914_v29 = vunpack.c.h.bf16 %v6143_v24  ;;  %v2232_v38 = vld [vmem:[#allocation1 + $0x8f] ss:$16 sm:%s6599_s5]   ;;  %v5922_v50 = vunpack.c.h.bf16 %v6145_v35  ;;  %v5913_v57 = vunpack.c.l.bf16 %v6143_v24  ;;  %v6917_v63 = vld [vmem:[%s7918_s0 + $0xe0] sm:$0xff]   ;;  %v5921_v4 = vunpack.c.l.bf16 %v6145_v35  ;;  %s6504_s5 = smov 127  }
  0x21   :  { %820 = vst [vmem:[#allocation1 + $0x268] sm:$0xff] %v5902_v14  ;;  %852 = vst [vmem:[#allocation1 + $0x258] sm:$0xff] %v5906_v15  ;;  %v2235_v42 = vld [vmem:[#allocation1 + $0x8f] ss:$16 sm:%s6601_s6]   ;;  %v5942_v10 = vunpack.c.h.bf16 %v6917_v63  ;;  %v6935_v15 = vld [vmem:[%s7918_s0 + $0xd0] sm:$0xff]   ;;  %v5941_v63 = vunpack.c.l.bf16 %v6917_v63  ;;  %s2594_s6 = smov 192 }
  0x22   :  { %836 = vst [vmem:[#allocation1 + $0x260] sm:$0xff] %v5901_v16  ;;  %v2240_v43 = vld [vmem:[#allocation1 + $0x8f] ss:$16 sm:%s6619_s13]   ;;  %868 = vst [vmem:[#allocation1 + $0x250] sm:$0xff] %v5905_v25  ;;  %v2237_v52 = vsel %vm2053_vm0, %v2235_v42, %v2232_v38  ;;  %v6945_v17 = vld [vmem:[%s7918_s0 + $0xc0] sm:$0xff]   ;;  %v5950_v22 = vunpack.c.h.bf16 %v6935_v15  ;;  %v5949_v15 = vunpack.c.l.bf16 %v6935_v15  ;;  %s2599_s13 = smov 3 }
  0x23   :  { %36 = vst [vmem:[#allocation1 + $0x3f0] sm:$0xff] %v5801_v11  ;;  %v2245_v53 = vld [vmem:[#allocation1 + $0x8f] ss:$16 sm:%s6621_s14]   ;;  %884 = vst [vmem:[#allocation1 + $0x248] sm:$0xff] %v5910_v28  ;;  %v2242_v59 = vsel %vm2057_vm1, %v2240_v43, %v2237_v52  ;;  %v5958_v24 = vunpack.c.h.bf16 %v6945_v17  ;;  %v6172_v11 = vld [vmem:[%s7918_s0 + $0x30] sm:$0xff]   ;;  %v5957_v17 = vunpack.c.l.bf16 %v6945_v17  ;;  %s2602_s14 = smov 12 }
  0x24   :  { %916 = vst [vmem:[#allocation1 + $0x238] sm:$0xff] %v5914_v29  ;;  %v6895_v54 = vld [vmem:[%s7918_s0 + $0xf8] sm:$0xff]   ;;  %948 = vst [vmem:[#allocation1 + $0x228] sm:$0xff] %v5918_v49  ;;  %v6912_v62 = vld [vmem:[%s7918_s0 + $0xe8] sm:$0xff]   ;;  %v2247_v5 = vsel %vm2061_vm2, %v2245_v53, %v2242_v59  ;;  %v6030_v29 = vunpack.c.h.bf16 %v6172_v11  ;;  %vm2623_vm11 = vcmask 1048504   ;;  %vm3151_vm12 = vcmask 974640  }
  0x25   :  { %980 = vst [vmem:[#allocation1 + $0x218] sm:$0xff] %v5922_v50  ;;  %1012 = vst [vmem:[#allocation1 + $0x208] sm:$0xff] %v5926_v51  ;;  %v5930_v60 = vunpack.c.h.bf16 %v6895_v54  ;;  %v6922_v3 = vld [vmem:[%s7918_s0 + $0xd8] sm:$0xff]   ;;  %v5938_v9 = vunpack.c.h.bf16 %v6912_v62  ;;  %v6940_v16 = vld [vmem:[%s7918_s0 + $0xc8] sm:$0xff]   ;;  %v2249_v21 = vsel %vm2248_vm3, %v2247_v5, %v2229_v37  ;;  %v5929_v54 = vunpack.c.l.bf16 %v6895_v54 }
  0x26   :  { %v5946_v14 = vunpack.c.h.bf16 %v6922_v3  ;;  %900 = vst [vmem:[#allocation1 + $0x240] sm:$0xff] %v5909_v56  ;;  %932 = vst [vmem:[#allocation1 + $0x230] sm:$0xff] %v5913_v57  ;;  %v5954_v23 = vunpack.c.h.bf16 %v6940_v16  ;;  %v6171_v25 = vld [vmem:[%s7918_s0 + $0x38] sm:$0xff]   ;;  %v6964_v26 = vld [vmem:[%s7918_s0 + $0x28] sm:$0xff]   ;;  %v6204_v27 = vpack.i.bf16 %v6868_v27, %v2249_v21  ;;  %v5937_v62 = vunpack.c.l.bf16 %v6912_v62 }
  0x27   :  { %964 = vst [vmem:[#allocation1 + $0x220] sm:$0xff] %v5917_v58  ;;  %1044 = vst [vmem:[#allocation1 + $0x1f8] sm:$0xff] %v5930_v60  ;;  %v6026_v28 = vunpack.c.h.bf16 %v6171_v25  ;;  %v6034_v30 = vunpack.c.h.bf16 %v6964_v26  ;;  %v6174_v35 = vld [vmem:[%s7918_s0 + $0x20] sm:$0xff]   ;;  %v6175_v37 = vld [vmem:[%s7918_s0 + $0x18] sm:$0xff]   ;;  %v6025_v60 = vunpack.c.l.bf16 %v6171_v25  ;;  %v5945_v3 = vunpack.c.l.bf16 %v6922_v3 }
  0x28   :  { %1076 = vst [vmem:[#allocation1 + $0x1e8] sm:$0xff] %v5934_v61  ;;  %996 = vst [vmem:[#allocation1 + $0x210] sm:$0xff] %v5921_v4  ;;  %v6981_v38 = vld [vmem:[%s7918_s0 + $0x10] sm:$0xff]   ;;  %v6038_v42 = vunpack.c.h.bf16 %v6174_v35  ;;  %v6042_v43 = vunpack.c.h.bf16 %v6175_v37  ;;  %v6177_v50 = vld [vmem:[%s7918_s0 + $0x8] sm:$0xff]   ;;  %6205 = vrot.lane.b32.xlu0 %v6204_v27, %s6504_s5  ;;  %v6029_v61 = vunpack.c.l.bf16 %v6172_v11  ;;  %v6037_v21 = vunpack.c.l.bf16 %v6174_v35 }
  0x29   :  { %1108 = vst [vmem:[#allocation1 + $0x1d8] sm:$0xff] %v5938_v9  ;;  %1140 = vst [vmem:[#allocation1 + $0x1c8] sm:$0xff] %v5942_v10  ;;  %v6046_v49 = vunpack.c.h.bf16 %v6981_v38  ;;  %v6994_v51 = vld [vmem:[%s7918_s0] sm:$0xff]   ;;  %v2462_v52 = vld [vmem:[#allocation1 + $0x38f] ss:$16 sm:%s6863_s8]   ;;  %s6997_s0 = smov 12  ;;  %v6050_v53 = vunpack.c.h.bf16 %v6177_v50  ;;  %v6045_v27 = vunpack.c.l.bf16 %v6981_v38  ;;  %v5953_v16 = vunpack.c.l.bf16 %v6940_v16 }
  0x2a   :  { %1172 = vst [vmem:[#allocation1 + $0x1b8] sm:$0xff] %v5946_v14  ;;  %1204 = vst [vmem:[#allocation1 + $0x1a8] sm:$0xff] %v5950_v22  ;;  %s6999_s8 = smov 48  ;;  %v6054_v56 = vunpack.c.h.bf16 %v6994_v51  ;;  %v2465_v57 = vld [vmem:[#allocation1 + $0x38f] ss:$16 sm:%s6881_s29]   ;;  %v6033_v14 = vunpack.c.l.bf16 %v6964_v26  ;;  %v6041_v22 = vunpack.c.l.bf16 %v6175_v37  ;;  %s2520_s29 = smov 192 }
  0x2b   :  { %1236 = vst [vmem:[#allocation1 + $0x198] sm:$0xff] %v5954_v23  ;;  %1268 = vst [vmem:[#allocation1 + $0x188] sm:$0xff] %v5958_v24  ;;  %v2470_v58 = vld [vmem:[#allocation1 + $0x38f] ss:$16 sm:%s6883_s11]   ;;  %v2467_v4 = vsel %vm2053_vm0, %v2465_v57, %v2462_v52  ;;  %s2535_s11 = smov 3  ;;  %vm3518_vm13 = vcmask 835240  }
  0x2c   :  { %1812 = vst [vmem:[#allocation1 + $0x78] sm:$0xff] %v6026_v28  ;;  %1844 = vst [vmem:[#allocation1 + $0x68] sm:$0xff] %v6030_v29  ;;  %v2475_v59 = vld [vmem:[#allocation1 + $0x38f] ss:$16 sm:%s6902_s18]   ;;  %v2472_v11 = vsel %vm2057_vm1, %v2470_v58, %v2467_v4  ;;  %v6049_v28 = vunpack.c.l.bf16 %v6177_v50  ;;  %s2538_s18 = smov 12  ;;  %vm3701_vm14 = vcmask 761440  }
  0x2d   :  { %1876 = vst [vmem:[#allocation1 + $0x58] sm:$0xff] %v6034_v30  ;;  %1908 = vst [vmem:[#allocation1 + $0x48] sm:$0xff] %v6038_v42  ;;  %v2306_v5 = vld [vmem:[#allocation1 + $0x8f] ss:$16 sm:%s6904_s19]   ;;  %v2477_v35 = vsel %vm2061_vm2, %v2475_v59, %v2472_v11  ;;  %s2543_s19 = smov 48  ;;  %vm3885_vm15 = vcmask 695840  }
  0x2e   :  { %1940 = vst [vmem:[#allocation1 + $0x38] sm:$0xff] %v6042_v43  ;;  %1972 = vst [vmem:[#allocation1 + $0x28] sm:$0xff] %v6046_v49  ;;  %v2309_v9 = vld [vmem:[#allocation1 + $0x8f] ss:$16 sm:%s6924_s16]   ;;  %v6053_v43 = vunpack.c.l.bf16 %v6994_v51  ;;  %s2548_s16 = smov 192 }
  0x2f   :  { %v2314_v10 = vld [vmem:[#allocation1 + $0x8f] ss:$16 sm:%s6926_s28]   ;;  %1028 = vst [vmem:[#allocation1 + $0x200] sm:$0xff] %v5925_v36  ;;  %2004 = vst [vmem:[#allocation1 + $0x18] sm:$0xff] %v6050_v53  ;;  %v2311_v26 = vsel %vm2053_vm0, %v2309_v9, %v2306_v5  ;;  %s2553_s28 = smov 3 }
  0x30   :  { %2035 = vst [vmem:[#allocation1 + $0x8] sm:$0xff] %v6054_v56  ;;  %v2444_v23 = vld [vmem:[#allocation1 + $0x20f] ss:$16 sm:%s6825_s3]   ;;  %1828 = vst [vmem:[#allocation1 + $0x70] sm:$0xff] %v6025_v60  ;;  %v2316_v37 = vsel %vm2057_vm1, %v2314_v10, %v2311_v26  ;;  %s2364_s3 = smov 192 }
  0x31   :  { %v2447_v24 = vld [vmem:[#allocation1 + $0x20f] ss:$16 sm:%s6842_s4]   ;;  %1860 = vst [vmem:[#allocation1 + $0x60] sm:$0xff] %v6029_v61  ;;  %1892 = vst [vmem:[#allocation1 + $0x50] sm:$0xff] %v6033_v14  ;;  %s2369_s4 = smov 3 }
  0x32   :  { %v2452_v25 = vld [vmem:[#allocation1 + $0x20f] ss:$16 sm:%s6844_s15]   ;;  %v2449_v29 = vsel %vm2053_vm0, %v2447_v24, %v2444_v23  ;;  %1924 = vst [vmem:[#allocation1 + $0x40] sm:$0xff] %v6037_v21  ;;  %1956 = vst [vmem:[#allocation1 + $0x30] sm:$0xff] %v6041_v22  ;;  %s2372_s15 = smov 12 }
  0x33   :  { %v2457_v30 = vld [vmem:[#allocation1 + $0x20f] ss:$16 sm:%s6861_s7]   ;;  %v2454_v49 = vsel %vm2057_vm1, %v2452_v25, %v2449_v29  ;;  %1988 = vst [vmem:[#allocation1 + $0x20] sm:$0xff] %v6045_v27  ;;  %2020 = vst [vmem:[#allocation1 + $0x10] sm:$0xff] %v6049_v28  ;;  %s2377_s7 = smov 48 }
  0x34   :  { %v2319_v38 = vld [vmem:[#allocation1 + $0x8f] ss:$16 sm:%s6947_s9]   ;;  %v2459_v36 = vsel %vm2061_vm2, %v2457_v30, %v2454_v49  ;;  %2048 = vst [vmem:[#allocation1] sm:$0xff] %v6053_v43  ;;  %68 = vst [vmem:[#allocation1 + $0x3e0] sm:$0xff] %v5805_v18  ;;  %s2556_s9 = smov 12 }
  0x35   :  { %v2352_v42 = vld [vmem:[#allocation1 + $0x28f] ss:$16 sm:%s6985_s20]   ;;  %v7027_v50 = vsel %vm2061_vm2, %v2319_v38, %v2316_v37  ;;  %v7041_v61 = vsel %vm2248_vm3, %v2477_v35, %v2459_v36  ;;  %100 = vst [vmem:[#allocation1 + $0x3d0] sm:$0xff] %v5809_v19  ;;  %132 = vst [vmem:[#allocation1 + $0x3c0] sm:$0xff] %v5813_v20  ;;  %s2589_s20 = smov 48 }
  0x36   :  { %v2355_v51 = vld [vmem:[#allocation1 + $0x28f] ss:$16 sm:%s6997_s0]   ;;  %164 = vst [vmem:[#allocation1 + $0x3b0] sm:$0xff] %v5817_v31  ;;  %196 = vst [vmem:[#allocation1 + $0x3a0] sm:$0xff] %v5821_v32  ;;  %s2607_s0 = smov 48 }
  0x37   :  { %v2360_v52 = vld [vmem:[#allocation1 + $0x28f] ss:$16 sm:%s6999_s8]   ;;  %v2357_v53 = vsel %vm2053_vm0, %v2355_v51, %v2352_v42  ;;  %228 = vst [vmem:[#allocation1 + $0x390] sm:$0xff] %v5825_v44  ;;  %260 = vst [vmem:[#allocation1 + $0x380] sm:$0xff] %v5829_v45  ;;  %s2612_s8 = smov 192 }
  0x38   :  { %v2365_v56 = vld [vmem:[#allocation1 + $0x28f] ss:$16 sm:%s2364_s3]   ;;  %v2362_v4 = vsel %vm2057_vm1, %v2360_v52, %v2357_v53  ;;  %1060 = vst [vmem:[#allocation1 + $0x1f0] sm:$0xff] %v5929_v54  ;;  %1092 = vst [vmem:[#allocation1 + $0x1e0] sm:$0xff] %v5933_v55  ;;  %s2626_s3 = smov 3 }
  0x39   :  { %v2370_v57 = vld [vmem:[#allocation1 + $0x20f] ss:$16 sm:%s2369_s4]   ;;  %v2367_v10 = vsel %vm2061_vm2, %v2365_v56, %v2362_v4  ;;  %1124 = vst [vmem:[#allocation1 + $0x1d0] sm:$0xff] %v5937_v62  ;;  %1156 = vst [vmem:[#allocation1 + $0x1c0] sm:$0xff] %v5941_v63  ;;  %s2629_s4 = smov 12 }
  0x3a   :  { %v2416_v58 = vld [vmem:[#allocation1 + $0x18f] ss:$16 sm:%s6778_s22]   ;;  %s2382_s22 = smov 192  ;;  %1188 = vst [vmem:[#allocation1 + $0x1b0] sm:$0xff] %v5945_v3  ;;  %1220 = vst [vmem:[#allocation1 + $0x1a0] sm:$0xff] %v5949_v15 }
  0x3b   :  { %v2419_v59 = vld [vmem:[#allocation1 + $0x18f] ss:$16 sm:%s6800_s24]   ;;  %s7053_s24 = smov 3  ;;  %1252 = vst [vmem:[#allocation1 + $0x190] sm:$0xff] %v5953_v16  ;;  %1284 = vst [vmem:[#allocation1 + $0x180] sm:$0xff] %v5957_v17 }
  0x3c   :  { %v2424_v60 = vld [vmem:[#allocation1 + $0x18f] ss:$16 sm:%s6802_s25]   ;;  %v2421_v5 = vsel %vm2053_vm0, %v2419_v59, %v2416_v58  ;;  %292 = vst [vmem:[#allocation1 + $0x370] sm:$0xff] %v5833_v0  ;;  %324 = vst [vmem:[#allocation1 + $0x360] sm:$0xff] %v5837_v1  ;;  %s2510_s25 = smov 12 }
  0x3d   :  { %v2429_v9 = vld [vmem:[#allocation1 + $0x18f] ss:$16 sm:%s6823_s23]   ;;  %v2426_v22 = vsel %vm2057_vm1, %v2424_v60, %v2421_v5  ;;  %s2515_s23 = smov 48  ;;  %356 = vst [vmem:[#allocation1 + $0x350] sm:$0xff] %v5841_v2  ;;  %388 = vst [vmem:[#allocation1 + $0x340] sm:$0xff] %v5845_v6 }
  0x3e   :  { %v2373_v14 = vld [vmem:[#allocation1 + $0x20f] ss:$16 sm:%s2372_s15]   ;;  %v2431_v26 = vsel %vm2061_vm2, %v2429_v9, %v2426_v22  ;;  %420 = vst [vmem:[#allocation1 + $0x330] sm:$0xff] %v5849_v7  ;;  %452 = vst [vmem:[#allocation1 + $0x320] sm:$0xff] %v5853_v8  ;;  %v2595_v17 = vld [vmem:[#allocation1 + $0x87] ss:$16 sm:%s2594_s6]  }
  0x3f   :  { %v2378_v21 = vld [vmem:[#allocation1 + $0x20f] ss:$16 sm:%s2377_s7]   ;;  %v2375_v23 = vsel %vm2053_vm0, %v2373_v14, %v2370_v57  ;;  %484 = vst [vmem:[#allocation1 + $0x310] sm:$0xff] %v5857_v12  ;;  %516 = vst [vmem:[#allocation1 + $0x300] sm:$0xff] %v5861_v13  ;;  %s2634_s15 = smov 48  ;;  %s2639_s7 = smov 192 }
  0x40   :  { %v2398_v24 = vld [vmem:[#allocation1 + $0xf] ss:$16 sm:%s6732_s12]   ;;  %v2380_v27 = vsel %vm2057_vm1, %v2378_v21, %v2375_v23  ;;  %s2492_s12 = smov 12  ;;  %1316 = vst [vmem:[#allocation1 + $0x170] sm:$0xff] %v5961_v33  ;;  %1348 = vst [vmem:[#allocation1 + $0x160] sm:$0xff] %v5965_v34  ;;  %s2764_s6 = smov 3 }
  0x41   :  { %v2401_v25 = vld [vmem:[#allocation1 + $0xf] ss:$16 sm:%s6753_s30]   ;;  %s2497_s30 = smov 48  ;;  %1380 = vst [vmem:[#allocation1 + $0x150] sm:$0xff] %v5969_v39  ;;  %1412 = vst [vmem:[#allocation1 + $0x140] sm:$0xff] %v5973_v40 }
  0x42   :  { %v2406_v11 = vld [vmem:[#allocation1 + $0xf] ss:$16 sm:%s6755_s2]   ;;  %v2403_v28 = vsel %vm2053_vm0, %v2401_v25, %v2398_v24  ;;  %s2502_s2 = smov 192  ;;  %1444 = vst [vmem:[#allocation1 + $0x130] sm:$0xff] %v5977_v41  ;;  %1476 = vst [vmem:[#allocation1 + $0x120] sm:$0xff] %v5981_v46 }
  0x43   :  { %v2411_v29 = vld [vmem:[#allocation1 + $0xf] ss:$16 sm:%s6776_s21]   ;;  %v2408_v37 = vsel %vm2057_vm1, %v2406_v11, %v2403_v28  ;;  %s2507_s21 = smov 3  ;;  %1508 = vst [vmem:[#allocation1 + $0x110] sm:$0xff] %v5985_v47  ;;  %1540 = vst [vmem:[#allocation1 + $0x100] sm:$0xff] %v5989_v48 }
  0x44   :  { %v2324_v30 = vld [vmem:[#allocation1 + $0xf] ss:$16 sm:%s6949_s10]   ;;  %v2413_v51 = vsel %vm2061_vm2, %v2411_v29, %v2408_v37  ;;  %s2561_s10 = smov 48  ;;  %v2600_v37 = vld [vmem:[#allocation1 + $0x7] ss:$16 sm:%s2599_s13]   ;;  %s2767_s13 = smov 12 }
  0x45   :  { %v2327_v35 = vld [vmem:[#allocation1 + $0xf] ss:$16 sm:%s6966_s26]   ;;  %v2433_v36 = vsel %vm2248_vm3, %v2431_v26, %v2413_v51  ;;  %s2566_s26 = smov 192  ;;  %v2613_v51 = vld [vmem:[#allocation1 + $0x7] ss:$16 sm:%s2612_s8]   ;;  %s2782_s8 = smov 3 }
  0x46   :  { %v2329_v38 = vsel %vm2053_vm0, %v2327_v35, %v2324_v30  ;;  %v2332_v42 = vld [vmem:[#allocation1 + $0xf] ss:$16 sm:%s6968_s27]   ;;  %v6214_v31 = vpack.i.bf16 %v7041_v61, %v2433_v36  ;;  %s2581_s27 = smov 3  ;;  %v2590_v35 = vld [vmem:[#allocation1 + $0x87] ss:$16 sm:%s2589_s20]   ;;  %s2749_s20 = smov 192 }
  0x47   :  { %v2337_v43 = vld [vmem:[#allocation1 + $0xf] ss:$16 sm:%s6983_s17]   ;;  %v2334_v52 = vsel %vm2057_vm1, %v2332_v42, %v2329_v38  ;;  %v2582_v3 = vld [vmem:[#allocation1 + $0x87] ss:$16 sm:%s2581_s27]   ;;  %s2584_s17 = smov 12  ;;  %s2739_s27 = smov 12 }
  0x48   :  { %v2383_v49 = vld [vmem:[#allocation1 + $0x20f] ss:$16 sm:%s2382_s22]   ;;  %v2339_v53 = vsel %vm2061_vm2, %v2337_v43, %v2334_v52  ;;  %6215 = vrot.lane.b32.xlu1 %v6214_v31, %s6504_s5  ;;  %v2585_v30 = vld [vmem:[#allocation1 + $0x87] ss:$16 sm:%s2584_s17]   ;;  %s2647_s22 = smov 12  ;;  %s2744_s17 = smov 48 }
  0x49   :  { %v2385_v18 = vsel %vm2061_vm2, %v2383_v49, %v2380_v27  ;;  %v2490_v19 = vld [vmem:[#allocation1 + $0x18f] ss:$16 sm:%s7053_s24]   ;;  %v2341_v50 = vsel %vm2248_vm3, %v2339_v53, %v7027_v50  ;;  %v2587_v16 = vsel %vm2053_vm0, %v2585_v30, %v2582_v3  ;;  %v2603_v43 = vld [vmem:[#allocation1 + $0x7] ss:$16 sm:%s2602_s14]   ;;  %s2652_s24 = smov 48  ;;  %s2772_s14 = smov 48 }
  0x4a   :  { %v2387_v56 = vsel %vm2248_vm3, %v2385_v18, %v2367_v10  ;;  %v2493_v57 = vld [vmem:[#allocation1 + $0x18f] ss:$16 sm:%s2492_s12]   ;;  %v2592_v42 = vsel %vm2057_vm1, %v2590_v35, %v2587_v16  ;;  %v2608_v49 = vld [vmem:[#allocation1 + $0x7] ss:$16 sm:%s2607_s0]   ;;  %v2605_v1 = vsel %vm2053_vm0, %v2603_v43, %v2600_v37  ;;  %s2657_s12 = smov 192  ;;  %s2777_s0 = smov 192 }
  0x4b   :  { %v2498_v20 = vld [vmem:[#allocation1 + $0x18f] ss:$16 sm:%s2497_s30]   ;;  %v2495_v58 = vsel %vm2053_vm0, %v2493_v57, %v2490_v19  ;;  %v6209_v61 = vpack.i.bf16 %v2387_v56, %v2341_v50  ;;  %v2610_v52 = vsel %vm2057_vm1, %v2608_v49, %v2605_v1  ;;  %v2627_v18 = vld [vmem:[#allocation1 + $0x287] ss:$16 sm:%s2626_s3]   ;;  %v2597_v2 = vsel %vm2061_vm2, %v2595_v17, %v2592_v42  ;;  %s2672_s30 = smov 3  ;;  %s2785_s3 = smov 12 }
  0x4c   :  { %v2503_v59 = vld [vmem:[#allocation1 + $0x18f] ss:$16 sm:%s2502_s2]   ;;  %v2500_v4 = vsel %vm2057_vm1, %v2498_v20, %v2495_v58  ;;  %v2630_v19 = vld [vmem:[#allocation1 + $0x287] ss:$16 sm:%s2629_s4]   ;;  %v2615_v36 = vsel %vm2061_vm2, %v2613_v51, %v2610_v52  ;;  %s2675_s2 = smov 12  ;;  %s2790_s4 = smov 48 }
  0x4d   :  { %v2508_v60 = vld [vmem:[#allocation1 + $0x10f] ss:$16 sm:%s2507_s21]   ;;  %v2505_v5 = vsel %vm2061_vm2, %v2503_v59, %v2500_v4  ;;  %6210 = vrot.lane.b32.xlu0 %v6209_v61, %s6504_s5  ;;  %v2632_v53 = vsel %vm2053_vm0, %v2630_v19, %v2627_v18  ;;  %v2635_v56 = vld [vmem:[#allocation1 + $0x287] ss:$16 sm:%s2634_s15]   ;;  %v2617_v7 = vsel %vm2616_vm4, %v2615_v36, %v2597_v2  ;;  %s2680_s21 = smov 48  ;;  %s2795_s15 = smov 192 }
  0x4e   :  { %v2511_v32 = vld [vmem:[#allocation1 + $0x10f] ss:$16 sm:%s2510_s25]   ;;  %v2640_v57 = vld [vmem:[#allocation1 + $0x287] ss:$16 sm:%s2639_s7]   ;;  %v2637_v20 = vsel %vm2057_vm1, %v2635_v56, %v2632_v53  ;;  %s2685_s25 = smov 192  ;;  %s2810_s7 = smov 3 }
  0x4f   :  { %v2516_v44 = vld [vmem:[#allocation1 + $0x10f] ss:$16 sm:%s2515_s23]   ;;  %v2513_v9 = vsel %vm2053_vm0, %v2511_v32, %v2508_v60  ;;  %v2648_v31 = vld [vmem:[#allocation1 + $0x207] ss:$16 sm:%s2647_s22]   ;;  %v2642_v50 = vsel %vm2061_vm2, %v2640_v57, %v2637_v20  ;;  %s2690_s23 = smov 3  ;;  %s2818_s22 = smov 48 }
  0x50   :  { %v2521_v10 = vld [vmem:[#allocation1 + $0x10f] ss:$16 sm:%s2520_s29]   ;;  %v2518_v21 = vsel %vm2057_vm1, %v2516_v44, %v2513_v9  ;;  %v2653_v59 = vld [vmem:[#allocation1 + $0x207] ss:$16 sm:%s2652_s24]   ;;  %s2693_s29 = smov 12  ;;  %s2823_s24 = smov 192 }
  0x51   :  { %v2536_v14 = vld [vmem:[#allocation1 + $0x38f] ss:$16 sm:%s2535_s11]   ;;  %v2523_v22 = vsel %vm2061_vm2, %v2521_v10, %v2518_v21  ;;  %v2658_v60 = vld [vmem:[#allocation1 + $0x207] ss:$16 sm:%s2657_s12]   ;;  %s2698_s11 = smov 48  ;;  %s2828_s12 = smov 3 }
  0x52   :  { %v2539_v45 = vld [vmem:[#allocation1 + $0x38f] ss:$16 sm:%s2538_s18]   ;;  %v2525_v28 = vsel %vm2248_vm3, %v2523_v22, %v2505_v5  ;;  %v2673_v4 = vld [vmem:[#allocation1 + $0x7] ss:$16 sm:%s2672_s30]   ;;  %s2703_s18 = smov 192  ;;  %s2831_s30 = smov 12 }
  0x53   :  { %v2544_v54 = vld [vmem:[#allocation1 + $0x38f] ss:$16 sm:%s2543_s19]   ;;  %v2541_v23 = vsel %vm2053_vm0, %v2539_v45, %v2536_v14  ;;  %v2676_v32 = vld [vmem:[#allocation1 + $0x7] ss:$16 sm:%s2675_s2]   ;;  %s2718_s19 = smov 3  ;;  %s2836_s2 = smov 48 }
  0x54   :  { %v2549_v55 = vld [vmem:[#allocation1 + $0x38f] ss:$16 sm:%s2548_s16]   ;;  %v2546_v24 = vsel %vm2057_vm1, %v2544_v54, %v2541_v23  ;;  %v2678_v8 = vsel %vm2053_vm0, %v2676_v32, %v2673_v4  ;;  %v2681_v12 = vld [vmem:[#allocation1 + $0x7] ss:$16 sm:%s2680_s21]   ;;  %s2721_s16 = smov 12  ;;  %s2841_s21 = smov 192 }
  0x55   :  { %v2554_v62 = vld [vmem:[#allocation1 + $0x30f] ss:$16 sm:%s2553_s28]   ;;  %v2551_v26 = vsel %vm2061_vm2, %v2549_v55, %v2546_v24  ;;  %v2686_v5 = vld [vmem:[#allocation1 + $0x7] ss:$16 sm:%s2685_s25]   ;;  %v2683_v10 = vsel %vm2057_vm1, %v2681_v12, %v2678_v8  ;;  %s2726_s28 = smov 48  ;;  %s2856_s25 = smov 3 }
  0x56   :  { %v2557_v25 = vld [vmem:[#allocation1 + $0x30f] ss:$16 sm:%s2556_s9]   ;;  %v2691_v14 = vld [vmem:[#allocation1 + $0x187] ss:$16 sm:%s2690_s23]   ;;  %s2731_s9 = smov 192  ;;  %v2688_v22 = vsel %vm2061_vm2, %v2686_v5, %v2683_v10  ;;  %s2859_s23 = smov 12 }
  0x57   :  { %v2562_v11 = vld [vmem:[#allocation1 + $0x30f] ss:$16 sm:%s2561_s10]   ;;  %v2559_v27 = vsel %vm2053_vm0, %v2557_v25, %v2554_v62  ;;  %v2694_v13 = vld [vmem:[#allocation1 + $0x187] ss:$16 sm:%s2693_s29]   ;;  %s6505_s10 = smov 119   ;;  %s2864_s29 = smov 48 }
  0x58   :  { %v2567_v63 = vld [vmem:[#allocation1 + $0x30f] ss:$16 sm:%s2566_s26]   ;;  %v2564_v29 = vsel %vm2057_vm1, %v2562_v11, %v2559_v27  ;;  %v2696_v21 = vsel %vm2053_vm0, %v2694_v13, %v2691_v14  ;;  %v2699_v45 = vld [vmem:[#allocation1 + $0x187] ss:$16 sm:%s2698_s11]   ;;  %s2736_s26 = smov 3  ;;  %s2869_s11 = smov 192 }
  0x59   :  { %v2569_v15 = vsel %vm2061_vm2, %v2567_v63, %v2564_v29  ;;  %v2704_v54 = vld [vmem:[#allocation1 + $0x187] ss:$16 sm:%s2703_s18]   ;;  %v2701_v34 = vsel %vm2057_vm1, %v2699_v45, %v2696_v21  ;;  %s2874_s18 = smov 3 }
  0x5a   :  { %v2571_v38 = vsel %vm2248_vm3, %v2569_v15, %v2551_v26  ;;  %v2719_v39 = vld [vmem:[#allocation1 + $0x207] ss:$16 sm:%s2718_s19]   ;;  %v2706_v23 = vsel %vm2061_vm2, %v2704_v54, %v2701_v34  ;;  %s2877_s19 = smov 12  ;;  %vm4619_vm3 = vcmask 417040  }
  0x5b   :  { %v6219_v0 = vpack.i.bf16 %v2571_v38, %v2525_v28  ;;  %v2722_v40 = vld [vmem:[#allocation1 + $0x207] ss:$16 sm:%s2721_s16]   ;;  %v2708_v27 = vsel %vm2616_vm4, %v2706_v23, %v2688_v22  ;;  %s2882_s16 = smov 48 }
  0x5c   :  { %v2724_v55 = vsel %vm2053_vm0, %v2722_v40, %v2719_v39  ;;  %v2727_v62 = vld [vmem:[#allocation1 + $0x207] ss:$16 sm:%s2726_s28]   ;;  %s2887_s28 = smov 192 }
  0x5d   :  { %6220 = vrot.lane.b32.xlu1 %v6219_v0, %s6504_s5  ;;  %s2644_s5 = smov 3  ;;  %v2732_v41 = vld [vmem:[#allocation1 + $0x207] ss:$16 sm:%s2731_s9]   ;;  %v2729_v46 = vsel %vm2057_vm1, %v2727_v62, %v2724_v55  ;;  %s2902_s9 = smov 3 }
  0x5e   :  { %v2645_v6 = vld [vmem:[#allocation1 + $0x207] ss:$16 sm:%s2644_s5]   ;;  %v2734_v11 = vsel %vm2061_vm2, %v2732_v41, %v2729_v46  ;;  %s2813_s5 = smov 12 }
  0x5f   :  { %v2650_v58 = vsel %vm2053_vm0, %v2648_v31, %v2645_v6  ;;  %v2737_v24 = vld [vmem:[#allocation1 + $0x387] ss:$16 sm:%s2736_s26]   ;;  %s2905_s26 = smov 12 }
  0x60   :  { %v2655_v61 = vsel %vm2057_vm1, %v2653_v59, %v2650_v58  ;;  %v2740_v25 = vld [vmem:[#allocation1 + $0x387] ss:$16 sm:%s2739_s27]   ;;  %s2910_s27 = smov 48 }
  0x61   :  { %v2660_v44 = vsel %vm2061_vm2, %v2658_v60, %v2655_v61  ;;  %v2742_v47 = vsel %vm2053_vm0, %v2740_v25, %v2737_v24  ;;  %v2745_v48 = vld [vmem:[#allocation1 + $0x387] ss:$16 sm:%s2744_s17]   ;;  %s2915_s17 = smov 192 }
  0x62   :  { %v2662_v9 = vsel %vm2616_vm4, %v2660_v44, %v2642_v50  ;;  %v2750_v26 = vld [vmem:[#allocation1 + $0x387] ss:$16 sm:%s2749_s20]   ;;  %v2747_v63 = vsel %vm2057_vm1, %v2745_v48, %v2742_v47  ;;  %s2920_s20 = smov 3 }
  0x63   :  { %v6224_v33 = vpack.i.bf16 %v2662_v9, %v2617_v7  ;;  %v2765_v3 = vld [vmem:[#allocation1 + $0x187] ss:$16 sm:%s2764_s6]   ;;  %v2752_v29 = vsel %vm2061_vm2, %v2750_v26, %v2747_v63  ;;  %s2923_s6 = smov 12 }
  0x64   :  { %v2768_v28 = vld [vmem:[#allocation1 + $0x187] ss:$16 sm:%s2767_s13]   ;;  %v2754_v16 = vsel %vm2616_vm4, %v2752_v29, %v2734_v11  ;;  %s2928_s13 = smov 48 }
  0x65   :  { %6225 = vrot.lane.b32.xlu0 %v6224_v33, %s6505_s10  ;;  %v2770_v30 = vsel %vm2053_vm0, %v2768_v28, %v2765_v3  ;;  %v2773_v35 = vld [vmem:[#allocation1 + $0x187] ss:$16 sm:%s2772_s14]   ;;  %v6229_v42 = vpack.i.bf16 %v2754_v16, %v2708_v27  ;;  %s2933_s14 = smov 192 }
  0x66   :  { %v2778_v15 = vld [vmem:[#allocation1 + $0x187] ss:$16 sm:%s2777_s0]   ;;  %v2775_v17 = vsel %vm2057_vm1, %v2773_v35, %v2770_v30  ;;  %s2948_s0 = smov 3 }
  0x67   :  { %v2783_v37 = vld [vmem:[#allocation1 + $0x107] ss:$16 sm:%s2782_s8]   ;;  %6230 = vrot.lane.b32.xlu1 %v6229_v42, %s6505_s10  ;;  %v2780_v18 = vsel %vm2061_vm2, %v2778_v15, %v2775_v17  ;;  %s2951_s8 = smov 12  ;;  %v2949_v27 = vld [vmem:[#allocation1 + $0x8e] ss:$16 sm:%s2948_s0]   ;;  %s3112_s0 = smov 12 }
  0x68   :  { %v2786_v38 = vld [vmem:[#allocation1 + $0x107] ss:$16 sm:%s2785_s3]   ;;  %v2952_v63 = vld [vmem:[#allocation1 + $0x8e] ss:$16 sm:%s2951_s8]   ;;  %s2956_s3 = smov 48  ;;  %s3117_s8 = smov 48 }
  0x69   :  { %v2788_v43 = vsel %vm2053_vm0, %v2786_v38, %v2783_v37  ;;  %v2791_v49 = vld [vmem:[#allocation1 + $0x107] ss:$16 sm:%s2790_s4]   ;;  %s2961_s4 = smov 192  ;;  %v2954_v28 = vsel %vm2053_vm0, %v2952_v63, %v2949_v27  ;;  %v2957_v29 = vld [vmem:[#allocation1 + $0x8e] ss:$16 sm:%s2956_s3]   ;;  %s3122_s3 = smov 192 }
  0x6a   :  { %v2796_v0 = vld [vmem:[#allocation1 + $0x107] ss:$16 sm:%s2795_s15]   ;;  %v2793_v1 = vsel %vm2057_vm1, %v2791_v49, %v2788_v43  ;;  %v2962_v30 = vld [vmem:[#allocation1 + $0x8e] ss:$16 sm:%s2961_s4]   ;;  %s2971_s15 = smov 3  ;;  %v2959_v15 = vsel %vm2057_vm1, %v2957_v29, %v2954_v28  ;;  %s3132_s4 = smov 3 }
  0x6b   :  { %v2811_v51 = vld [vmem:[#allocation1 + $0x387] ss:$16 sm:%s2810_s7]   ;;  %v2798_v19 = vsel %vm2061_vm2, %v2796_v0, %v2793_v1  ;;  %v2972_v16 = vld [vmem:[#allocation1 + $0x28e] ss:$16 sm:%s2971_s15]   ;;  %s2974_s7 = smov 12  ;;  %v2964_v42 = vsel %vm2061_vm2, %v2962_v30, %v2959_v15  ;;  %s3135_s15 = smov 12 }
  0x6c   :  { %v2814_v52 = vld [vmem:[#allocation1 + $0x387] ss:$16 sm:%s2813_s5]   ;;  %v2800_v59 = vsel %vm2616_vm4, %v2798_v19, %v2780_v18  ;;  %s2979_s5 = smov 48  ;;  %v2975_v37 = vld [vmem:[#allocation1 + $0x28e] ss:$16 sm:%s2974_s7]   ;;  %s3140_s7 = smov 48 }
  0x6d   :  { %v2816_v2 = vsel %vm2053_vm0, %v2814_v52, %v2811_v51  ;;  %v2819_v36 = vld [vmem:[#allocation1 + $0x387] ss:$16 sm:%s2818_s22]   ;;  %v2980_v38 = vld [vmem:[#allocation1 + $0x28e] ss:$16 sm:%s2979_s5]   ;;  %s2984_s22 = smov 192  ;;  %v2977_v43 = vsel %vm2053_vm0, %v2975_v37, %v2972_v16  ;;  %s3145_s5 = smov 192 }
  0x6e   :  { %v2824_v53 = vld [vmem:[#allocation1 + $0x387] ss:$16 sm:%s2823_s24]   ;;  %v2821_v56 = vsel %vm2057_vm1, %v2819_v36, %v2816_v2  ;;  %s2994_s24 = smov 3  ;;  %v2985_v49 = vld [vmem:[#allocation1 + $0x28e] ss:$16 sm:%s2984_s22]   ;;  %v2982_v1 = vsel %vm2057_vm1, %v2980_v38, %v2977_v43  ;;  %s3154_s22 = smov 3 }
  0x6f   :  { %v2829_v57 = vld [vmem:[#allocation1 + $0x307] ss:$16 sm:%s2828_s12]   ;;  %v2826_v6 = vsel %vm2061_vm2, %v2824_v53, %v2821_v56  ;;  %v2995_v0 = vld [vmem:[#allocation1 + $0xe] ss:$16 sm:%s2994_s24]   ;;  %s2997_s12 = smov 12  ;;  %v2987_v18 = vsel %vm2061_vm2, %v2985_v49, %v2982_v1  ;;  %s3157_s24 = smov 12 }
  0x70   :  { %v2832_v20 = vld [vmem:[#allocation1 + $0x307] ss:$16 sm:%s2831_s30]   ;;  %s3002_s30 = smov 48  ;;  %v2998_v51 = vld [vmem:[#allocation1 + $0xe] ss:$16 sm:%s2997_s12]   ;;  %v6239_v53 = vpack.i.bf16 %v2987_v18, %v2964_v42  ;;  %s3162_s12 = smov 48 }
  0x71   :  { %v2834_v31 = vsel %vm2053_vm0, %v2832_v20, %v2829_v57  ;;  %v2837_v50 = vld [vmem:[#allocation1 + $0x307] ss:$16 sm:%s2836_s2]   ;;  %v3003_v52 = vld [vmem:[#allocation1 + $0xe] ss:$16 sm:%s3002_s30]   ;;  %s3017_s2 = smov 3  ;;  %v3000_v19 = vsel %vm2053_vm0, %v2998_v51, %v2995_v0  ;;  %s3167_s30 = smov 192 }
  0x72   :  { %v2842_v58 = vld [vmem:[#allocation1 + $0x307] ss:$16 sm:%s2841_s21]   ;;  %v2839_v60 = vsel %vm2057_vm1, %v2837_v50, %v2834_v31  ;;  %v3018_v36 = vld [vmem:[#allocation1 + $0x20e] ss:$16 sm:%s3017_s2]   ;;  %s3020_s21 = smov 12  ;;  %v3005_v56 = vsel %vm2057_vm1, %v3003_v52, %v3000_v19  ;;  %s3180_s2 = smov 12 }
  0x73   :  { %v2857_v7 = vld [vmem:[#allocation1 + $0x107] ss:$16 sm:%s2856_s25]   ;;  %v2844_v4 = vsel %vm2061_vm2, %v2842_v58, %v2839_v60  ;;  %s3025_s25 = smov 48  ;;  %v3021_v57 = vld [vmem:[#allocation1 + $0x20e] ss:$16 sm:%s3020_s21]   ;;  %s3185_s21 = smov 48 }
  0x74   :  { %v2860_v61 = vld [vmem:[#allocation1 + $0x107] ss:$16 sm:%s2859_s23]   ;;  %v2846_v12 = vsel %vm2616_vm4, %v2844_v4, %v2826_v6  ;;  %v3026_v20 = vld [vmem:[#allocation1 + $0x20e] ss:$16 sm:%s3025_s25]   ;;  %s3030_s23 = smov 192  ;;  %v3023_v31 = vsel %vm2053_vm0, %v3021_v57, %v3018_v36  ;;  %s3190_s25 = smov 192 }
  0x75   :  { %v2862_v32 = vsel %vm2053_vm0, %v2860_v61, %v2857_v7  ;;  %v2865_v44 = vld [vmem:[#allocation1 + $0x107] ss:$16 sm:%s2864_s29]   ;;  %v6234_v14 = vpack.i.bf16 %v2846_v12, %v2800_v59  ;;  %s3040_s29 = smov 3  ;;  %v3031_v50 = vld [vmem:[#allocation1 + $0x20e] ss:$16 sm:%s3030_s23]   ;;  %v3028_v59 = vsel %vm2057_vm1, %v3026_v20, %v3023_v31  ;;  %s3200_s23 = smov 3 }
  0x76   :  { %v2870_v8 = vld [vmem:[#allocation1 + $0x107] ss:$16 sm:%s2869_s11]   ;;  %v2867_v5 = vsel %vm2057_vm1, %v2865_v44, %v2862_v32  ;;  %v3041_v58 = vld [vmem:[#allocation1 + $0x18e] ss:$16 sm:%s3040_s29]   ;;  %s3043_s11 = smov 12  ;;  %v3033_v61 = vsel %vm2061_vm2, %v3031_v50, %v3028_v59  ;;  %s3203_s29 = smov 12 }
  0x77   :  { %v2875_v9 = vld [vmem:[#allocation1 + $0x87] ss:$16 sm:%s2874_s18]   ;;  %6235 = vrot.lane.b32.xlu0 %v6234_v14, %s6505_s10  ;;  %v2872_v39 = vsel %vm2061_vm2, %v2870_v8, %v2867_v5  ;;  %s3048_s18 = smov 48  ;;  %v3044_v60 = vld [vmem:[#allocation1 + $0x18e] ss:$16 sm:%s3043_s11]   ;;  %s3208_s11 = smov 48 }
  0x78   :  { %v2878_v10 = vld [vmem:[#allocation1 + $0x87] ss:$16 sm:%s2877_s19]   ;;  %s6506_s19 = smov 110   ;;  %v3049_v7 = vld [vmem:[#allocation1 + $0x18e] ss:$16 sm:%s3048_s18]   ;;  %v3046_v4 = vsel %vm2053_vm0, %v3044_v60, %v3041_v58  ;;  %s3213_s18 = smov 192 }
  0x79   :  { %v2880_v13 = vsel %vm2053_vm0, %v2878_v10, %v2875_v9  ;;  %v2883_v33 = vld [vmem:[#allocation1 + $0x87] ss:$16 sm:%s2882_s16]   ;;  %s3053_s16 = smov 192  ;;  %v3051_v12 = vsel %vm2057_vm1, %v3049_v7, %v3046_v4  ;;  %v3155_v30 = vld [vmem:[#allocation1 + $0x206] ss:$16 sm:%s3154_s22]   ;;  %s3318_s22 = smov 12 }
  0x7a   :  { %v2888_v21 = vld [vmem:[#allocation1 + $0x87] ss:$16 sm:%s2887_s28]   ;;  %v2885_v45 = vsel %vm2057_vm1, %v2883_v33, %v2880_v13  ;;  %s3063_s28 = smov 3  ;;  %v3054_v32 = vld [vmem:[#allocation1 + $0x18e] ss:$16 sm:%s3053_s16]   ;;  %s3226_s16 = smov 12 }
  0x7b   :  { %v2903_v54 = vld [vmem:[#allocation1 + $0x307] ss:$16 sm:%s2902_s9]   ;;  %v2890_v40 = vsel %vm2061_vm2, %v2888_v21, %v2885_v45  ;;  %6240 = vrot.lane.b32.xlu0 %v6239_v53, %s6506_s19  ;;  %v3064_v44 = vld [vmem:[#allocation1 + $0x38e] ss:$16 sm:%s3063_s28]   ;;  %s3066_s9 = smov 12  ;;  %v3056_v10 = vsel %vm2061_vm2, %v3054_v32, %v3051_v12  ;;  %s6507_s28 = smov 102  }
  0x7c   :  { %v2906_v34 = vld [vmem:[#allocation1 + $0x307] ss:$16 sm:%s2905_s26]   ;;  %v2892_v48 = vsel %vm2616_vm4, %v2890_v40, %v2872_v39  ;;  %s3071_s26 = smov 48  ;;  %v3067_v5 = vld [vmem:[#allocation1 + $0x38e] ss:$16 sm:%s3066_s9]   ;;  %s3231_s9 = smov 48 }
  0x7d   :  { %v2908_v22 = vsel %vm2053_vm0, %v2906_v34, %v2903_v54  ;;  %v2911_v23 = vld [vmem:[#allocation1 + $0x307] ss:$16 sm:%s2910_s27]   ;;  %v3072_v9 = vld [vmem:[#allocation1 + $0x38e] ss:$16 sm:%s3071_s26]   ;;  %s3076_s27 = smov 192  ;;  %v3069_v14 = vsel %vm2053_vm0, %v3067_v5, %v3064_v44  ;;  %s3236_s26 = smov 192 }
  0x7e   :  { %v2916_v55 = vld [vmem:[#allocation1 + $0x307] ss:$16 sm:%s2915_s17]   ;;  %v2913_v62 = vsel %vm2057_vm1, %v2911_v23, %v2908_v22  ;;  %s3086_s17 = smov 3  ;;  %v3077_v13 = vld [vmem:[#allocation1 + $0x38e] ss:$16 sm:%s3076_s27]   ;;  %v3074_v21 = vsel %vm2057_vm1, %v3072_v9, %v3069_v14  ;;  %s3246_s27 = smov 3 }
  0x7f   :  { %v2921_v41 = vld [vmem:[#allocation1 + $0x287] ss:$16 sm:%s2920_s20]   ;;  %v2918_v24 = vsel %vm2061_vm2, %v2916_v55, %v2913_v62  ;;  %v3087_v33 = vld [vmem:[#allocation1 + $0x10e] ss:$16 sm:%s3086_s17]   ;;  %s3089_s20 = smov 12  ;;  %v3079_v34 = vsel %vm2061_vm2, %v3077_v13, %v3074_v21  ;;  %s3249_s17 = smov 12 }
  0x80   :  { %v2924_v46 = vld [vmem:[#allocation1 + $0x287] ss:$16 sm:%s2923_s6]   ;;  %s3094_s6 = smov 48  ;;  %v3090_v45 = vld [vmem:[#allocation1 + $0x10e] ss:$16 sm:%s3089_s20]   ;;  %v6254_v23 = vpack.i.bf16 %v3079_v34, %v3056_v10  ;;  %s3254_s20 = smov 48 }
  0x81   :  { %v2926_v25 = vsel %vm2053_vm0, %v2924_v46, %v2921_v41  ;;  %v2929_v11 = vld [vmem:[#allocation1 + $0x287] ss:$16 sm:%s2928_s13]   ;;  %v3095_v54 = vld [vmem:[#allocation1 + $0x10e] ss:$16 sm:%s3094_s6]   ;;  %s3099_s13 = smov 192  ;;  %v3092_v39 = vsel %vm2053_vm0, %v3090_v45, %v3087_v33  ;;  %s3259_s6 = smov 192 }
  0x82   :  { %v2934_v47 = vld [vmem:[#allocation1 + $0x287] ss:$16 sm:%s2933_s14]   ;;  %v2931_v26 = vsel %vm2057_vm1, %v2929_v11, %v2926_v25  ;;  %s3109_s14 = smov 3  ;;  %v3100_v40 = vld [vmem:[#allocation1 + $0x10e] ss:$16 sm:%s3099_s13]   ;;  %v3097_v55 = vsel %vm2057_vm1, %v3095_v54, %v3092_v39  ;;  %6255 = vrot.lane.b32.xlu0 %v6254_v23, %s6506_s19  ;;  %s3269_s13 = smov 3 }
  0x83   :  { %v2936_v3 = vsel %vm2061_vm2, %v2934_v47, %v2931_v26  ;;  %v3110_v22 = vld [vmem:[#allocation1 + $0x30e] ss:$16 sm:%s3109_s14]   ;;  %v3102_v46 = vsel %vm2061_vm2, %v3100_v40, %v3097_v55  ;;  %v3133_v11 = vld [vmem:[#allocation1 + $0x6] ss:$16 sm:%s3132_s4]   ;;  %s3272_s14 = smov 12  ;;  %s3295_s4 = smov 12 }
  0x84   :  { %v2938_v35 = vsel %vm2616_vm4, %v2936_v3, %v2918_v24  ;;  %v3113_v62 = vld [vmem:[#allocation1 + $0x30e] ss:$16 sm:%s3112_s0]   ;;  %v3141_v26 = vld [vmem:[#allocation1 + $0x6] ss:$16 sm:%s3140_s7]   ;;  %s3277_s0 = smov 48  ;;  %s3305_s7 = smov 192 }
  0x85   :  { %v6244_v17 = vpack.i.bf16 %v2938_v35, %v2892_v48  ;;  %v3118_v41 = vld [vmem:[#allocation1 + $0x30e] ss:$16 sm:%s3117_s8]   ;;  %v3115_v24 = vsel %vm2053_vm0, %v3113_v62, %v3110_v22  ;;  %v3136_v48 = vld [vmem:[#allocation1 + $0x6] ss:$16 sm:%s3135_s15]   ;;  %s3282_s8 = smov 192  ;;  %s3300_s15 = smov 48 }
  0x86   :  { %v3123_v25 = vld [vmem:[#allocation1 + $0x30e] ss:$16 sm:%s3122_s3]   ;;  %v3120_v47 = vsel %vm2057_vm1, %v3118_v41, %v3115_v24  ;;  %v3138_v63 = vsel %vm2053_vm0, %v3136_v48, %v3133_v11  ;;  %v3146_v3 = vld [vmem:[#allocation1 + $0x6] ss:$16 sm:%s3145_s5]   ;;  %s3292_s3 = smov 3  ;;  %s3315_s5 = smov 3 }
  0x87   :  { %6245 = vrot.lane.b32.xlu1 %v6244_v17, %s6505_s10  ;;  %s3007_s10 = smov 192  ;;  %v3125_v27 = vsel %vm2061_vm2, %v3123_v25, %v3120_v47  ;;  %v3143_v29 = vsel %vm2057_vm1, %v3141_v26, %v3138_v63  ;;  %v3158_v35 = vld [vmem:[#allocation1 + $0x206] ss:$16 sm:%s3157_s24]   ;;  %v3319_v24 = vld [vmem:[#allocation1 + $0x8d] ss:$16 sm:%s3318_s22]   ;;  %s3323_s24 = smov 48 }
  0x88   :  { %v3008_v2 = vld [vmem:[#allocation1 + $0xe] ss:$16 sm:%s3007_s10]   ;;  %v6259_v28 = vpack.i.bf16 %v3125_v27, %v3102_v46  ;;  %v3148_v15 = vsel %vm2061_vm2, %v3146_v3, %v3143_v29  ;;  %v3160_v16 = vsel %vm2053_vm0, %v3158_v35, %v3155_v30  ;;  %v3163_v17 = vld [vmem:[#allocation1 + $0x206] ss:$16 sm:%s3162_s12]   ;;  %s3177_s10 = smov 3  ;;  %s3328_s12 = smov 192 }
  0x89   :  { %v3010_v6 = vsel %vm2061_vm2, %v3008_v2, %v3005_v56  ;;  %v3168_v37 = vld [vmem:[#allocation1 + $0x206] ss:$16 sm:%s3167_s30]   ;;  %v3165_v38 = vsel %vm2057_vm1, %v3163_v17, %v3160_v16  ;;  %v3316_v46 = vld [vmem:[#allocation1 + $0x8d] ss:$16 sm:%s3315_s5]   ;;  %s3338_s30 = smov 3  ;;  %s3479_s5 = smov 12 }
  0x8a   :  { %v6249_v8 = vpack.i.bf16 %v3033_v61, %v3010_v6  ;;  %v3178_v42 = vld [vmem:[#allocation1 + $0x186] ss:$16 sm:%s3177_s10]   ;;  %v3170_v49 = vsel %vm2061_vm2, %v3168_v37, %v3165_v38  ;;  %v3321_v11 = vsel %vm2053_vm0, %v3319_v24, %v3316_v46  ;;  %v3324_v47 = vld [vmem:[#allocation1 + $0x8d] ss:$16 sm:%s3323_s24]   ;;  %s3341_s10 = smov 12  ;;  %s3484_s22 = smov 48 }
  0x8b   :  { %v3181_v43 = vld [vmem:[#allocation1 + $0x186] ss:$16 sm:%s3180_s2]   ;;  %v6264_v52 = vpack.i.bf16 %v3170_v49, %v3148_v15  ;;  %v3329_v48 = vld [vmem:[#allocation1 + $0x8d] ss:$16 sm:%s3328_s12]   ;;  %v3326_v27 = vsel %vm2057_vm1, %v3324_v47, %v3321_v11  ;;  %s3346_s2 = smov 48  ;;  %s3489_s24 = smov 192 }
  0x8c   :  { %6250 = vrot.lane.b32.xlu1 %v6249_v8, %s6506_s19  ;;  %v3183_v0 = vsel %vm2053_vm0, %v3181_v43, %v3178_v42  ;;  %v3186_v1 = vld [vmem:[#allocation1 + $0x186] ss:$16 sm:%s3185_s21]   ;;  %v3339_v63 = vld [vmem:[#allocation1 + $0x28d] ss:$16 sm:%s3338_s30]   ;;  %s3351_s21 = smov 192  ;;  %v3331_v29 = vsel %vm2061_vm2, %v3329_v48, %v3326_v27  ;;  %s3499_s12 = smov 3 }
  0x8d   :  { %v3191_v51 = vld [vmem:[#allocation1 + $0x186] ss:$16 sm:%s3190_s25]   ;;  %v3188_v18 = vsel %vm2057_vm1, %v3186_v1, %v3183_v0  ;;  %6265 = vrot.lane.b32.xlu0 %v6264_v52, %s6507_s28  ;;  %v3342_v3 = vld [vmem:[#allocation1 + $0x28d] ss:$16 sm:%s3341_s10]   ;;  %s3361_s25 = smov 3  ;;  %s3502_s30 = smov 12 }
  0x8e   :  { %v3201_v19 = vld [vmem:[#allocation1 + $0x386] ss:$16 sm:%s3200_s23]   ;;  %v3193_v36 = vsel %vm2061_vm2, %v3191_v51, %v3188_v18  ;;  %v3344_v30 = vsel %vm2053_vm0, %v3342_v3, %v3339_v63  ;;  %v3352_v35 = vld [vmem:[#allocation1 + $0x28d] ss:$16 sm:%s3351_s21]   ;;  %s3364_s23 = smov 12  ;;  %s3507_s10 = smov 48 }
  0x8f   :  { %v3204_v2 = vld [vmem:[#allocation1 + $0x386] ss:$16 sm:%s3203_s29]   ;;  %v3362_v15 = vld [vmem:[#allocation1 + $0xd] ss:$16 sm:%s3361_s25]   ;;  %s3369_s29 = smov 48  ;;  %s3521_s21 = smov 3 }
  0x90   :  { %6260 = vrot.lane.b32.xlu1 %v6259_v28, %s6506_s19  ;;  %v3206_v53 = vsel %vm2053_vm0, %v3204_v2, %v3201_v19  ;;  %v3209_v56 = vld [vmem:[#allocation1 + $0x386] ss:$16 sm:%s3208_s11]   ;;  %s3223_s19 = smov 3  ;;  %v3347_v28 = vld [vmem:[#allocation1 + $0x28d] ss:$16 sm:%s3346_s2]   ;;  %s3374_s11 = smov 192 }
  0x91   :  { %v3214_v57 = vld [vmem:[#allocation1 + $0x386] ss:$16 sm:%s3213_s18]   ;;  %v3211_v20 = vsel %vm2057_vm1, %v3209_v56, %v3206_v53  ;;  %v3349_v16 = vsel %vm2057_vm1, %v3347_v28, %v3344_v30  ;;  %v3365_v17 = vld [vmem:[#allocation1 + $0xd] ss:$16 sm:%s3364_s23]   ;;  %s3384_s18 = smov 3  ;;  %s3512_s2 = smov 192 }
  0x92   :  { %v3224_v6 = vld [vmem:[#allocation1 + $0x106] ss:$16 sm:%s3223_s19]   ;;  %v3216_v50 = vsel %vm2061_vm2, %v3214_v57, %v3211_v20  ;;  %v3370_v37 = vld [vmem:[#allocation1 + $0xd] ss:$16 sm:%s3369_s29]   ;;  %v3354_v38 = vsel %vm2061_vm2, %v3352_v35, %v3349_v16  ;;  %v3367_v42 = vsel %vm2053_vm0, %v3365_v17, %v3362_v15  ;;  %s3387_s19 = smov 12  ;;  %s3524_s25 = smov 12 }
  0x93   :  { %v3227_v31 = vld [vmem:[#allocation1 + $0x106] ss:$16 sm:%s3226_s16]   ;;  %v6269_v7 = vpack.i.bf16 %v3216_v50, %v3193_v36  ;;  %v3375_v43 = vld [vmem:[#allocation1 + $0xd] ss:$16 sm:%s3374_s11]   ;;  %s3392_s16 = smov 48  ;;  %v6284_v0 = vpack.i.bf16 %v3354_v38, %v3331_v29  ;;  %v3372_v1 = vsel %vm2057_vm1, %v3370_v37, %v3367_v42  ;;  %s3529_s23 = smov 48 }
  0x94   :  { %v3229_v58 = vsel %vm2053_vm0, %v3227_v31, %v3224_v6  ;;  %v3232_v59 = vld [vmem:[#allocation1 + $0x106] ss:$16 sm:%s3231_s9]   ;;  %v3385_v49 = vld [vmem:[#allocation1 + $0x20d] ss:$16 sm:%s3384_s18]   ;;  %s3407_s9 = smov 3  ;;  %v3377_v18 = vsel %vm2061_vm2, %v3375_v43, %v3372_v1  ;;  %s3534_s29 = smov 192 }
  0x95   :  { %v3237_v60 = vld [vmem:[#allocation1 + $0x106] ss:$16 sm:%s3236_s26]   ;;  %v3234_v61 = vsel %vm2057_vm1, %v3232_v59, %v3229_v58  ;;  %6270 = vrot.lane.b32.xlu1 %v6269_v7, %s6507_s28  ;;  %v3388_v51 = vld [vmem:[#allocation1 + $0x20d] ss:$16 sm:%s3387_s19]   ;;  %s3410_s26 = smov 12  ;;  %s3544_s11 = smov 3 }
  0x96   :  { %v3247_v4 = vld [vmem:[#allocation1 + $0x306] ss:$16 sm:%s3246_s27]   ;;  %v3239_v44 = vsel %vm2061_vm2, %v3237_v60, %v3234_v61  ;;  %v3393_v52 = vld [vmem:[#allocation1 + $0x20d] ss:$16 sm:%s3392_s16]   ;;  %v3390_v19 = vsel %vm2053_vm0, %v3388_v51, %v3385_v49  ;;  %s3415_s27 = smov 48  ;;  %s3547_s18 = smov 12 }
  0x97   :  { %v3250_v32 = vld [vmem:[#allocation1 + $0x306] ss:$16 sm:%s3249_s17]   ;;  %v3408_v36 = vld [vmem:[#allocation1 + $0x18d] ss:$16 sm:%s3407_s9]   ;;  %s6508_s17 = smov 93   ;;  %v3395_v53 = vsel %vm2057_vm1, %v3393_v52, %v3390_v19  ;;  %s3552_s19 = smov 48 }
  0x98   :  { %v3252_v8 = vsel %vm2053_vm0, %v3250_v32, %v3247_v4  ;;  %v3255_v12 = vld [vmem:[#allocation1 + $0x306] ss:$16 sm:%s3254_s20]   ;;  %v3411_v56 = vld [vmem:[#allocation1 + $0x18d] ss:$16 sm:%s3410_s26]   ;;  %s3420_s20 = smov 192  ;;  %s3557_s16 = smov 192 }
  0x99   :  { %v3260_v5 = vld [vmem:[#allocation1 + $0x306] ss:$16 sm:%s3259_s6]   ;;  %v3257_v9 = vsel %vm2057_vm1, %v3255_v12, %v3252_v8  ;;  %v3416_v57 = vld [vmem:[#allocation1 + $0x18d] ss:$16 sm:%s3415_s27]   ;;  %s3430_s6 = smov 3  ;;  %v3413_v6 = vsel %vm2053_vm0, %v3411_v56, %v3408_v36  ;;  %s3570_s9 = smov 12 }
  0x9a   :  { %v3270_v10 = vld [vmem:[#allocation1 + $0x86] ss:$16 sm:%s3269_s13]   ;;  %v3262_v13 = vsel %vm2061_vm2, %v3260_v5, %v3257_v9  ;;  %v3421_v31 = vld [vmem:[#allocation1 + $0x18d] ss:$16 sm:%s3420_s20]   ;;  %s3433_s13 = smov 12  ;;  %v3418_v59 = vsel %vm2057_vm1, %v3416_v57, %v3413_v6  ;;  %s3575_s26 = smov 48 }
  0x9b   :  { %v3273_v14 = vld [vmem:[#allocation1 + $0x86] ss:$16 sm:%s3272_s14]   ;;  %v6274_v54 = vpack.i.bf16 %v3262_v13, %v3239_v44  ;;  %v3431_v50 = vld [vmem:[#allocation1 + $0x38d] ss:$16 sm:%s3430_s6]   ;;  %s3438_s14 = smov 48  ;;  %v3423_v61 = vsel %vm2061_vm2, %v3421_v31, %v3418_v59  ;;  %s3580_s27 = smov 192 }
  0x9c   :  { %v3275_v33 = vsel %vm2053_vm0, %v3273_v14, %v3270_v10  ;;  %v3278_v21 = vld [vmem:[#allocation1 + $0x86] ss:$16 sm:%s3277_s0]   ;;  %v3434_v60 = vld [vmem:[#allocation1 + $0x38d] ss:$16 sm:%s3433_s13]   ;;  %s3443_s0 = smov 192  ;;  %s3593_s20 = smov 12 }
  0x9d   :  { %v3283_v45 = vld [vmem:[#allocation1 + $0x86] ss:$16 sm:%s3282_s8]   ;;  %v3280_v34 = vsel %vm2057_vm1, %v3278_v21, %v3275_v33  ;;  %6275 = vrot.lane.b32.xlu0 %v6274_v54, %s6507_s28  ;;  %v3439_v7 = vld [vmem:[#allocation1 + $0x38d] ss:$16 sm:%s3438_s14]   ;;  %s3453_s8 = smov 3  ;;  %v3436_v4 = vsel %vm2053_vm0, %v3434_v60, %v3431_v50  ;;  %s6509_s6 = smov 85  }
  0x9e   :  { %v3293_v39 = vld [vmem:[#allocation1 + $0x286] ss:$16 sm:%s3292_s3]   ;;  %v3285_v22 = vsel %vm2061_vm2, %v3283_v45, %v3280_v34  ;;  %v3444_v32 = vld [vmem:[#allocation1 + $0x38d] ss:$16 sm:%s3443_s0]   ;;  %s3456_s3 = smov 12  ;;  %v3441_v8 = vsel %vm2057_vm1, %v3439_v7, %v3436_v4  ;;  %s3598_s13 = smov 48 }
  0x9f   :  { %v3296_v40 = vld [vmem:[#allocation1 + $0x286] ss:$16 sm:%s3295_s4]   ;;  %v3454_v44 = vld [vmem:[#allocation1 + $0x10d] ss:$16 sm:%s3453_s8]   ;;  %s3461_s4 = smov 48  ;;  %v3446_v9 = vsel %vm2061_vm2, %v3444_v32, %v3441_v8  ;;  %s3603_s14 = smov 192 }
  0xa0   :  { %v3298_v23 = vsel %vm2053_vm0, %v3296_v40, %v3293_v39  ;;  %v3301_v55 = vld [vmem:[#allocation1 + $0x286] ss:$16 sm:%s3300_s15]   ;;  %v3457_v12 = vld [vmem:[#allocation1 + $0x10d] ss:$16 sm:%s3456_s3]   ;;  %s3466_s15 = smov 192  ;;  %v6294_v33 = vpack.i.bf16 %v3446_v9, %v3423_v61  ;;  %s3613_s0 = smov 3 }
  0xa1   :  { %v3306_v62 = vld [vmem:[#allocation1 + $0x286] ss:$16 sm:%s3305_s7]   ;;  %v3303_v41 = vsel %vm2057_vm1, %v3301_v55, %v3298_v23  ;;  %6285 = vrot.lane.b32.xlu0 %v6284_v0, %s6508_s17  ;;  %v3462_v5 = vld [vmem:[#allocation1 + $0x10d] ss:$16 sm:%s3461_s4]   ;;  %s3476_s7 = smov 3  ;;  %v3459_v10 = vsel %vm2053_vm0, %v3457_v12, %v3454_v44  ;;  %s3616_s8 = smov 12 }
  0xa2   :  { %v3308_v25 = vsel %vm2061_vm2, %v3306_v62, %v3303_v41  ;;  %v3467_v14 = vld [vmem:[#allocation1 + $0x10d] ss:$16 sm:%s3466_s15]   ;;  %v3464_v21 = vsel %vm2057_vm1, %v3462_v5, %v3459_v10  ;;  %v3503_v55 = vld [vmem:[#allocation1 + $0x5] ss:$16 sm:%s3502_s30]   ;;  %s3621_s3 = smov 48  ;;  %s3626_s4 = smov 192 }
  0xa3   :  { %v6279_v26 = vpack.i.bf16 %v3308_v25, %v3285_v22  ;;  %v3477_v13 = vld [vmem:[#allocation1 + $0x30d] ss:$16 sm:%s3476_s7]   ;;  %v3469_v34 = vsel %vm2061_vm2, %v3467_v14, %v3464_v21  ;;  %v3500_v22 = vld [vmem:[#allocation1 + $0x5] ss:$16 sm:%s3499_s12]   ;;  %s3636_s15 = smov 3  ;;  %s3639_s7 = smov 12 }
  0xa4   :  { %v3480_v45 = vld [vmem:[#allocation1 + $0x30d] ss:$16 sm:%s3479_s5]   ;;  %v3508_v62 = vld [vmem:[#allocation1 + $0x5] ss:$16 sm:%s3507_s10]   ;;  %v3505_v46 = vsel %vm2053_vm0, %v3503_v55, %v3500_v22  ;;  %s3644_s5 = smov 48  ;;  %s3662_s12 = smov 12 }
  0xa5   :  { %6280 = vrot.lane.b32.xlu1 %v6279_v26, %s6507_s28  ;;  %s3397_s28 = smov 192  ;;  %v3485_v54 = vld [vmem:[#allocation1 + $0x30d] ss:$16 sm:%s3484_s22]   ;;  %v3482_v39 = vsel %vm2053_vm0, %v3480_v45, %v3477_v13  ;;  %6295 = vrot.lane.b32.xlu0 %v6294_v33, %s6508_s17  ;;  %v3513_v24 = vld [vmem:[#allocation1 + $0x5] ss:$16 sm:%s3512_s2]   ;;  %v3510_v11 = vsel %vm2057_vm1, %v3508_v62, %v3505_v46  ;;  %s3649_s22 = smov 192 }
  0xa6   :  { %v3398_v2 = vld [vmem:[#allocation1 + $0x20d] ss:$16 sm:%s3397_s28]   ;;  %v3487_v23 = vsel %vm2057_vm1, %v3485_v54, %v3482_v39  ;;  %v3522_v47 = vld [vmem:[#allocation1 + $0x205] ss:$16 sm:%s3521_s21]   ;;  %v3515_v26 = vsel %vm2061_vm2, %v3513_v24, %v3510_v11  ;;  %s3567_s28 = smov 3  ;;  %s3667_s30 = smov 48 }
  0xa7   :  { %v3400_v20 = vsel %vm2061_vm2, %v3398_v2, %v3395_v53  ;;  %v3490_v40 = vld [vmem:[#allocation1 + $0x30d] ss:$16 sm:%s3489_s24]   ;;  %v3525_v48 = vld [vmem:[#allocation1 + $0x205] ss:$16 sm:%s3524_s25]   ;;  %s3659_s24 = smov 3  ;;  %s3672_s10 = smov 192 }
  0xa8   :  { %v6289_v58 = vpack.i.bf16 %v3400_v20, %v3377_v18  ;;  %v3492_v41 = vsel %vm2061_vm2, %v3490_v40, %v3487_v23  ;;  %v3527_v27 = vsel %vm2053_vm0, %v3525_v48, %v3522_v47  ;;  %v3530_v63 = vld [vmem:[#allocation1 + $0x205] ss:$16 sm:%s3529_s23]   ;;  %s3682_s2 = smov 3  ;;  %s3685_s21 = smov 12  ;;  %vm4802_vm4 = vcmask 343240  }
  0xa9   :  { %v6299_v25 = vpack.i.bf16 %v3492_v41, %v3469_v34  ;;  %v3535_v3 = vld [vmem:[#allocation1 + $0x205] ss:$16 sm:%s3534_s29]   ;;  %v3532_v28 = vsel %vm2057_vm1, %v3530_v63, %v3527_v27  ;;  %v3683_v34 = vld [vmem:[#allocation1 + $0x8c] ss:$16 sm:%s3682_s2]   ;;  %s3690_s25 = smov 48  ;;  %s3695_s23 = smov 192 }
  0xaa   :  { %6290 = vrot.lane.b32.xlu1 %v6289_v58, %s6508_s17  ;;  %v3545_v29 = vld [vmem:[#allocation1 + $0x185] ss:$16 sm:%s3544_s11]   ;;  %v3537_v35 = vsel %vm2061_vm2, %v3535_v3, %v3532_v28  ;;  %v3686_v39 = vld [vmem:[#allocation1 + $0x8c] ss:$16 sm:%s3685_s21]   ;;  %s3705_s29 = smov 3  ;;  %s3708_s11 = smov 12 }
  0xab   :  { %v3548_v30 = vld [vmem:[#allocation1 + $0x185] ss:$16 sm:%s3547_s18]   ;;  %v6304_v37 = vpack.i.bf16 %v3537_v35, %v3515_v26  ;;  %v3688_v22 = vsel %vm2053_vm0, %v3686_v39, %v3683_v34  ;;  %v3691_v23 = vld [vmem:[#allocation1 + $0x8c] ss:$16 sm:%s3690_s25]   ;;  %s3713_s18 = smov 48  ;;  %s3846_s2 = smov 12 }
  0xac   :  { %v3550_v15 = vsel %vm2053_vm0, %v3548_v30, %v3545_v29  ;;  %v3553_v16 = vld [vmem:[#allocation1 + $0x185] ss:$16 sm:%s3552_s19]   ;;  %v3696_v55 = vld [vmem:[#allocation1 + $0x8c] ss:$16 sm:%s3695_s23]   ;;  %v3693_v41 = vsel %vm2057_vm1, %v3691_v23, %v3688_v22  ;;  %s3718_s19 = smov 192  ;;  %s3851_s21 = smov 48 }
  0xad   :  { %v3558_v17 = vld [vmem:[#allocation1 + $0x185] ss:$16 sm:%s3557_s16]   ;;  %v3555_v38 = vsel %vm2057_vm1, %v3553_v16, %v3550_v15  ;;  %6305 = vrot.lane.b32.xlu0 %v6304_v37, %s6509_s6  ;;  %v3706_v46 = vld [vmem:[#allocation1 + $0x28c] ss:$16 sm:%s3705_s29]   ;;  %s3728_s16 = smov 3  ;;  %v3698_v11 = vsel %vm2061_vm2, %v3696_v55, %v3693_v41  ;;  %s3856_s25 = smov 192 }
  0xae   :  { %6300 = vrot.lane.b32.xlu1 %v6299_v25, %s6508_s17  ;;  %v3568_v42 = vld [vmem:[#allocation1 + $0x385] ss:$16 sm:%s3567_s28]   ;;  %v3560_v49 = vsel %vm2061_vm2, %v3558_v17, %v3555_v38  ;;  %s3590_s17 = smov 3  ;;  %v3709_v24 = vld [vmem:[#allocation1 + $0x28c] ss:$16 sm:%s3708_s11]   ;;  %s3731_s28 = smov 12 }
  0xaf   :  { %v3571_v43 = vld [vmem:[#allocation1 + $0x385] ss:$16 sm:%s3570_s9]   ;;  %v3714_v25 = vld [vmem:[#allocation1 + $0x28c] ss:$16 sm:%s3713_s18]   ;;  %v3711_v47 = vsel %vm2053_vm0, %v3709_v24, %v3706_v46  ;;  %s3736_s9 = smov 48  ;;  %s3866_s23 = smov 3 }
  0xb0   :  { %v3573_v0 = vsel %vm2053_vm0, %v3571_v43, %v3568_v42  ;;  %v3576_v1 = vld [vmem:[#allocation1 + $0x385] ss:$16 sm:%s3575_s26]   ;;  %v3719_v48 = vld [vmem:[#allocation1 + $0x28c] ss:$16 sm:%s3718_s19]   ;;  %v3716_v27 = vsel %vm2057_vm1, %v3714_v25, %v3711_v47  ;;  %s3741_s26 = smov 192  ;;  %s3869_s29 = smov 12 }
  0xb1   :  { %v3581_v51 = vld [vmem:[#allocation1 + $0x385] ss:$16 sm:%s3580_s27]   ;;  %v3578_v52 = vsel %vm2057_vm1, %v3576_v1, %v3573_v0  ;;  %v3729_v26 = vld [vmem:[#allocation1 + $0xc] ss:$16 sm:%s3728_s16]   ;;  %s3751_s27 = smov 3  ;;  %v3721_v28 = vsel %vm2061_vm2, %v3719_v48, %v3716_v27  ;;  %s3874_s11 = smov 48 }
  0xb2   :  { %v3591_v18 = vld [vmem:[#allocation1 + $0x105] ss:$16 sm:%s3590_s17]   ;;  %v3583_v2 = vsel %vm2061_vm2, %v3581_v51, %v3578_v52  ;;  %v3732_v63 = vld [vmem:[#allocation1 + $0xc] ss:$16 sm:%s3731_s28]   ;;  %s3754_s17 = smov 12  ;;  %v6324_v15 = vpack.i.bf16 %v3721_v28, %v3698_v11  ;;  %s3879_s18 = smov 192 }
  0xb3   :  { %v3594_v19 = vld [vmem:[#allocation1 + $0x105] ss:$16 sm:%s3593_s20]   ;;  %v6309_v57 = vpack.i.bf16 %v3583_v2, %v3560_v49  ;;  %v3737_v3 = vld [vmem:[#allocation1 + $0xc] ss:$16 sm:%s3736_s9]   ;;  %v3734_v29 = vsel %vm2053_vm0, %v3732_v63, %v3729_v26  ;;  %s3759_s20 = smov 48  ;;  %s3888_s19 = smov 3 }
  0xb4   :  { %v3596_v36 = vsel %vm2053_vm0, %v3594_v19, %v3591_v18  ;;  %v3599_v53 = vld [vmem:[#allocation1 + $0x105] ss:$16 sm:%s3598_s13]   ;;  %v3742_v30 = vld [vmem:[#allocation1 + $0xc] ss:$16 sm:%s3741_s26]   ;;  %v3739_v16 = vsel %vm2057_vm1, %v3737_v3, %v3734_v29  ;;  %s3774_s13 = smov 3  ;;  %s3891_s16 = smov 12 }
  0xb5   :  { %v3604_v56 = vld [vmem:[#allocation1 + $0x105] ss:$16 sm:%s3603_s14]   ;;  %v3601_v20 = vsel %vm2057_vm1, %v3599_v53, %v3596_v36  ;;  %6310 = vrot.lane.b32.xlu1 %v6309_v57, %s6509_s6  ;;  %v3752_v35 = vld [vmem:[#allocation1 + $0x20c] ss:$16 sm:%s3751_s27]   ;;  %v3744_v38 = vsel %vm2061_vm2, %v3742_v30, %v3739_v16  ;;  %s3777_s14 = smov 12  ;;  %s3896_s28 = smov 48 }
  0xb6   :  { %v3614_v6 = vld [vmem:[#allocation1 + $0x305] ss:$16 sm:%s3613_s0]   ;;  %v3606_v50 = vsel %vm2061_vm2, %v3604_v56, %v3601_v20  ;;  %v3755_v17 = vld [vmem:[#allocation1 + $0x20c] ss:$16 sm:%s3754_s17]   ;;  %s3782_s0 = smov 48  ;;  %s3901_s9 = smov 192 }
  0xb7   :  { %v3617_v31 = vld [vmem:[#allocation1 + $0x305] ss:$16 sm:%s3616_s8]   ;;  %v3760_v37 = vld [vmem:[#allocation1 + $0x20c] ss:$16 sm:%s3759_s20]   ;;  %v3757_v42 = vsel %vm2053_vm0, %v3755_v17, %v3752_v35  ;;  %s6510_s8 = smov 76   ;;  %s3911_s26 = smov 3 }
  0xb8   :  { %v3619_v58 = vsel %vm2053_vm0, %v3617_v31, %v3614_v6  ;;  %v3622_v59 = vld [vmem:[#allocation1 + $0x305] ss:$16 sm:%s3621_s3]   ;;  %v3775_v49 = vld [vmem:[#allocation1 + $0x18c] ss:$16 sm:%s3774_s13]   ;;  %v3762_v0 = vsel %vm2057_vm1, %v3760_v37, %v3757_v42  ;;  %s3787_s3 = smov 192  ;;  %s3914_s27 = smov 12 }
  0xb9   :  { %v3627_v60 = vld [vmem:[#allocation1 + $0x305] ss:$16 sm:%s3626_s4]   ;;  %v3624_v7 = vsel %vm2057_vm1, %v3622_v59, %v3619_v58  ;;  %v3778_v1 = vld [vmem:[#allocation1 + $0x18c] ss:$16 sm:%s3777_s14]   ;;  %s3797_s4 = smov 3  ;;  %s3919_s17 = smov 48 }
  0xba   :  { %v3637_v61 = vld [vmem:[#allocation1 + $0x85] ss:$16 sm:%s3636_s15]   ;;  %v3629_v32 = vsel %vm2061_vm2, %v3627_v60, %v3624_v7  ;;  %v3783_v51 = vld [vmem:[#allocation1 + $0x18c] ss:$16 sm:%s3782_s0]   ;;  %v3780_v18 = vsel %vm2053_vm0, %v3778_v1, %v3775_v49  ;;  %s3800_s15 = smov 12  ;;  %v6216_v34 = vpop.permute.xlu1 %6215  ;;  %s3924_s20 = smov 192 }
  0xbb   :  { %v3640_v4 = vld [vmem:[#allocation1 + $0x85] ss:$16 sm:%s3639_s7]   ;;  %v6314_v5 = vpack.i.bf16 %v3629_v32, %v3606_v50  ;;  %v3788_v19 = vld [vmem:[#allocation1 + $0x18c] ss:$16 sm:%s3787_s3]   ;;  %s3805_s7 = smov 48  ;;  %v3785_v53 = vsel %vm2057_vm1, %v3783_v51, %v3780_v18  ;;  %v6218_v26 = vunpack.i.h.bf16 %v6216_v34  ;;  %v6217_v27 = vunpack.i.l.bf16 %v6216_v34  ;;  %s3937_s13 = smov 12 }
  0xbc   :  { %v3642_v44 = vsel %vm2053_vm0, %v3640_v4, %v3637_v61  ;;  %v3645_v8 = vld [vmem:[#allocation1 + $0x85] ss:$16 sm:%s3644_s5]   ;;  %v3798_v2 = vld [vmem:[#allocation1 + $0x38c] ss:$16 sm:%s3797_s4]   ;;  %s3810_s5 = smov 192  ;;  %v3790_v20 = vsel %vm2061_vm2, %v3788_v19, %v3785_v53  ;;  %s3942_s14 = smov 48 }
  0xbd   :  { %v3650_v12 = vld [vmem:[#allocation1 + $0x85] ss:$16 sm:%s3649_s22]   ;;  %v3647_v9 = vsel %vm2057_vm1, %v3645_v8, %v3642_v44  ;;  %6315 = vrot.lane.b32.xlu0 %v6314_v5, %s6509_s6  ;;  %v3801_v56 = vld [vmem:[#allocation1 + $0x38c] ss:$16 sm:%s3800_s15]   ;;  %s3820_s22 = smov 3  ;;  %2484 = vst.msk [vmem:[#allocation0 + $0x70] sm:$0xff] %vm2252_vm5, %v6218_v26  }
  0xbe   :  { %v3660_v10 = vld [vmem:[#allocation1 + $0x285] ss:$16 sm:%s3659_s24]   ;;  %v3652_v13 = vsel %vm2061_vm2, %v3650_v12, %v3647_v9  ;;  %v3806_v57 = vld [vmem:[#allocation1 + $0x38c] ss:$16 sm:%s3805_s7]   ;;  %v3803_v6 = vsel %vm2053_vm0, %v3801_v56, %v3798_v2  ;;  %s3823_s24 = smov 12  ;;  %2487 = vst.msk [vmem:[#allocation0 + $0xb0] sm:$0xff] %vm2255_vm6, %v6218_v26  }
  0xbf   :  { %v3663_v14 = vld [vmem:[#allocation1 + $0x285] ss:$16 sm:%s3662_s12]   ;;  %v3811_v31 = vld [vmem:[#allocation1 + $0x38c] ss:$16 sm:%s3810_s5]   ;;  %s3828_s12 = smov 48  ;;  %v3808_v58 = vsel %vm2057_vm1, %v3806_v57, %v3803_v6  ;;  %2438 = vst.msk [vmem:[#allocation0 + $0x10] sm:$0xff] %vm2252_vm5, %v6217_v27  }
  0xc0   :  { %v3665_v33 = vsel %vm2053_vm0, %v3663_v14, %v3660_v10  ;;  %v3668_v21 = vld [vmem:[#allocation1 + $0x285] ss:$16 sm:%s3667_s30]   ;;  %v3821_v50 = vld [vmem:[#allocation1 + $0x10c] ss:$16 sm:%s3820_s22]   ;;  %s3833_s30 = smov 192  ;;  %v3813_v7 = vsel %vm2061_vm2, %v3811_v31, %v3808_v58  ;;  %2441 = vst.msk [vmem:[#allocation0 + $0x50] sm:$0xff] %vm2255_vm6, %v6217_v27  }
  0xc1   :  { %v3673_v45 = vld [vmem:[#allocation1 + $0x285] ss:$16 sm:%s3672_s10]   ;;  %v3670_v54 = vsel %vm2057_vm1, %v3668_v21, %v3665_v33  ;;  %6325 = vrot.lane.b32.xlu0 %v6324_v15, %s6510_s8  ;;  %v3824_v59 = vld [vmem:[#allocation1 + $0x10c] ss:$16 sm:%s3823_s24]   ;;  %s3843_s10 = smov 3  ;;  %v6334_v44 = vpack.i.bf16 %v3813_v7, %v3790_v20  ;;  %s3947_s0 = smov 192 }
  0xc2   :  { %v3675_v40 = vsel %vm2061_vm2, %v3673_v45, %v3670_v54  ;;  %v3829_v60 = vld [vmem:[#allocation1 + $0x10c] ss:$16 sm:%s3828_s12]   ;;  %v3826_v61 = vsel %vm2053_vm0, %v3824_v59, %v3821_v50  ;;  %v3870_v21 = vld [vmem:[#allocation1 + $0x4] ss:$16 sm:%s3869_s29]   ;;  %v6206_v54 = vpop.permute.xlu0 %6205  ;;  %s3960_s3 = smov 12  ;;  %s6511_s4 = smov 68  }
  0xc3   :  { %v6319_v62 = vpack.i.bf16 %v3675_v40, %v3652_v13  ;;  %v3834_v4 = vld [vmem:[#allocation1 + $0x10c] ss:$16 sm:%s3833_s30]   ;;  %v3831_v8 = vsel %vm2057_vm1, %v3829_v60, %v3826_v61  ;;  %v3867_v13 = vld [vmem:[#allocation1 + $0x4] ss:$16 sm:%s3866_s23]   ;;  %v6208_v46 = vunpack.i.h.bf16 %v6206_v54  ;;  %v6207_v24 = vunpack.i.l.bf16 %v6206_v54  ;;  %s3965_s15 = smov 48  ;;  %s3970_s7 = smov 192 }
  0xc4   :  { %v3844_v32 = vld [vmem:[#allocation1 + $0x30c] ss:$16 sm:%s3843_s10]   ;;  %v3836_v9 = vsel %vm2061_vm2, %v3834_v4, %v3831_v8  ;;  %v3875_v45 = vld [vmem:[#allocation1 + $0x4] ss:$16 sm:%s3874_s11]   ;;  %v3872_v40 = vsel %vm2053_vm0, %v3870_v21, %v3867_v13  ;;  %s3980_s5 = smov 3  ;;  %s3983_s22 = smov 12 }
  0xc5   :  { %6320 = vrot.lane.b32.xlu1 %v6319_v62, %s6509_s6  ;;  %s3764_s6 = smov 192  ;;  %v3847_v12 = vld [vmem:[#allocation1 + $0x30c] ss:$16 sm:%s3846_s2]   ;;  %6335 = vrot.lane.b32.xlu0 %v6334_v44, %s6510_s8  ;;  %v3880_v22 = vld [vmem:[#allocation1 + $0x4] ss:$16 sm:%s3879_s18]   ;;  %v3877_v55 = vsel %vm2057_vm1, %v3875_v45, %v3872_v40  ;;  %2300 = vst.msk [vmem:[#allocation0 + $0xa0] sm:$0xff] %vm2252_vm5, %v6208_v46  }
  0xc6   :  { %v3765_v43 = vld [vmem:[#allocation1 + $0x20c] ss:$16 sm:%s3764_s6]   ;;  %v3849_v10 = vsel %vm2053_vm0, %v3847_v12, %v3844_v32  ;;  %v3889_v62 = vld [vmem:[#allocation1 + $0x204] ss:$16 sm:%s3888_s19]   ;;  %v3882_v25 = vsel %vm2061_vm2, %v3880_v22, %v3877_v55  ;;  %2303 = vst.msk [vmem:[#allocation0 + $0x80] sm:$0xff] %vm2255_vm6, %v6208_v46   ;;  %2257 = vst.msk [vmem:[#allocation0 + $0x20] sm:$0xff] %vm2255_vm6, %v6207_v24   ;;  %v6211_v18 = vpop.permute.xlu0 %6210 }
  0xc7   :  { %v3767_v52 = vsel %vm2061_vm2, %v3765_v43, %v3762_v0  ;;  %v3852_v5 = vld [vmem:[#allocation1 + $0x30c] ss:$16 sm:%s3851_s21]   ;;  %v3892_v41 = vld [vmem:[#allocation1 + $0x204] ss:$16 sm:%s3891_s16]   ;;  %2254 = vst.msk [vmem:[#allocation0 + $0x40] sm:$0xff] %vm2252_vm5, %v6207_v24   ;;  %s3934_s6 = smov 3  ;;  %v6213_v57 = vunpack.i.h.bf16 %v6211_v18  ;;  %v6212_v20 = vunpack.i.l.bf16 %v6211_v18 }
  0xc8   :  { %v6329_v36 = vpack.i.bf16 %v3767_v52, %v3744_v38  ;;  %v3857_v14 = vld [vmem:[#allocation1 + $0x30c] ss:$16 sm:%s3856_s25]   ;;  %v3854_v33 = vsel %vm2057_vm1, %v3852_v5, %v3849_v10  ;;  %v3894_v11 = vsel %vm2053_vm0, %v3892_v41, %v3889_v62  ;;  %v3897_v47 = vld [vmem:[#allocation1 + $0x204] ss:$16 sm:%s3896_s28]   ;;  %s3988_s24 = smov 48  ;;  %s3993_s12 = smov 192 }
  0xc9   :  { %v3859_v39 = vsel %vm2061_vm2, %v3857_v14, %v3854_v33  ;;  %v3902_v48 = vld [vmem:[#allocation1 + $0x204] ss:$16 sm:%s3901_s9]   ;;  %v3899_v63 = vsel %vm2057_vm1, %v3897_v47, %v3894_v11  ;;  %s4003_s30 = smov 3  ;;  %s4006_s10 = smov 12  ;;  %2392 = vst.msk [vmem:[#allocation0 + $0x88] sm:$0xff] %vm2252_vm5, %v6213_v57   ;;  %2346 = vst.msk [vmem:[#allocation0 + $0x28] sm:$0xff] %vm2252_vm5, %v6212_v20  }
  0xca   :  { %6330 = vrot.lane.b32.xlu1 %v6329_v36, %s6510_s8  ;;  %v6339_v23 = vpack.i.bf16 %v3859_v39, %v3836_v9  ;;  %v3912_v3 = vld [vmem:[#allocation1 + $0x184] ss:$16 sm:%s3911_s26]   ;;  %v3904_v29 = vsel %vm2061_vm2, %v3902_v48, %v3899_v63  ;;  %2395 = vst.msk [vmem:[#allocation0 + $0x68] sm:$0xff] %vm2255_vm6, %v6213_v57   ;;  %2349 = vst.msk [vmem:[#allocation0 + $0x8] sm:$0xff] %vm2255_vm6, %v6212_v20   ;;  %s4011_s2 = smov 48  ;;  %s4016_s21 = smov 192 }
  0xcb   :  { %v3915_v28 = vld [vmem:[#allocation1 + $0x184] ss:$16 sm:%s3914_s27]   ;;  %v6344_v16 = vpack.i.bf16 %v3904_v29, %v3882_v25  ;;  %s4026_s25 = smov 3  ;;  %s4029_s23 = smov 12 }
  0xcc   :  { %v3917_v30 = vsel %vm2053_vm0, %v3915_v28, %v3912_v3  ;;  %v3920_v35 = vld [vmem:[#allocation1 + $0x184] ss:$16 sm:%s3919_s17]   ;;  %s4034_s29 = smov 48  ;;  %s4039_s11 = smov 192 }
  0xcd   :  { %v3925_v15 = vld [vmem:[#allocation1 + $0x184] ss:$16 sm:%s3924_s20]   ;;  %v3922_v17 = vsel %vm2057_vm1, %v3920_v35, %v3917_v30  ;;  %6345 = vrot.lane.b32.xlu0 %v6344_v16, %s6511_s4  ;;  %s4049_s18 = smov 3  ;;  %s4052_s19 = smov 12 }
  0xce   :  { %6340 = vrot.lane.b32.xlu1 %v6339_v23, %s6510_s8  ;;  %v3935_v37 = vld [vmem:[#allocation1 + $0x384] ss:$16 sm:%s3934_s6]   ;;  %v3927_v42 = vsel %vm2061_vm2, %v3925_v15, %v3922_v17  ;;  %s3957_s8 = smov 3  ;;  %v4050_v55 = vld [vmem:[#allocation1 + $0x8b] ss:$16 sm:%s4049_s18]   ;;  %s4057_s16 = smov 48 }
  0xcf   :  { %v3938_v38 = vld [vmem:[#allocation1 + $0x384] ss:$16 sm:%s3937_s13]   ;;  %v6221_v19 = vpop.permute.xlu1 %6220  ;;  %v4053_v62 = vld [vmem:[#allocation1 + $0x8b] ss:$16 sm:%s4052_s19]   ;;  %s4062_s28 = smov 192  ;;  %s4072_s9 = smov 3 }
  0xd0   :  { %v3940_v43 = vsel %vm2053_vm0, %v3938_v38, %v3935_v37  ;;  %v3943_v49 = vld [vmem:[#allocation1 + $0x384] ss:$16 sm:%s3942_s14]   ;;  %v6223_v59 = vunpack.i.h.bf16 %v6221_v19  ;;  %v6222_v60 = vunpack.i.l.bf16 %v6221_v19  ;;  %v4055_v46 = vsel %vm2053_vm0, %v4053_v62, %v4050_v55  ;;  %v4058_v24 = vld [vmem:[#allocation1 + $0x8b] ss:$16 sm:%s4057_s16]   ;;  %s4075_s26 = smov 12  ;;  %s4080_s27 = smov 48 }
  0xd1   :  { %v3948_v0 = vld [vmem:[#allocation1 + $0x384] ss:$16 sm:%s3947_s0]   ;;  %v3945_v1 = vsel %vm2057_vm1, %v3943_v49, %v3940_v43  ;;  %v4063_v25 = vld [vmem:[#allocation1 + $0x8b] ss:$16 sm:%s4062_s28]   ;;  %v4060_v47 = vsel %vm2057_vm1, %v4058_v24, %v4055_v46  ;;  %s4085_s17 = smov 192  ;;  %s4095_s20 = smov 3 }
  0xd2   :  { %v3958_v51 = vld [vmem:[#allocation1 + $0x104] ss:$16 sm:%s3957_s8]   ;;  %v3950_v2 = vsel %vm2061_vm2, %v3948_v0, %v3945_v1  ;;  %2576 = vst.msk [vmem:[#allocation0 + $0xb8] sm:$0xff] %vm2252_vm5, %v6223_v59   ;;  %2530 = vst.msk [vmem:[#allocation0 + $0x58] sm:$0xff] %vm2252_vm5, %v6222_v60   ;;  %v4073_v48 = vld [vmem:[#allocation1 + $0x28b] ss:$16 sm:%s4072_s9]   ;;  %v4065_v63 = vsel %vm2061_vm2, %v4063_v25, %v4060_v47 }
  0xd3   :  { %v3961_v52 = vld [vmem:[#allocation1 + $0x104] ss:$16 sm:%s3960_s3]   ;;  %v6349_v6 = vpack.i.bf16 %v3950_v2, %v3927_v42  ;;  %2579 = vst.msk [vmem:[#allocation0 + $0x98] sm:$0xff] %vm2255_vm6, %v6223_v59   ;;  %2533 = vst.msk [vmem:[#allocation0 + $0x38] sm:$0xff] %vm2255_vm6, %v6222_v60   ;;  %v4076_v26 = vld [vmem:[#allocation1 + $0x28b] ss:$16 sm:%s4075_s26]  }
  0xd4   :  { %v3963_v36 = vsel %vm2053_vm0, %v3961_v52, %v3958_v51  ;;  %v3966_v53 = vld [vmem:[#allocation1 + $0x104] ss:$16 sm:%s3965_s15]   ;;  %v4081_v27 = vld [vmem:[#allocation1 + $0x28b] ss:$16 sm:%s4080_s27]   ;;  %v4078_v3 = vsel %vm2053_vm0, %v4076_v26, %v4073_v48  ;;  %s4098_s6 = smov 12  ;;  %s4103_s13 = smov 48 }
  0xd5   :  { %v3971_v56 = vld [vmem:[#allocation1 + $0x104] ss:$16 sm:%s3970_s7]   ;;  %v3968_v31 = vsel %vm2057_vm1, %v3966_v53, %v3963_v36  ;;  %6350 = vrot.lane.b32.xlu1 %v6349_v6, %s6511_s4  ;;  %v4086_v28 = vld [vmem:[#allocation1 + $0x28b] ss:$16 sm:%s4085_s17]   ;;  %v4083_v35 = vsel %vm2057_vm1, %v4081_v27, %v4078_v3  ;;  %s4108_s14 = smov 192  ;;  %s4118_s0 = smov 3 }
  0xd6   :  { %v3981_v50 = vld [vmem:[#allocation1 + $0x304] ss:$16 sm:%s3980_s5]   ;;  %v3973_v7 = vsel %vm2061_vm2, %v3971_v56, %v3968_v31  ;;  %v4096_v29 = vld [vmem:[#allocation1 + $0xb] ss:$16 sm:%s4095_s20]   ;;  %v4088_v17 = vsel %vm2061_vm2, %v4086_v28, %v4083_v35  ;;  %s4121_s8 = smov 12  ;;  %s4126_s3 = smov 48 }
  0xd7   :  { %v3984_v58 = vld [vmem:[#allocation1 + $0x304] ss:$16 sm:%s3983_s22]   ;;  %v7353_v5 = vpop.permute.xlu0 %6225  ;;  %v4099_v15 = vld [vmem:[#allocation1 + $0xb] ss:$16 sm:%s4098_s6]   ;;  %v6364_v43 = vpack.i.bf16 %v4088_v17, %v4065_v63  ;;  %s4141_s15 = smov 3  ;;  %s4144_s7 = smov 12 }
  0xd8   :  { %v3986_v61 = vsel %vm2053_vm0, %v3984_v58, %v3981_v50  ;;  %v3989_v4 = vld [vmem:[#allocation1 + $0x304] ss:$16 sm:%s3988_s24]   ;;  %v4104_v16 = vld [vmem:[#allocation1 + $0xb] ss:$16 sm:%s4103_s13]   ;;  %v4101_v37 = vsel %vm2053_vm0, %v4099_v15, %v4096_v29  ;;  %s4149_s5 = smov 48  ;;  %s6512_s22 = smov 59  }
  0xd9   :  { %v3994_v32 = vld [vmem:[#allocation1 + $0x304] ss:$16 sm:%s3993_s12]   ;;  %v3991_v44 = vsel %vm2057_vm1, %v3989_v4, %v3986_v61  ;;  %v7368_v30 = vpop.permute.xlu1 %6230  ;;  %v4109_v38 = vld [vmem:[#allocation1 + $0xb] ss:$16 sm:%s4108_s14]   ;;  %v4106_v49 = vsel %vm2057_vm1, %v4104_v16, %v4101_v37  ;;  %s4154_s24 = smov 192  ;;  %s4164_s12 = smov 3 }
  0xda   :  { %v4004_v8 = vld [vmem:[#allocation1 + $0x84] ss:$16 sm:%s4003_s30]   ;;  %v3996_v9 = vsel %vm2061_vm2, %v3994_v32, %v3991_v44  ;;  %v4119_v42 = vld [vmem:[#allocation1 + $0x20b] ss:$16 sm:%s4118_s0]   ;;  %v4111_v51 = vsel %vm2061_vm2, %v4109_v38, %v4106_v49  ;;  %s4167_s30 = smov 12  ;;  %s4213_s18 = smov 12 }
  0xdb   :  { %v4007_v12 = vld [vmem:[#allocation1 + $0x84] ss:$16 sm:%s4006_s10]   ;;  %v6354_v33 = vpack.i.bf16 %v3996_v9, %v3973_v7  ;;  %v4122_v0 = vld [vmem:[#allocation1 + $0x20b] ss:$16 sm:%s4121_s8]   ;;  %s4172_s10 = smov 48  ;;  %v6228_v9 = vunpack.i.h.bf16 %v7353_v5  ;;  %s4218_s19 = smov 48 }
  0xdc   :  { %v4009_v10 = vsel %vm2053_vm0, %v4007_v12, %v4004_v8  ;;  %v4012_v14 = vld [vmem:[#allocation1 + $0x84] ss:$16 sm:%s4011_s2]   ;;  %v4127_v1 = vld [vmem:[#allocation1 + $0x20b] ss:$16 sm:%s4126_s3]   ;;  %v4124_v52 = vsel %vm2053_vm0, %v4122_v0, %v4119_v42  ;;  %s4177_s2 = smov 192  ;;  %s4223_s16 = smov 192 }
  0xdd   :  { %v4017_v13 = vld [vmem:[#allocation1 + $0x84] ss:$16 sm:%s4016_s21]   ;;  %v4014_v21 = vsel %vm2057_vm1, %v4012_v14, %v4009_v10  ;;  %6355 = vrot.lane.b32.xlu0 %v6354_v33, %s6511_s4  ;;  %v4142_v19 = vld [vmem:[#allocation1 + $0x18b] ss:$16 sm:%s4141_s15]   ;;  %v4129_v2 = vsel %vm2057_vm1, %v4127_v1, %v4124_v52  ;;  %s4187_s21 = smov 3  ;;  %v6227_v10 = vunpack.i.l.bf16 %v7353_v5  ;;  %s4233_s28 = smov 3 }
  0xde   :  { %v4027_v45 = vld [vmem:[#allocation1 + $0x284] ss:$16 sm:%s4026_s25]   ;;  %v4019_v34 = vsel %vm2061_vm2, %v4017_v13, %v4014_v21  ;;  %v4145_v36 = vld [vmem:[#allocation1 + $0x18b] ss:$16 sm:%s4144_s7]   ;;  %s4190_s25 = smov 12  ;;  %s4236_s9 = smov 12 }
  0xdf   :  { %v4030_v54 = vld [vmem:[#allocation1 + $0x284] ss:$16 sm:%s4029_s23]   ;;  %v4150_v53 = vld [vmem:[#allocation1 + $0x18b] ss:$16 sm:%s4149_s5]   ;;  %v4147_v57 = vsel %vm2053_vm0, %v4145_v36, %v4142_v19  ;;  %s4195_s23 = smov 48  ;;  %s4241_s26 = smov 48 }
  0xe0   :  { %v4032_v39 = vsel %vm2053_vm0, %v4030_v54, %v4027_v45  ;;  %v4035_v40 = vld [vmem:[#allocation1 + $0x284] ss:$16 sm:%s4034_s29]   ;;  %v4155_v20 = vld [vmem:[#allocation1 + $0x18b] ss:$16 sm:%s4154_s24]   ;;  %v4152_v50 = vsel %vm2057_vm1, %v4150_v53, %v4147_v57  ;;  %s4200_s29 = smov 192  ;;  %v6233_v45 = vunpack.i.h.bf16 %v7368_v30  ;;  %v6232_v54 = vunpack.i.l.bf16 %v7368_v30  ;;  %s4246_s27 = smov 192 }
  0xe1   :  { %v4040_v22 = vld [vmem:[#allocation1 + $0x284] ss:$16 sm:%s4039_s11]   ;;  %v4037_v23 = vsel %vm2057_vm1, %v4035_v40, %v4032_v39  ;;  %6365 = vrot.lane.b32.xlu0 %v6364_v43, %s6512_s22  ;;  %v4165_v6 = vld [vmem:[#allocation1 + $0x38b] ss:$16 sm:%s4164_s12]   ;;  %v4157_v60 = vsel %vm2061_vm2, %v4155_v20, %v4152_v50  ;;  %s4210_s11 = smov 3  ;;  %s4255_s17 = smov 3 }
  0xe2   :  { %v4042_v41 = vsel %vm2061_vm2, %v4040_v22, %v4037_v23  ;;  %v4168_v58 = vld [vmem:[#allocation1 + $0x38b] ss:$16 sm:%s4167_s30]   ;;  %v4234_v24 = vld [vmem:[#allocation1 + $0x3] ss:$16 sm:%s4233_s28]   ;;  %s4258_s20 = smov 12  ;;  %s4263_s6 = smov 48 }
  0xe3   :  { %v6359_v11 = vpack.i.bf16 %v4042_v41, %v4019_v34  ;;  %v4173_v59 = vld [vmem:[#allocation1 + $0x38b] ss:$16 sm:%s4172_s10]   ;;  %v4170_v7 = vsel %vm2053_vm0, %v4168_v58, %v4165_v6  ;;  %v4242_v47 = vld [vmem:[#allocation1 + $0x3] ss:$16 sm:%s4241_s26]   ;;  %s4268_s13 = smov 192  ;;  %2622 = vst.msk [vmem:[#allocation0 + $0x20] sm:$0xff] %vm2620_vm7, %v6227_v10  }
  0xe4   :  { %v4178_v61 = vld [vmem:[#allocation1 + $0x38b] ss:$16 sm:%s4177_s2]   ;;  %v4175_v44 = vsel %vm2057_vm1, %v4173_v59, %v4170_v7  ;;  %v4247_v27 = vld [vmem:[#allocation1 + $0x3] ss:$16 sm:%s4246_s27]   ;;  %2667 = vst.msk [vmem:[#allocation0 + $0x80] sm:$0xff] %vm2620_vm7, %v6228_v9   ;;  %2713 = vst.msk [vmem:[#allocation0 + $0x8] sm:$0xff] %vm2620_vm7, %v6232_v54  }
  0xe5   :  { %6360 = vrot.lane.b32.xlu1 %v6359_v11, %s6511_s4  ;;  %s4131_s4 = smov 192  ;;  %v4188_v4 = vld [vmem:[#allocation1 + $0x10b] ss:$16 sm:%s4187_s21]   ;;  %v4180_v14 = vsel %vm2061_vm2, %v4178_v61, %v4175_v44  ;;  %v4237_v11 = vld [vmem:[#allocation1 + $0x3] ss:$16 sm:%s4236_s9]   ;;  %2759 = vst.msk [vmem:[#allocation0 + $0x68] sm:$0xff] %vm2620_vm7, %v6233_v45  }
  0xe6   :  { %v4132_v18 = vld [vmem:[#allocation1 + $0x20b] ss:$16 sm:%s4131_s4]   ;;  %v6374_v34 = vpack.i.bf16 %v4180_v14, %v4157_v60  ;;  %v4239_v26 = vsel %vm2053_vm0, %v4237_v11, %v4234_v24  ;;  %v4256_v28 = vld [vmem:[#allocation1 + $0x203] ss:$16 sm:%s4255_s17]   ;;  %s4278_s14 = smov 3  ;;  %s4281_s0 = smov 12 }
  0xe7   :  { %v4134_v56 = vsel %vm2061_vm2, %v4132_v18, %v4129_v2  ;;  %v4191_v8 = vld [vmem:[#allocation1 + $0x10b] ss:$16 sm:%s4190_s25]   ;;  %v4244_v3 = vsel %vm2057_vm1, %v4242_v47, %v4239_v26  ;;  %v4259_v29 = vld [vmem:[#allocation1 + $0x203] ss:$16 sm:%s4258_s20]   ;;  %s4286_s8 = smov 48  ;;  %s4291_s3 = smov 192 }
  0xe8   :  { %v6369_v31 = vpack.i.bf16 %v4134_v56, %v4111_v51  ;;  %v4196_v12 = vld [vmem:[#allocation1 + $0x10b] ss:$16 sm:%s4195_s23]   ;;  %v4193_v13 = vsel %vm2053_vm0, %v4191_v8, %v4188_v4  ;;  %6375 = vrot.lane.b32.xlu0 %v6374_v34, %s6512_s22  ;;  %v4249_v35 = vsel %vm2061_vm2, %v4247_v27, %v4244_v3  ;;  %v4261_v15 = vsel %vm2053_vm0, %v4259_v29, %v4256_v28  ;;  %v4264_v16 = vld [vmem:[#allocation1 + $0x203] ss:$16 sm:%s4263_s6]   ;;  %s4301_s4 = smov 3  ;;  %s4304_s15 = smov 12 }
  0xe9   :  { %v7383_v32 = vpop.permute.xlu0 %6235  ;;  %v4201_v33 = vld [vmem:[#allocation1 + $0x10b] ss:$16 sm:%s4200_s29]   ;;  %v4198_v39 = vsel %vm2057_vm1, %v4196_v12, %v4193_v13  ;;  %v4269_v17 = vld [vmem:[#allocation1 + $0x203] ss:$16 sm:%s4268_s13]   ;;  %v4266_v38 = vsel %vm2057_vm1, %v4264_v16, %v4261_v15  ;;  %s4309_s7 = smov 48  ;;  %s4314_s5 = smov 192 }
  0xea   :  { %6370 = vrot.lane.b32.xlu1 %v6369_v31, %s6512_s22  ;;  %v4211_v21 = vld [vmem:[#allocation1 + $0x30b] ss:$16 sm:%s4210_s11]   ;;  %v6238_v23 = vunpack.i.h.bf16 %v7383_v32  ;;  %v6237_v55 = vunpack.i.l.bf16 %v7383_v32  ;;  %v4203_v62 = vsel %vm2061_vm2, %v4201_v33, %v4198_v39  ;;  %v4279_v42 = vld [vmem:[#allocation1 + $0x183] ss:$16 sm:%s4278_s14]   ;;  %v4271_v1 = vsel %vm2061_vm2, %v4269_v17, %v4266_v38  ;;  %s4327_s24 = smov 12  ;;  %s6513_s12 = smov 51  }
  0xeb   :  { %v4214_v40 = vld [vmem:[#allocation1 + $0x30b] ss:$16 sm:%s4213_s18]   ;;  %v4282_v43 = vld [vmem:[#allocation1 + $0x183] ss:$16 sm:%s4281_s0]   ;;  %v6384_v19 = vpack.i.bf16 %v4271_v1, %v4249_v35  ;;  %s4332_s30 = smov 48  ;;  %s4337_s10 = smov 192 }
  0xec   :  { %v4219_v22 = vld [vmem:[#allocation1 + $0x30b] ss:$16 sm:%s4218_s19]   ;;  %v4216_v41 = vsel %vm2053_vm0, %v4214_v40, %v4211_v21  ;;  %2805 = vst.msk [vmem:[#allocation0 + $0x50] sm:$0xff] %vm2620_vm7, %v6237_v55   ;;  %2851 = vst.msk [vmem:[#allocation0 + $0xb0] sm:$0xff] %vm2620_vm7, %v6238_v23   ;;  %v4284_v51 = vsel %vm2053_vm0, %v4282_v43, %v4279_v42  ;;  %v4287_v52 = vld [vmem:[#allocation1 + $0x183] ss:$16 sm:%s4286_s8]  }
  0xed   :  { %v4224_v46 = vld [vmem:[#allocation1 + $0x30b] ss:$16 sm:%s4223_s16]   ;;  %v4221_v25 = vsel %vm2057_vm1, %v4219_v22, %v4216_v41  ;;  %v4292_v18 = vld [vmem:[#allocation1 + $0x183] ss:$16 sm:%s4291_s3]   ;;  %v4289_v2 = vsel %vm2057_vm1, %v4287_v52, %v4284_v51  ;;  %v7440_v31 = vpop.permute.xlu0 %6240  ;;  %6385 = vrot.lane.b32.xlu0 %v6384_v19, %s6513_s12  ;;  %s4347_s2 = smov 3  ;;  %s4350_s21 = smov 12 }
  0xee   :  { %v4226_v48 = vsel %vm2061_vm2, %v4224_v46, %v4221_v25  ;;  %v4302_v36 = vld [vmem:[#allocation1 + $0x383] ss:$16 sm:%s4301_s4]   ;;  %v4294_v56 = vsel %vm2061_vm2, %v4292_v18, %v4289_v2  ;;  %s4355_s25 = smov 48  ;;  %s4360_s23 = smov 192  ;;  %vm4986_vm5 = vcmask 277640   ;;  %vm5169_vm6 = vcmask 203840  }
  0xef   :  { %v6379_v63 = vpack.i.bf16 %v4226_v48, %v4203_v62  ;;  %v4305_v53 = vld [vmem:[#allocation1 + $0x383] ss:$16 sm:%s4304_s15]   ;;  %s4370_s29 = smov 3  ;;  %s4373_s11 = smov 12 }
  0xf0   :  { %v4307_v57 = vsel %vm2053_vm0, %v4305_v53, %v4302_v36  ;;  %v4310_v20 = vld [vmem:[#allocation1 + $0x383] ss:$16 sm:%s4309_s7]   ;;  %s4378_s18 = smov 48  ;;  %s4383_s19 = smov 192 }
  0xf1   :  { %6380 = vrot.lane.b32.xlu1 %v6379_v63, %s6512_s22  ;;  %v4315_v6 = vld [vmem:[#allocation1 + $0x383] ss:$16 sm:%s4314_s5]   ;;  %s4324_s22 = smov 3  ;;  %v4312_v50 = vsel %vm2057_vm1, %v4310_v20, %v4307_v57  ;;  %s4393_s16 = smov 3 }
  0xf2   :  { %v4325_v58 = vld [vmem:[#allocation1 + $0x103] ss:$16 sm:%s4324_s22]   ;;  %v4317_v60 = vsel %vm2061_vm2, %v4315_v6, %v4312_v50  ;;  %s4396_s28 = smov 12  ;;  %s4401_s9 = smov 48 }
  0xf3   :  { %v4328_v59 = vld [vmem:[#allocation1 + $0x103] ss:$16 sm:%s4327_s24]   ;;  %v6389_v44 = vpack.i.bf16 %v4317_v60, %v4294_v56  ;;  %s4406_s26 = smov 192  ;;  %s4416_s27 = smov 3 }
  0xf4   :  { %v4330_v7 = vsel %vm2053_vm0, %v4328_v59, %v4325_v58  ;;  %v4333_v61 = vld [vmem:[#allocation1 + $0x103] ss:$16 sm:%s4332_s30]   ;;  %s4419_s17 = smov 12  ;;  %v7458_v29 = vpop.permute.xlu0 %6255  ;;  %v4417_v15 = vld [vmem:[#allocation1 + $0x8a] ss:$16 sm:%s4416_s27]   ;;  %s4424_s20 = smov 48 }
  0xf5   :  { %v4338_v4 = vld [vmem:[#allocation1 + $0x103] ss:$16 sm:%s4337_s10]   ;;  %v4335_v8 = vsel %vm2057_vm1, %v4333_v61, %v4330_v7  ;;  %6390 = vrot.lane.b32.xlu1 %v6389_v44, %s6513_s12  ;;  %v4420_v16 = vld [vmem:[#allocation1 + $0x8a] ss:$16 sm:%s4419_s17]   ;;  %s4429_s6 = smov 192  ;;  %s4439_s13 = smov 3 }
  0xf6   :  { %v4348_v12 = vld [vmem:[#allocation1 + $0x303] ss:$16 sm:%s4347_s2]   ;;  %v4340_v13 = vsel %vm2061_vm2, %v4338_v4, %v4335_v8  ;;  %v4422_v38 = vsel %vm2053_vm0, %v4420_v16, %v4417_v15  ;;  %v4425_v42 = vld [vmem:[#allocation1 + $0x8a] ss:$16 sm:%s4424_s20]   ;;  %s4442_s14 = smov 12  ;;  %s4447_s0 = smov 48 }
  0xf7   :  { %v4351_v14 = vld [vmem:[#allocation1 + $0x303] ss:$16 sm:%s4350_s21]   ;;  %v4430_v43 = vld [vmem:[#allocation1 + $0x8a] ss:$16 sm:%s4429_s6]   ;;  %v4427_v51 = vsel %vm2057_vm1, %v4425_v42, %v4422_v38  ;;  %s4452_s8 = smov 192  ;;  %s4462_s3 = smov 3 }
  0xf8   :  { %v4353_v33 = vsel %vm2053_vm0, %v4351_v14, %v4348_v12  ;;  %v4356_v21 = vld [vmem:[#allocation1 + $0x303] ss:$16 sm:%s4355_s25]   ;;  %v4440_v52 = vld [vmem:[#allocation1 + $0x28a] ss:$16 sm:%s4439_s13]   ;;  %v4432_v36 = vsel %vm2061_vm2, %v4430_v43, %v4427_v51  ;;  %s4465_s4 = smov 12  ;;  %s4470_s15 = smov 48 }
  0xf9   :  { %v7423_v37 = vpop.permute.xlu1 %6245  ;;  %v4361_v34 = vld [vmem:[#allocation1 + $0x303] ss:$16 sm:%s4360_s23]   ;;  %v4358_v40 = vsel %vm2057_vm1, %v4356_v21, %v4353_v33  ;;  %v4443_v18 = vld [vmem:[#allocation1 + $0x28a] ss:$16 sm:%s4442_s14]   ;;  %s4475_s7 = smov 192  ;;  %s4485_s5 = smov 3 }
  0xfa   :  { %v6248_v49 = vunpack.i.h.bf16 %v7423_v37  ;;  %v6247_v0 = vunpack.i.l.bf16 %v7423_v37  ;;  %v4371_v22 = vld [vmem:[#allocation1 + $0x83] ss:$16 sm:%s4370_s29]   ;;  %v4363_v41 = vsel %vm2061_vm2, %v4361_v34, %v4358_v40  ;;  %v4448_v19 = vld [vmem:[#allocation1 + $0x28a] ss:$16 sm:%s4447_s0]   ;;  %v4445_v53 = vsel %vm2053_vm0, %v4443_v18, %v4440_v52  ;;  %s4488_s22 = smov 12  ;;  %s4493_s24 = smov 48 }
  0xfb   :  { %v4374_v62 = vld [vmem:[#allocation1 + $0x83] ss:$16 sm:%s4373_s11]   ;;  %v6394_v11 = vpack.i.bf16 %v4363_v41, %v4340_v13  ;;  %v4453_v56 = vld [vmem:[#allocation1 + $0x28a] ss:$16 sm:%s4452_s8]   ;;  %v4450_v20 = vsel %vm2057_vm1, %v4448_v19, %v4445_v53  ;;  %s4508_s30 = smov 3  ;;  %s4511_s10 = smov 12 }
  0xfc   :  { %2897 = vst.msk [vmem:[#allocation0 + $0x38] sm:$0xff] %vm2620_vm7, %v6247_v0   ;;  %2943 = vst.msk [vmem:[#allocation0 + $0x98] sm:$0xff] %vm2620_vm7, %v6248_v49   ;;  %v4376_v46 = vsel %vm2053_vm0, %v4374_v62, %v4371_v22  ;;  %v4379_v24 = vld [vmem:[#allocation1 + $0x83] ss:$16 sm:%s4378_s18]   ;;  %v4463_v57 = vld [vmem:[#allocation1 + $0xa] ss:$16 sm:%s4462_s3]   ;;  %v4455_v58 = vsel %vm2061_vm2, %v4453_v56, %v4450_v20 }
  0xfd   :  { %v4384_v25 = vld [vmem:[#allocation1 + $0x83] ss:$16 sm:%s4383_s19]   ;;  %v4381_v47 = vsel %vm2057_vm1, %v4379_v24, %v4376_v46  ;;  %6395 = vrot.lane.b32.xlu0 %v6394_v11, %s6513_s12  ;;  %v4466_v6 = vld [vmem:[#allocation1 + $0xa] ss:$16 sm:%s4465_s4]   ;;  %v6404_v61 = vpack.i.bf16 %v4455_v58, %v4432_v36  ;;  %s4516_s2 = smov 48  ;;  %s6514_s21 = smov 42  }
  0xfe   :  { %v7449_v39 = vpop.permute.xlu1 %6250  ;;  %v4394_v48 = vld [vmem:[#allocation1 + $0x283] ss:$16 sm:%s4393_s16]   ;;  %v4386_v27 = vsel %vm2061_vm2, %v4384_v25, %v4381_v47  ;;  %v4471_v50 = vld [vmem:[#allocation1 + $0xa] ss:$16 sm:%s4470_s15]   ;;  %v4468_v59 = vsel %vm2053_vm0, %v4466_v6, %v4463_v57  ;;  %s4521_s25 = smov 192  ;;  %s4531_s23 = smov 3 }
  0xff   :  { %v4397_v26 = vld [vmem:[#allocation1 + $0x283] ss:$16 sm:%s4396_s28]   ;;  %v4476_v60 = vld [vmem:[#allocation1 + $0xa] ss:$16 sm:%s4475_s7]   ;;  %v4473_v4 = vsel %vm2057_vm1, %v4471_v50, %v4468_v59  ;;  %v7474_v12 = vpop.permute.xlu0 %6265  ;;  %s4534_s29 = smov 12  ;;  %s4539_s11 = smov 48 }
 0x100   :  { %v4399_v63 = vsel %vm2053_vm0, %v4397_v26, %v4394_v48  ;;  %v4402_v3 = vld [vmem:[#allocation1 + $0x283] ss:$16 sm:%s4401_s9]   ;;  %v4486_v7 = vld [vmem:[#allocation1 + $0x20a] ss:$16 sm:%s4485_s5]   ;;  %v4478_v14 = vsel %vm2061_vm2, %v4476_v60, %v4473_v4  ;;  %s4544_s18 = smov 192  ;;  %s4554_s19 = smov 3 }
 0x101   :  { %v4407_v28 = vld [vmem:[#allocation1 + $0x283] ss:$16 sm:%s4406_s26]   ;;  %v4404_v35 = vsel %vm2057_vm1, %v4402_v3, %v4399_v63  ;;  %v4489_v44 = vld [vmem:[#allocation1 + $0x20a] ss:$16 sm:%s4488_s22]   ;;  %6405 = vrot.lane.b32.xlu0 %v6404_v61, %s6514_s21  ;;  %s4557_s16 = smov 12  ;;  %s4562_s28 = smov 48 }
 0x102   :  { %v4409_v17 = vsel %vm2061_vm2, %v4407_v28, %v4404_v35  ;;  %v7465_v2 = vpop.permute.xlu1 %6260  ;;  %v4494_v8 = vld [vmem:[#allocation1 + $0x20a] ss:$16 sm:%s4493_s24]   ;;  %v4491_v13 = vsel %vm2053_vm0, %v4489_v44, %v4486_v7  ;;  %s4567_s9 = smov 192  ;;  %s4577_s26 = smov 3 }
 0x103   :  { %v6399_v1 = vpack.i.bf16 %v4409_v17, %v4386_v27  ;;  %v4509_v21 = vld [vmem:[#allocation1 + $0x18a] ss:$16 sm:%s4508_s30]   ;;  %v4496_v34 = vsel %vm2057_vm1, %v4494_v8, %v4491_v13  ;;  %s4580_s27 = smov 12  ;;  %s4585_s17 = smov 48 }
 0x104   :  { %v4512_v40 = vld [vmem:[#allocation1 + $0x18a] ss:$16 sm:%s4511_s10]   ;;  %s4590_s20 = smov 192  ;;  %s4600_s6 = smov 3 }
 0x105   :  { %6400 = vrot.lane.b32.xlu1 %v6399_v1, %s6513_s12  ;;  %s4498_s12 = smov 192  ;;  %v4517_v22 = vld [vmem:[#allocation1 + $0x18a] ss:$16 sm:%s4516_s2]   ;;  %v4514_v41 = vsel %vm2053_vm0, %v4512_v40, %v4509_v21  ;;  %v4601_v57 = vld [vmem:[#allocation1 + $0x2] ss:$16 sm:%s4600_s6]   ;;  %s4603_s13 = smov 12 }
 0x106   :  { %v4499_v33 = vld [vmem:[#allocation1 + $0x20a] ss:$16 sm:%s4498_s12]   ;;  %v4519_v11 = vsel %vm2057_vm1, %v4517_v22, %v4514_v41  ;;  %s4608_s14 = smov 48  ;;  %v4604_v6 = vld [vmem:[#allocation1 + $0x2] ss:$16 sm:%s4603_s13]   ;;  %s4613_s0 = smov 192 }
 0x107   :  { %v4501_v62 = vsel %vm2061_vm2, %v4499_v33, %v4496_v34  ;;  %v4522_v46 = vld [vmem:[#allocation1 + $0x18a] ss:$16 sm:%s4521_s25]   ;;  %v7483_v26 = vpop.permute.xlu1 %6270  ;;  %v4609_v50 = vld [vmem:[#allocation1 + $0x2] ss:$16 sm:%s4608_s14]   ;;  %v4606_v59 = vsel %vm2053_vm0, %v4604_v6, %v4601_v57  ;;  %s4622_s8 = smov 3  ;;  %s4625_s3 = smov 12 }
 0x108   :  { %v4532_v24 = vld [vmem:[#allocation1 + $0x38a] ss:$16 sm:%s4531_s23]   ;;  %v6409_v25 = vpack.i.bf16 %v4501_v62, %v4478_v14  ;;  %v4524_v27 = vsel %vm2061_vm2, %v4522_v46, %v4519_v11  ;;  %v4614_v60 = vld [vmem:[#allocation1 + $0x2] ss:$16 sm:%s4613_s0]   ;;  %v4611_v61 = vsel %vm2057_vm1, %v4609_v50, %v4606_v59  ;;  %s4630_s4 = smov 48  ;;  %s4635_s15 = smov 192 }
 0x109   :  { %v4535_v47 = vld [vmem:[#allocation1 + $0x38a] ss:$16 sm:%s4534_s29]   ;;  %v4623_v4 = vld [vmem:[#allocation1 + $0x202] ss:$16 sm:%s4622_s8]   ;;  %v4616_v14 = vsel %vm2061_vm2, %v4614_v60, %v4611_v61  ;;  %s4645_s7 = smov 3  ;;  %s4648_s5 = smov 12 }
 0x10a   :  { %v4540_v48 = vld [vmem:[#allocation1 + $0x38a] ss:$16 sm:%s4539_s11]   ;;  %v4537_v63 = vsel %vm2053_vm0, %v4535_v47, %v4532_v24  ;;  %6410 = vrot.lane.b32.xlu1 %v6409_v25, %s6514_s21  ;;  %v4626_v44 = vld [vmem:[#allocation1 + $0x202] ss:$16 sm:%s4625_s3]   ;;  %s4653_s22 = smov 48  ;;  %s4658_s24 = smov 192 }
 0x10b   :  { %v4545_v3 = vld [vmem:[#allocation1 + $0x38a] ss:$16 sm:%s4544_s18]   ;;  %v4542_v35 = vsel %vm2057_vm1, %v4540_v48, %v4537_v63  ;;  %v4628_v13 = vsel %vm2053_vm0, %v4626_v44, %v4623_v4  ;;  %v4631_v33 = vld [vmem:[#allocation1 + $0x202] ss:$16 sm:%s4630_s4]   ;;  %s4668_s12 = smov 3  ;;  %s4671_s30 = smov 12 }
 0x10c   :  { %v4555_v28 = vld [vmem:[#allocation1 + $0x10a] ss:$16 sm:%s4554_s19]   ;;  %v4547_v17 = vsel %vm2061_vm2, %v4545_v3, %v4542_v35  ;;  %v4636_v21 = vld [vmem:[#allocation1 + $0x202] ss:$16 sm:%s4635_s15]   ;;  %v4633_v34 = vsel %vm2057_vm1, %v4631_v33, %v4628_v13  ;;  %s4676_s10 = smov 48  ;;  %s4681_s2 = smov 192 }
 0x10d   :  { %v4558_v15 = vld [vmem:[#allocation1 + $0x10a] ss:$16 sm:%s4557_s16]   ;;  %v6414_v1 = vpack.i.bf16 %v4547_v17, %v4524_v27  ;;  %v4646_v40 = vld [vmem:[#allocation1 + $0x182] ss:$16 sm:%s4645_s7]   ;;  %v4638_v62 = vsel %vm2061_vm2, %v4636_v21, %v4633_v34  ;;  %s4694_s25 = smov 12  ;;  %s6515_s23 = smov 34  }
 0x10e   :  { %v4563_v16 = vld [vmem:[#allocation1 + $0x10a] ss:$16 sm:%s4562_s28]   ;;  %v4560_v38 = vsel %vm2053_vm0, %v4558_v15, %v4555_v28  ;;  %v4649_v22 = vld [vmem:[#allocation1 + $0x182] ss:$16 sm:%s4648_s5]   ;;  %v6424_v25 = vpack.i.bf16 %v4638_v62, %v4616_v14  ;;  %s4699_s29 = smov 48  ;;  %s4704_s11 = smov 192 }
 0x10f   :  { %v4568_v42 = vld [vmem:[#allocation1 + $0x10a] ss:$16 sm:%s4567_s9]   ;;  %v4565_v51 = vsel %vm2057_vm1, %v4563_v16, %v4560_v38  ;;  %v7492_v19 = vpop.permute.xlu0 %6275  ;;  %6415 = vrot.lane.b32.xlu0 %v6414_v1, %s6514_s21  ;;  %v4651_v41 = vsel %vm2053_vm0, %v4649_v22, %v4646_v40  ;;  %v4654_v46 = vld [vmem:[#allocation1 + $0x182] ss:$16 sm:%s4653_s22]   ;;  %s4714_s18 = smov 3  ;;  %s4717_s19 = smov 12 }
 0x110   :  { %v4578_v43 = vld [vmem:[#allocation1 + $0x30a] ss:$16 sm:%s4577_s26]   ;;  %v4570_v36 = vsel %vm2061_vm2, %v4568_v42, %v4565_v51  ;;  %v4659_v24 = vld [vmem:[#allocation1 + $0x182] ss:$16 sm:%s4658_s24]   ;;  %v4656_v11 = vsel %vm2057_vm1, %v4654_v46, %v4651_v41  ;;  %s4722_s16 = smov 48  ;;  %s4727_s28 = smov 192 }
 0x111   :  { %v4581_v52 = vld [vmem:[#allocation1 + $0x30a] ss:$16 sm:%s4580_s27]   ;;  %v4669_v47 = vld [vmem:[#allocation1 + $0x382] ss:$16 sm:%s4668_s12]   ;;  %v4661_v27 = vsel %vm2061_vm2, %v4659_v24, %v4656_v11  ;;  %s4737_s9 = smov 3  ;;  %s4740_s26 = smov 12 }
 0x112   :  { %v4586_v18 = vld [vmem:[#allocation1 + $0x30a] ss:$16 sm:%s4585_s17]   ;;  %v4583_v53 = vsel %vm2053_vm0, %v4581_v52, %v4578_v43  ;;  %v4672_v48 = vld [vmem:[#allocation1 + $0x382] ss:$16 sm:%s4671_s30]   ;;  %s4745_s27 = smov 48  ;;  %s4750_s17 = smov 192 }
 0x113   :  { %v4591_v56 = vld [vmem:[#allocation1 + $0x30a] ss:$16 sm:%s4590_s20]   ;;  %v4588_v20 = vsel %vm2057_vm1, %v4586_v18, %v4583_v53  ;;  %v4674_v63 = vsel %vm2053_vm0, %v4672_v48, %v4669_v47  ;;  %v4677_v3 = vld [vmem:[#allocation1 + $0x382] ss:$16 sm:%s4676_s10]   ;;  %v7512_v35 = vpop.permute.xlu0 %6285  ;;  %6425 = vrot.lane.b32.xlu0 %v6424_v25, %s6515_s23  ;;  %s4760_s20 = smov 3  ;;  %s4763_s6 = smov 12 }
 0x114   :  { %v4593_v58 = vsel %vm2061_vm2, %v4591_v56, %v4588_v20  ;;  %v4682_v28 = vld [vmem:[#allocation1 + $0x382] ss:$16 sm:%s4681_s2]   ;;  %v4679_v15 = vsel %vm2057_vm1, %v4677_v3, %v4674_v63  ;;  %s4768_s13 = smov 48  ;;  %s4773_s14 = smov 192 }
 0x115   :  { %v6419_v7 = vpack.i.bf16 %v4593_v58, %v4570_v36  ;;  %v4695_v17 = vld [vmem:[#allocation1 + $0x102] ss:$16 sm:%s4694_s25]   ;;  %v4684_v38 = vsel %vm2061_vm2, %v4682_v28, %v4679_v15  ;;  %s4783_s0 = smov 3  ;;  %s4786_s8 = smov 12 }
 0x116   :  { %v4700_v43 = vld [vmem:[#allocation1 + $0x102] ss:$16 sm:%s4699_s29]   ;;  %v6429_v51 = vpack.i.bf16 %v4684_v38, %v4661_v27  ;;  %v4784_v46 = vld [vmem:[#allocation1 + $0x89] ss:$16 sm:%s4783_s0]   ;;  %s4791_s3 = smov 48  ;;  %s4796_s4 = smov 192 }
 0x117   :  { %v7501_v8 = vpop.permute.xlu1 %6280  ;;  %6420 = vrot.lane.b32.xlu1 %v6419_v7, %s6514_s21  ;;  %s4691_s21 = smov 3  ;;  %v4705_v1 = vld [vmem:[#allocation1 + $0x102] ss:$16 sm:%s4704_s11]   ;;  %v7530_v62 = vpop.permute.xlu0 %6295  ;;  %v4787_v24 = vld [vmem:[#allocation1 + $0x89] ss:$16 sm:%s4786_s8]   ;;  %s4806_s15 = smov 3 }
 0x118   :  { %v4692_v16 = vld [vmem:[#allocation1 + $0x102] ss:$16 sm:%s4691_s21]   ;;  %v4789_v11 = vsel %vm2053_vm0, %v4787_v24, %v4784_v46  ;;  %v4792_v47 = vld [vmem:[#allocation1 + $0x89] ss:$16 sm:%s4791_s3]   ;;  %s4809_s7 = smov 12  ;;  %s4814_s5 = smov 48 }
 0x119   :  { %v4697_v42 = vsel %vm2053_vm0, %v4695_v17, %v4692_v16  ;;  %v4715_v18 = vld [vmem:[#allocation1 + $0x302] ss:$16 sm:%s4714_s18]   ;;  %v4797_v48 = vld [vmem:[#allocation1 + $0x89] ss:$16 sm:%s4796_s4]   ;;  %v4794_v63 = vsel %vm2057_vm1, %v4792_v47, %v4789_v11  ;;  %s4819_s22 = smov 192  ;;  %s4829_s24 = smov 3 }
 0x11a   :  { %v4702_v52 = vsel %vm2057_vm1, %v4700_v43, %v4697_v42  ;;  %v4718_v36 = vld [vmem:[#allocation1 + $0x302] ss:$16 sm:%s4717_s19]   ;;  %v4807_v3 = vld [vmem:[#allocation1 + $0x289] ss:$16 sm:%s4806_s15]   ;;  %v4799_v17 = vsel %vm2061_vm2, %v4797_v48, %v4794_v63  ;;  %s4832_s12 = smov 12  ;;  %s4837_s30 = smov 48  ;;  %v6243_v63 = vunpack.i.h.bf16 %v7440_v31  ;;  %v6242_v31 = vunpack.i.l.bf16 %v7440_v31 }
 0x11b   :  { %v4707_v53 = vsel %vm2061_vm2, %v4705_v1, %v4702_v52  ;;  %v4720_v56 = vsel %vm2053_vm0, %v4718_v36, %v4715_v18  ;;  %v4723_v57 = vld [vmem:[#allocation1 + $0x302] ss:$16 sm:%s4722_s16]   ;;  %6430 = vrot.lane.b32.xlu1 %v6429_v51, %s6515_s23  ;;  %v4810_v28 = vld [vmem:[#allocation1 + $0x289] ss:$16 sm:%s4809_s7]   ;;  %s4842_s10 = smov 192  ;;  %s4852_s2 = smov 3 }
 0x11c   :  { %v4728_v20 = vld [vmem:[#allocation1 + $0x302] ss:$16 sm:%s4727_s28]   ;;  %v7521_v6 = vpop.permute.xlu1 %6290  ;;  %v4725_v50 = vsel %vm2057_vm1, %v4723_v57, %v4720_v56  ;;  %v4815_v15 = vld [vmem:[#allocation1 + $0x289] ss:$16 sm:%s4814_s5]   ;;  %v4812_v38 = vsel %vm2053_vm0, %v4810_v28, %v4807_v3  ;;  %s4855_s21 = smov 12  ;;  %s4860_s25 = smov 48 }
 0x11d   :  { %v4738_v58 = vld [vmem:[#allocation1 + $0x82] ss:$16 sm:%s4737_s9]   ;;  %v4730_v60 = vsel %vm2061_vm2, %v4728_v20, %v4725_v50  ;;  %v4820_v42 = vld [vmem:[#allocation1 + $0x289] ss:$16 sm:%s4819_s22]   ;;  %v4817_v1 = vsel %vm2057_vm1, %v4815_v15, %v4812_v38  ;;  %s4875_s29 = smov 3  ;;  %s4878_s11 = smov 12 }
 0x11e   :  { %v4741_v59 = vld [vmem:[#allocation1 + $0x82] ss:$16 sm:%s4740_s26]   ;;  %v6434_v44 = vpack.i.bf16 %v4730_v60, %v4707_v53  ;;  %v4830_v43 = vld [vmem:[#allocation1 + $0x9] ss:$16 sm:%s4829_s24]   ;;  %v4822_v18 = vsel %vm2061_vm2, %v4820_v42, %v4817_v1  ;;  %s4883_s18 = smov 48  ;;  %s6516_s19 = smov 25  }
 0x11f   :  { %v4743_v7 = vsel %vm2053_vm0, %v4741_v59, %v4738_v58  ;;  %v4746_v61 = vld [vmem:[#allocation1 + $0x82] ss:$16 sm:%s4745_s27]   ;;  %v4833_v51 = vld [vmem:[#allocation1 + $0x9] ss:$16 sm:%s4832_s12]   ;;  %v6444_v57 = vpack.i.bf16 %v4822_v18, %v4799_v17  ;;  %v7546_v59 = vpop.permute.xlu0 %6305  ;;  %s4888_s16 = smov 192  ;;  %s4898_s28 = smov 3  ;;  %v6253_v17 = vunpack.i.h.bf16 %v7449_v39  ;;  %v6252_v39 = vunpack.i.l.bf16 %v7449_v39 }
 0x120   :  { %v4751_v4 = vld [vmem:[#allocation1 + $0x82] ss:$16 sm:%s4750_s17]   ;;  %v4748_v14 = vsel %vm2057_vm1, %v4746_v61, %v4743_v7  ;;  %6435 = vrot.lane.b32.xlu0 %v6434_v44, %s6515_s23  ;;  %v7537_v16 = vpop.permute.xlu1 %6300  ;;  %v4838_v52 = vld [vmem:[#allocation1 + $0x9] ss:$16 sm:%s4837_s30]   ;;  %v4835_v36 = vsel %vm2053_vm0, %v4833_v51, %v4830_v43  ;;  %s4901_s9 = smov 12  ;;  %s4906_s26 = smov 48  ;;  %v6258_v51 = vunpack.i.h.bf16 %v7458_v29  ;;  %v6257_v29 = vunpack.i.l.bf16 %v7458_v29 }
 0x121   :  { %v4761_v13 = vld [vmem:[#allocation1 + $0x282] ss:$16 sm:%s4760_s20]   ;;  %v4753_v21 = vsel %vm2061_vm2, %v4751_v4, %v4748_v14  ;;  %v4843_v53 = vld [vmem:[#allocation1 + $0x9] ss:$16 sm:%s4842_s10]   ;;  %v4840_v20 = vsel %vm2057_vm1, %v4838_v52, %v4835_v36  ;;  %s4911_s27 = smov 192  ;;  %s4921_s17 = smov 3 }
 0x122   :  { %v4764_v33 = vld [vmem:[#allocation1 + $0x282] ss:$16 sm:%s4763_s6]   ;;  %v4853_v56 = vld [vmem:[#allocation1 + $0x209] ss:$16 sm:%s4852_s2]   ;;  %v4845_v60 = vsel %vm2061_vm2, %v4843_v53, %v4840_v20  ;;  %s4924_s20 = smov 12  ;;  %s4929_s6 = smov 48 }
 0x123   :  { %v4766_v34 = vsel %vm2053_vm0, %v4764_v33, %v4761_v13  ;;  %v4769_v40 = vld [vmem:[#allocation1 + $0x282] ss:$16 sm:%s4768_s13]   ;;  %v4856_v50 = vld [vmem:[#allocation1 + $0x209] ss:$16 sm:%s4855_s21]   ;;  %s4934_s13 = smov 192  ;;  %s4947_s0 = smov 12 }
 0x124   :  { %v4774_v22 = vld [vmem:[#allocation1 + $0x282] ss:$16 sm:%s4773_s14]   ;;  %v4771_v41 = vsel %vm2057_vm1, %v4769_v40, %v4766_v34  ;;  %v4861_v58 = vld [vmem:[#allocation1 + $0x209] ss:$16 sm:%s4860_s25]   ;;  %v4858_v7 = vsel %vm2053_vm0, %v4856_v50, %v4853_v56  ;;  %6445 = vrot.lane.b32.xlu0 %v6444_v57, %s6516_s19  ;;  %s4944_s14 = smov 3  ;;  %s4952_s8 = smov 48  ;;  %v6263_v56 = vunpack.i.h.bf16 %v7465_v2  ;;  %v6262_v2 = vunpack.i.l.bf16 %v7465_v2 }
 0x125   :  { %v4776_v25 = vsel %vm2061_vm2, %v4774_v22, %v4771_v41  ;;  %v4876_v4 = vld [vmem:[#allocation1 + $0x189] ss:$16 sm:%s4875_s29]   ;;  %v4863_v44 = vsel %vm2057_vm1, %v4861_v58, %v4858_v7  ;;  %s4957_s3 = smov 192  ;;  %s4967_s4 = smov 3  ;;  %2992 = vst.msk [vmem:[#allocation0 + $0x80] sm:$0xff] %vm2967_vm8, %v6243_v63   ;;  %2969 = vst.msk [vmem:[#allocation0 + $0x20] sm:$0xff] %vm2967_vm8, %v6242_v31  }
 0x126   :  { %v6439_v27 = vpack.i.bf16 %v4776_v25, %v4753_v21  ;;  %v4879_v14 = vld [vmem:[#allocation1 + $0x189] ss:$16 sm:%s4878_s11]   ;;  %s4970_s15 = smov 12  ;;  %s4975_s7 = smov 48  ;;  %3015 = vst.msk [vmem:[#allocation0 + $0x8] sm:$0xff] %vm2967_vm8, %v6252_v39   ;;  %3038 = vst.msk [vmem:[#allocation0 + $0x68] sm:$0xff] %vm2967_vm8, %v6253_v17  }
 0x127   :  { %v4884_v13 = vld [vmem:[#allocation1 + $0x189] ss:$16 sm:%s4883_s18]   ;;  %v4881_v21 = vsel %vm2053_vm0, %v4879_v14, %v4876_v4  ;;  %v7555_v25 = vpop.permute.xlu1 %6310  ;;  %v4976_v4 = vld [vmem:[#allocation1 + $0x1] ss:$16 sm:%s4975_s7]   ;;  %s4980_s5 = smov 192  ;;  %s4989_s22 = smov 3 }
 0x128   :  { %6440 = vrot.lane.b32.xlu1 %v6439_v27, %s6515_s23  ;;  %s4865_s23 = smov 192  ;;  %v4889_v34 = vld [vmem:[#allocation1 + $0x189] ss:$16 sm:%s4888_s16]   ;;  %v4886_v41 = vsel %vm2057_vm1, %v4884_v13, %v4881_v21  ;;  %v4981_v13 = vld [vmem:[#allocation1 + $0x1] ss:$16 sm:%s4980_s5]   ;;  %s4992_s24 = smov 12 }
 0x129   :  { %v4866_v61 = vld [vmem:[#allocation1 + $0x209] ss:$16 sm:%s4865_s23]   ;;  %v4891_v11 = vsel %vm2061_vm2, %v4889_v34, %v4886_v41  ;;  %v4990_v34 = vld [vmem:[#allocation1 + $0x201] ss:$16 sm:%s4989_s22]   ;;  %s4997_s12 = smov 48  ;;  %s5002_s30 = smov 192 }
 0x12a   :  { %v4868_v33 = vsel %vm2061_vm2, %v4866_v61, %v4863_v44  ;;  %v4899_v40 = vld [vmem:[#allocation1 + $0x389] ss:$16 sm:%s4898_s28]   ;;  %v4971_v61 = vld [vmem:[#allocation1 + $0x1] ss:$16 sm:%s4970_s15]   ;;  %3061 = vst.msk [vmem:[#allocation0 + $0x50] sm:$0xff] %vm2967_vm8, %v6257_v29   ;;  %3084 = vst.msk [vmem:[#allocation0 + $0xb0] sm:$0xff] %vm2967_vm8, %v6258_v51  }
 0x12b   :  { %v6449_v22 = vpack.i.bf16 %v4868_v33, %v4845_v60  ;;  %v4902_v46 = vld [vmem:[#allocation1 + $0x389] ss:$16 sm:%s4901_s9]   ;;  %v4968_v60 = vld [vmem:[#allocation1 + $0x1] ss:$16 sm:%s4967_s4]   ;;  %3107 = vst.msk [vmem:[#allocation0 + $0x38] sm:$0xff] %vm2967_vm8, %v6262_v2   ;;  %3130 = vst.msk [vmem:[#allocation0 + $0x98] sm:$0xff] %vm2967_vm8, %v6263_v56  }
 0x12c   :  { %v4907_v24 = vld [vmem:[#allocation1 + $0x389] ss:$16 sm:%s4906_s26]   ;;  %v4904_v47 = vsel %vm2053_vm0, %v4902_v46, %v4899_v40  ;;  %v4973_v14 = vsel %vm2053_vm0, %v4971_v61, %v4968_v60  ;;  %v4993_v40 = vld [vmem:[#allocation1 + $0x201] ss:$16 sm:%s4992_s24]   ;;  %s5012_s10 = smov 3  ;;  %s5015_s2 = smov 12 }
 0x12d   :  { %v4912_v48 = vld [vmem:[#allocation1 + $0x389] ss:$16 sm:%s4911_s27]   ;;  %6450 = vrot.lane.b32.xlu1 %v6449_v22, %s6516_s19  ;;  %v4909_v3 = vsel %vm2057_vm1, %v4907_v24, %v4904_v47  ;;  %v4978_v21 = vsel %vm2057_vm1, %v4976_v4, %v4973_v14  ;;  %v4995_v46 = vsel %vm2053_vm0, %v4993_v40, %v4990_v34  ;;  %v4998_v24 = vld [vmem:[#allocation1 + $0x201] ss:$16 sm:%s4997_s12]   ;;  %s5020_s21 = smov 48  ;;  %s5025_s25 = smov 192  ;;  %v6288_v40 = vunpack.i.h.bf16 %v7512_v35 }
 0x12e   :  { %v4922_v27 = vld [vmem:[#allocation1 + $0x109] ss:$16 sm:%s4921_s17]   ;;  %v4914_v38 = vsel %vm2061_vm2, %v4912_v48, %v4909_v3  ;;  %v4983_v41 = vsel %vm2061_vm2, %v4981_v13, %v4978_v21  ;;  %v5000_v47 = vsel %vm2057_vm1, %v4998_v24, %v4995_v46  ;;  %v5013_v48 = vld [vmem:[#allocation1 + $0x181] ss:$16 sm:%s5012_s10]   ;;  %s5035_s23 = smov 3  ;;  %s5038_s29 = smov 12  ;;  %v6287_v35 = vunpack.i.l.bf16 %v7512_v35 }
 0x12f   :  { %v4925_v28 = vld [vmem:[#allocation1 + $0x109] ss:$16 sm:%s4924_s20]   ;;  %v6454_v52 = vpack.i.bf16 %v4914_v38, %v4891_v11  ;;  %v7572_v57 = vpop.permute.xlu0 %6315  ;;  %v5003_v11 = vld [vmem:[#allocation1 + $0x201] ss:$16 sm:%s5002_s30]   ;;  %s5043_s11 = smov 48  ;;  %s5048_s18 = smov 192 }
 0x130   :  { %v4930_v15 = vld [vmem:[#allocation1 + $0x109] ss:$16 sm:%s4929_s6]   ;;  %v4927_v42 = vsel %vm2053_vm0, %v4925_v28, %v4922_v27  ;;  %v5016_v27 = vld [vmem:[#allocation1 + $0x181] ss:$16 sm:%s5015_s2]   ;;  %v5005_v63 = vsel %vm2061_vm2, %v5003_v11, %v5000_v47  ;;  %s5061_s16 = smov 12  ;;  %s6517_s28 = smov 17   ;;  %v6293_v47 = vunpack.i.h.bf16 %v7521_v6  ;;  %v6292_v6 = vunpack.i.l.bf16 %v7521_v6 }
 0x131   :  { %v4935_v43 = vld [vmem:[#allocation1 + $0x109] ss:$16 sm:%s4934_s13]   ;;  %v4932_v18 = vsel %vm2057_vm1, %v4930_v15, %v4927_v42  ;;  %6455 = vrot.lane.b32.xlu0 %v6454_v52, %s6516_s19  ;;  %v5018_v3 = vsel %vm2053_vm0, %v5016_v27, %v5013_v48  ;;  %v5021_v28 = vld [vmem:[#allocation1 + $0x181] ss:$16 sm:%s5020_s21]   ;;  %v6464_v31 = vpack.i.bf16 %v5005_v63, %v4983_v41  ;;  %s5066_s9 = smov 48  ;;  %s5071_s26 = smov 192 }
 0x132   :  { %v4945_v1 = vld [vmem:[#allocation1 + $0x309] ss:$16 sm:%s4944_s14]   ;;  %v4937_v20 = vsel %vm2061_vm2, %v4935_v43, %v4932_v18  ;;  %v5026_v15 = vld [vmem:[#allocation1 + $0x181] ss:$16 sm:%s5025_s25]   ;;  %v5023_v17 = vsel %vm2057_vm1, %v5021_v28, %v5018_v3  ;;  %s5081_s27 = smov 3  ;;  %s5084_s17 = smov 12  ;;  %v6298_v28 = vunpack.i.h.bf16 %v7530_v62  ;;  %v6297_v62 = vunpack.i.l.bf16 %v7530_v62 }
 0x133   :  { %v4948_v36 = vld [vmem:[#allocation1 + $0x309] ss:$16 sm:%s4947_s0]   ;;  %v5036_v39 = vld [vmem:[#allocation1 + $0x381] ss:$16 sm:%s5035_s23]   ;;  %v5028_v42 = vsel %vm2061_vm2, %v5026_v15, %v5023_v17  ;;  %v7592_v29 = vpop.permute.xlu0 %6325  ;;  %s5089_s20 = smov 48  ;;  %s5094_s6 = smov 192 }
 0x134   :  { %v4953_v53 = vld [vmem:[#allocation1 + $0x309] ss:$16 sm:%s4952_s8]   ;;  %v4950_v50 = vsel %vm2053_vm0, %v4948_v36, %v4945_v1  ;;  %v5039_v38 = vld [vmem:[#allocation1 + $0x381] ss:$16 sm:%s5038_s29]   ;;  %s5104_s13 = smov 3  ;;  %s5107_s14 = smov 12 }
 0x135   :  { %v4958_v58 = vld [vmem:[#allocation1 + $0x309] ss:$16 sm:%s4957_s3]   ;;  %v4955_v7 = vsel %vm2057_vm1, %v4953_v53, %v4950_v50  ;;  %v5041_v43 = vsel %vm2053_vm0, %v5039_v38, %v5036_v39  ;;  %v5044_v1 = vld [vmem:[#allocation1 + $0x381] ss:$16 sm:%s5043_s11]   ;;  %6465 = vrot.lane.b32.xlu0 %v6464_v31, %s6517_s28  ;;  %s5112_s0 = smov 48  ;;  %s5117_s8 = smov 192  ;;  %v6303_v38 = vunpack.i.h.bf16 %v7537_v16  ;;  %v6302_v16 = vunpack.i.l.bf16 %v7537_v16 }
 0x136   :  { %v4960_v44 = vsel %vm2061_vm2, %v4958_v58, %v4955_v7  ;;  %v5049_v51 = vld [vmem:[#allocation1 + $0x381] ss:$16 sm:%s5048_s18]   ;;  %v5046_v52 = vsel %vm2057_vm1, %v5044_v1, %v5041_v43  ;;  %s5127_s3 = smov 3  ;;  %s5130_s4 = smov 12  ;;  %3336 = vst.msk [vmem:[#allocation0 + $0x20] sm:$0xff] %vm3334_vm9, %v6287_v35   ;;  %3359 = vst.msk [vmem:[#allocation0 + $0x80] sm:$0xff] %vm3334_vm9, %v6288_v40  }
 0x137   :  { %v6459_v33 = vpack.i.bf16 %v4960_v44, %v4937_v20  ;;  %v7581_v22 = vpop.permute.xlu1 %6320  ;;  %v5062_v36 = vld [vmem:[#allocation1 + $0x101] ss:$16 sm:%s5061_s16]   ;;  %v5051_v53 = vsel %vm2061_vm2, %v5049_v51, %v5046_v52  ;;  %s5135_s15 = smov 48  ;;  %s5140_s7 = smov 192  ;;  %3382 = vst.msk [vmem:[#allocation0 + $0x8] sm:$0xff] %vm3334_vm9, %v6292_v6   ;;  %3405 = vst.msk [vmem:[#allocation0 + $0x68] sm:$0xff] %vm3334_vm9, %v6293_v47  }
 0x138   :  { %v5067_v2 = vld [vmem:[#allocation1 + $0x101] ss:$16 sm:%s5066_s9]   ;;  %v6469_v50 = vpack.i.bf16 %v5051_v53, %v5028_v42  ;;  %s5150_s5 = smov 3  ;;  %s5153_s22 = smov 12  ;;  %v7618_v42 = vpop.permute.xlu0 %6335  ;;  %3428 = vst.msk [vmem:[#allocation0 + $0x50] sm:$0xff] %vm3334_vm9, %v6297_v62   ;;  %3451 = vst.msk [vmem:[#allocation0 + $0xb0] sm:$0xff] %vm3334_vm9, %v6298_v28  }
 0x139   :  { %6460 = vrot.lane.b32.xlu1 %v6459_v33, %s6516_s19  ;;  %s5058_s19 = smov 3  ;;  %v5072_v20 = vld [vmem:[#allocation1 + $0x101] ss:$16 sm:%s5071_s26]   ;;  %v5151_v1 = vld [vmem:[#allocation1 + $0x88] ss:$16 sm:%s5150_s5]   ;;  %s5158_s24 = smov 48 }
 0x13a   :  { %v5059_v18 = vld [vmem:[#allocation1 + $0x101] ss:$16 sm:%s5058_s19]   ;;  %v5154_v51 = vld [vmem:[#allocation1 + $0x88] ss:$16 sm:%s5153_s22]   ;;  %s5163_s12 = smov 192  ;;  %s5173_s30 = smov 3 }
 0x13b   :  { %v5064_v56 = vsel %vm2053_vm0, %v5062_v36, %v5059_v18  ;;  %v5082_v60 = vld [vmem:[#allocation1 + $0x301] ss:$16 sm:%s5081_s27]   ;;  %v5156_v18 = vsel %vm2053_vm0, %v5154_v51, %v5151_v1  ;;  %v5159_v36 = vld [vmem:[#allocation1 + $0x88] ss:$16 sm:%s5158_s24]   ;;  %s5176_s10 = smov 12  ;;  %s5181_s2 = smov 48 }
 0x13c   :  { %v5069_v58 = vsel %vm2057_vm1, %v5067_v2, %v5064_v56  ;;  %v5085_v7 = vld [vmem:[#allocation1 + $0x301] ss:$16 sm:%s5084_s17]   ;;  %v7601_v13 = vpop.permute.xlu1 %6330  ;;  %v5164_v53 = vld [vmem:[#allocation1 + $0x88] ss:$16 sm:%s5163_s12]   ;;  %v5161_v2 = vsel %vm2057_vm1, %v5159_v36, %v5156_v18  ;;  %s5186_s21 = smov 192  ;;  %s5196_s25 = smov 3 }
 0x13d   :  { %v5074_v61 = vsel %vm2061_vm2, %v5072_v20, %v5069_v58  ;;  %v5087_v4 = vsel %vm2053_vm0, %v5085_v7, %v5082_v60  ;;  %v5090_v44 = vld [vmem:[#allocation1 + $0x301] ss:$16 sm:%s5089_s20]   ;;  %6470 = vrot.lane.b32.xlu1 %v6469_v50, %s6517_s28  ;;  %v5174_v20 = vld [vmem:[#allocation1 + $0x288] ss:$16 sm:%s5173_s30]   ;;  %3474 = vst.msk [vmem:[#allocation0 + $0x38] sm:$0xff] %vm3334_vm9, %v6302_v16   ;;  %3497 = vst.msk [vmem:[#allocation0 + $0x98] sm:$0xff] %vm3334_vm9, %v6303_v38   ;;  %v5166_v7 = vsel %vm2061_vm2, %v5164_v53, %v5161_v2 }
 0x13e   :  { %v5095_v14 = vld [vmem:[#allocation1 + $0x301] ss:$16 sm:%s5094_s6]   ;;  %v5092_v33 = vsel %vm2057_vm1, %v5090_v44, %v5087_v4  ;;  %v5177_v50 = vld [vmem:[#allocation1 + $0x288] ss:$16 sm:%s5176_s10]   ;;  %s5199_s23 = smov 12  ;;  %s5204_s29 = smov 48 }
 0x13f   :  { %v5105_v21 = vld [vmem:[#allocation1 + $0x81] ss:$16 sm:%s5104_s13]   ;;  %v5097_v41 = vsel %vm2061_vm2, %v5095_v14, %v5092_v33  ;;  %v5182_v58 = vld [vmem:[#allocation1 + $0x288] ss:$16 sm:%s5181_s2]   ;;  %s5209_s11 = smov 192  ;;  %s5219_s18 = smov 3  ;;  %v7634_v6 = vpop.permute.xlu0 %6345 }
 0x140   :  { %v5108_v34 = vld [vmem:[#allocation1 + $0x81] ss:$16 sm:%s5107_s14]   ;;  %v6474_v48 = vpack.i.bf16 %v5097_v41, %v5074_v61  ;;  %v7625_v60 = vpop.permute.xlu1 %6340  ;;  %v5179_v61 = vsel %vm2053_vm0, %v5177_v50, %v5174_v20  ;;  %v5187_v4 = vld [vmem:[#allocation1 + $0x288] ss:$16 sm:%s5186_s21]   ;;  %s5222_s19 = smov 12  ;;  %s5227_s16 = smov 48 }
 0x141   :  { %v5110_v46 = vsel %vm2053_vm0, %v5108_v34, %v5105_v21  ;;  %v5113_v24 = vld [vmem:[#allocation1 + $0x81] ss:$16 sm:%s5112_s0]   ;;  %v5197_v44 = vld [vmem:[#allocation1 + $0x8] ss:$16 sm:%s5196_s25]   ;;  %v5184_v14 = vsel %vm2057_vm1, %v5182_v58, %v5179_v61  ;;  %s5242_s9 = smov 3  ;;  %s5245_s26 = smov 12 }
 0x142   :  { %v5118_v11 = vld [vmem:[#allocation1 + $0x81] ss:$16 sm:%s5117_s8]   ;;  %v5115_v27 = vsel %vm2057_vm1, %v5113_v24, %v5110_v46  ;;  %6475 = vrot.lane.b32.xlu0 %v6474_v48, %s6517_s28  ;;  %v5200_v33 = vld [vmem:[#allocation1 + $0x8] ss:$16 sm:%s5199_s23]   ;;  %v5189_v34 = vsel %vm2061_vm2, %v5187_v4, %v5184_v14  ;;  %s5250_s27 = smov 48  ;;  %s6518_s17 = smov 8  }
 0x143   :  { %v5128_v63 = vld [vmem:[#allocation1 + $0x281] ss:$16 sm:%s5127_s3]   ;;  %v5120_v15 = vsel %vm2061_vm2, %v5118_v11, %v5115_v27  ;;  %v5205_v21 = vld [vmem:[#allocation1 + $0x8] ss:$16 sm:%s5204_s29]   ;;  %v5202_v40 = vsel %vm2053_vm0, %v5200_v33, %v5197_v44  ;;  %v6484_v46 = vpack.i.bf16 %v5189_v34, %v5166_v7  ;;  %s5255_s20 = smov 192  ;;  %s5265_s6 = smov 3 }
 0x144   :  { %v5131_v3 = vld [vmem:[#allocation1 + $0x281] ss:$16 sm:%s5130_s4]   ;;  %v5210_v35 = vld [vmem:[#allocation1 + $0x8] ss:$16 sm:%s5209_s11]   ;;  %v5207_v24 = vsel %vm2057_vm1, %v5205_v21, %v5202_v40  ;;  %s5268_s13 = smov 12  ;;  %s5273_s14 = smov 48 }
 0x145   :  { %v5133_v31 = vsel %vm2053_vm0, %v5131_v3, %v5128_v63  ;;  %v5136_v17 = vld [vmem:[#allocation1 + $0x281] ss:$16 sm:%s5135_s15]   ;;  %v5220_v41 = vld [vmem:[#allocation1 + $0x208] ss:$16 sm:%s5219_s18]   ;;  %v5212_v48 = vsel %vm2061_vm2, %v5210_v35, %v5207_v24  ;;  %s5278_s0 = smov 192  ;;  %s5288_s8 = smov 3 }
 0x146   :  { %v5141_v39 = vld [vmem:[#allocation1 + $0x281] ss:$16 sm:%s5140_s7]   ;;  %v5138_v43 = vsel %vm2057_vm1, %v5136_v17, %v5133_v31  ;;  %v5223_v11 = vld [vmem:[#allocation1 + $0x208] ss:$16 sm:%s5222_s19]   ;;  %6485 = vrot.lane.b32.xlu0 %v6484_v46, %s6518_s17  ;;  %s5291_s3 = smov 12  ;;  %s5296_s4 = smov 48 }
 0x147   :  { %v5143_v52 = vsel %vm2061_vm2, %v5141_v39, %v5138_v43  ;;  %v5228_v47 = vld [vmem:[#allocation1 + $0x208] ss:$16 sm:%s5227_s16]   ;;  %v5225_v27 = vsel %vm2053_vm0, %v5223_v11, %v5220_v41  ;;  %s5301_s15 = smov 192  ;;  %s5311_s7 = smov 3 }
 0x148   :  { %v6479_v56 = vpack.i.bf16 %v5143_v52, %v5120_v15  ;;  %v5243_v3 = vld [vmem:[#allocation1 + $0x188] ss:$16 sm:%s5242_s9]   ;;  %v5230_v28 = vsel %vm2057_vm1, %v5228_v47, %v5225_v27  ;;  %v7643_v52 = vpop.permute.xlu1 %6350  ;;  %s5314_s5 = smov 12  ;;  %s5319_s22 = smov 48 }
 0x149   :  { %v5246_v62 = vld [vmem:[#allocation1 + $0x188] ss:$16 sm:%s5245_s26]   ;;  %s5324_s24 = smov 192  ;;  %s2049_s12 = smov 3 }
 0x14a   :  { %6480 = vrot.lane.b32.xlu1 %v6479_v56, %s6517_s28  ;;  %s5232_s28 = smov 192  ;;  %v5251_v15 = vld [vmem:[#allocation1 + $0x188] ss:$16 sm:%s5250_s27]   ;;  %v5248_v17 = vsel %vm2053_vm0, %v5246_v62, %v5243_v3  ;;  %v2050_v46 = vld [vmem:[#allocation1] ss:$16 sm:%s2049_s12]   ;;  %s2051_s30 = smov 12  ;;  %v6267_v62 = vunpack.i.l.bf16 %v7474_v12 }
 0x14b   :  { %v5233_v63 = vld [vmem:[#allocation1 + $0x208] ss:$16 sm:%s5232_s28]   ;;  %v5253_v43 = vsel %vm2057_vm1, %v5251_v15, %v5248_v17  ;;  %s2055_s10 = smov 48  ;;  %v2052_v11 = vld [vmem:[#allocation1] ss:$16 sm:%s2051_s30]   ;;  %s2059_s2 = smov 192  ;;  %v6273_v15 = vunpack.i.h.bf16 %v7483_v26 }
 0x14c   :  { %v5235_v31 = vsel %vm2061_vm2, %v5233_v63, %v5230_v28  ;;  %v5256_v39 = vld [vmem:[#allocation1 + $0x188] ss:$16 sm:%s5255_s20]   ;;  %v2056_v47 = vld [vmem:[#allocation1] ss:$16 sm:%s2055_s10]   ;;  %s2129_s21 = smov 3  ;;  %v2054_v63 = vsel %vm2053_vm0, %v2052_v11, %v2050_v46  ;;  %s2132_s25 = smov 12  ;;  %v6317_v11 = vunpack.i.l.bf16 %v7572_v57 }
 0x14d   :  { %v5266_v38 = vld [vmem:[#allocation1 + $0x388] ss:$16 sm:%s5265_s6]   ;;  %v6489_v16 = vpack.i.bf16 %v5235_v31, %v5212_v48  ;;  %v5258_v18 = vsel %vm2061_vm2, %v5256_v39, %v5253_v43  ;;  %v6268_v48 = vunpack.i.h.bf16 %v7474_v12  ;;  %v2060_v3 = vld [vmem:[#allocation1] ss:$16 sm:%s2059_s2]   ;;  %s2137_s23 = smov 48  ;;  %v2058_v17 = vsel %vm2057_vm1, %v2056_v47, %v2054_v63  ;;  %s2142_s29 = smov 192 }
 0x14e   :  { %v5269_v1 = vld [vmem:[#allocation1 + $0x388] ss:$16 sm:%s5268_s13]   ;;  %v2130_v28 = vld [vmem:[#allocation1 + $0x200] ss:$16 sm:%s2129_s21]   ;;  %s2108_s11 = smov 3  ;;  %v6278_v43 = vunpack.i.h.bf16 %v7492_v19  ;;  %s2111_s18 = smov 12  ;;  %v6322_v47 = vunpack.i.l.bf16 %v7581_v22  ;;  %v6333_v12 = vunpack.i.h.bf16 %v7601_v13 }
 0x14f   :  { %v5274_v51 = vld [vmem:[#allocation1 + $0x388] ss:$16 sm:%s5273_s14]   ;;  %v5271_v36 = vsel %vm2053_vm0, %v5269_v1, %v5266_v38  ;;  %6490 = vrot.lane.b32.xlu1 %v6489_v16, %s6518_s17  ;;  %v7652_v34 = vpop.permute.xlu0 %6355  ;;  %v2133_v39 = vld [vmem:[#allocation1 + $0x200] ss:$16 sm:%s2132_s25]   ;;  %v6272_v16 = vunpack.i.l.bf16 %v7483_v26  ;;  %s2116_s19 = smov 48  ;;  %s2121_s16 = smov 192 }
 0x150   :  { %v5279_v53 = vld [vmem:[#allocation1 + $0x388] ss:$16 sm:%s5278_s0]   ;;  %v5276_v2 = vsel %vm2057_vm1, %v5274_v51, %v5271_v36  ;;  %v2138_v38 = vld [vmem:[#allocation1 + $0x200] ss:$16 sm:%s2137_s23]   ;;  %v2062_v51 = vsel %vm2061_vm2, %v2060_v3, %v2058_v17  ;;  %s2192_s28 = smov 3  ;;  %s2195_s9 = smov 12  ;;  %v6328_v3 = vunpack.i.h.bf16 %v7592_v29  ;;  %v6357_v26 = vunpack.i.l.bf16 %v7652_v34 }
 0x151   :  { %v5289_v56 = vld [vmem:[#allocation1 + $0x108] ss:$16 sm:%s5288_s8]   ;;  %v5281_v58 = vsel %vm2061_vm2, %v5279_v53, %v5276_v2  ;;  %v2143_v36 = vld [vmem:[#allocation1 + $0x200] ss:$16 sm:%s2142_s29]   ;;  %v6283_v2 = vunpack.i.h.bf16 %v7501_v8  ;;  %2064 = vst.msk [vmem:[#allocation0] sm:$0xff] %vm2063_vm10, %v2062_v51   ;;  %s2200_s26 = smov 48  ;;  %v6358_v34 = vunpack.i.h.bf16 %v7652_v34 }
 0x152   :  { %v5292_v20 = vld [vmem:[#allocation1 + $0x108] ss:$16 sm:%s5291_s3]   ;;  %v6494_v44 = vpack.i.bf16 %v5281_v58, %v5258_v18  ;;  %v2135_v18 = vsel %vm2053_vm0, %v2133_v39, %v2130_v28  ;;  %v2109_v53 = vld [vmem:[#allocation1 + $0x180] ss:$16 sm:%s2108_s11]   ;;  %2624 = vst.msk [vmem:[#allocation0] sm:$0xff] %vm2623_vm11, %v6227_v10   ;;  %s2205_s27 = smov 192  ;;  %v6327_v28 = vunpack.i.l.bf16 %v7592_v29 }
 0x153   :  { %v5297_v50 = vld [vmem:[#allocation1 + $0x108] ss:$16 sm:%s5296_s4]   ;;  %v5294_v7 = vsel %vm2053_vm0, %v5292_v20, %v5289_v56  ;;  %v6277_v56 = vunpack.i.l.bf16 %v7492_v19  ;;  %v2140_v20 = vsel %vm2057_vm1, %v2138_v38, %v2135_v18  ;;  %v2117_v58 = vld [vmem:[#allocation1 + $0x180] ss:$16 sm:%s2116_s19]   ;;  %3152 = vst.msk [vmem:[#allocation0] sm:$0xff] %vm3151_vm12, %v6267_v62   ;;  %s2090_s20 = smov 12  ;;  %v7698_v62 = vpop.permute.xlu0 %6365  ;;  %v6338_v38 = vunpack.i.h.bf16 %v7618_v42 }
 0x154   :  { %v5302_v61 = vld [vmem:[#allocation1 + $0x108] ss:$16 sm:%s5301_s15]   ;;  %v5299_v14 = vsel %vm2057_vm1, %v5297_v50, %v5294_v7  ;;  %6495 = vrot.lane.b32.xlu0 %v6494_v44, %s6518_s17  ;;  %v2112_v50 = vld [vmem:[#allocation1 + $0x180] ss:$16 sm:%s2111_s18]   ;;  %v6282_v7 = vunpack.i.l.bf16 %v7501_v8  ;;  %v2145_v44 = vsel %vm2061_vm2, %v2143_v36, %v2140_v20  ;;  %s2095_s6 = smov 48  ;;  %s2100_s13 = smov 192  ;;  %v6343_v20 = vunpack.i.h.bf16 %v7625_v60 }
 0x155   :  { %v5312_v4 = vld [vmem:[#allocation1 + $0x308] ss:$16 sm:%s5311_s7]   ;;  %v5304_v40 = vsel %vm2061_vm2, %v5302_v61, %v5299_v14  ;;  %v6308_v61 = vunpack.i.h.bf16 %v7546_v59  ;;  %v2114_v10 = vsel %vm2053_vm0, %v2112_v50, %v2109_v53  ;;  %v2122_v14 = vld [vmem:[#allocation1 + $0x180] ss:$16 sm:%s2121_s16]   ;;  %2148 = vst.msk [vmem:[#allocation0 + $0x60] sm:$0xff] %vm2063_vm10, %v2145_v44   ;;  %s2171_s14 = smov 3  ;;  %v6337_v53 = vunpack.i.l.bf16 %v7618_v42 }
 0x156   :  { %v5315_v33 = vld [vmem:[#allocation1 + $0x308] ss:$16 sm:%s5314_s5]   ;;  %v2201_v46 = vld [vmem:[#allocation1 + $0x380] ss:$16 sm:%s2200_s26]   ;;  %2670 = vst.msk [vmem:[#allocation0 + $0x60] sm:$0xff] %vm2623_vm11, %v6228_v9   ;;  %s2174_s0 = smov 12 }
 0x157   :  { %v5320_v21 = vld [vmem:[#allocation1 + $0x308] ss:$16 sm:%s5319_s22]   ;;  %v5317_v35 = vsel %vm2053_vm0, %v5315_v33, %v5312_v4  ;;  %v7666_v1 = vpop.permute.xlu1 %6360  ;;  %v6307_v4 = vunpack.i.l.bf16 %v7546_v59  ;;  %v2193_v33 = vld [vmem:[#allocation1 + $0x380] ss:$16 sm:%s2192_s28]   ;;  %3175 = vst.msk [vmem:[#allocation0 + $0x60] sm:$0xff] %vm3151_vm12, %v6268_v48   ;;  %v6332_v48 = vunpack.i.l.bf16 %v7601_v13  ;;  %s2179_s8 = smov 48 }
 0x158   :  { %v5325_v41 = vld [vmem:[#allocation1 + $0x308] ss:$16 sm:%s5324_s24]   ;;  %v5322_v24 = vsel %vm2057_vm1, %v5320_v21, %v5317_v35  ;;  %v6313_v21 = vunpack.i.h.bf16 %v7555_v25  ;;  %v2119_v35 = vsel %vm2057_vm1, %v2117_v58, %v2114_v10  ;;  %v2091_v17 = vld [vmem:[#allocation1 + $0x100] ss:$16 sm:%s2090_s20]   ;;  %s2184_s3 = smov 192  ;;  %s2066_s4 = smov 3  ;;  %v6348_v10 = vunpack.i.h.bf16 %v7634_v6 }
 0x159   :  { %v5327_v27 = vsel %vm2061_vm2, %v5325_v41, %v5322_v24  ;;  %v2196_v41 = vld [vmem:[#allocation1 + $0x380] ss:$16 sm:%s2195_s9]   ;;  %v6318_v24 = vunpack.i.h.bf16 %v7572_v57  ;;  %v2124_v5 = vsel %vm2061_vm2, %v2122_v14, %v2119_v35  ;;  %v6347_v14 = vunpack.i.l.bf16 %v7634_v6  ;;  %s2069_s15 = smov 12  ;;  %s2074_s7 = smov 48  ;;  %3519 = vst.msk [vmem:[#allocation0] sm:$0xff] %vm3518_vm13, %v6307_v4   ;;  %3542 = vst.msk [vmem:[#allocation0 + $0x60] sm:$0xff] %vm3518_vm13, %v6308_v61  }
 0x15a   :  { %v6499_v31 = vpack.i.bf16 %v5327_v27, %v5304_v40  ;;  %v6312_v40 = vunpack.i.l.bf16 %v7555_v25  ;;  %v2198_v9 = vsel %vm2053_vm0, %v2196_v41, %v2193_v33  ;;  %v2206_v27 = vld [vmem:[#allocation1 + $0x380] ss:$16 sm:%s2205_s27]   ;;  %2127 = vst.msk [vmem:[#allocation0 + $0x48] sm:$0xff] %vm2063_vm10, %v2124_v5   ;;  %v6353_v41 = vunpack.i.h.bf16 %v7643_v52  ;;  %s2079_s5 = smov 192  ;;  %s2150_s22 = smov 3  ;;  %v6376_v59 = vpop.permute.xlu0 %6375 }
 0x15b   :  { %v2096_v39 = vld [vmem:[#allocation1 + $0x100] ss:$16 sm:%s2095_s6]   ;;  %2716 = vst.msk [vmem:[#allocation0 + $0x48] sm:$0xff] %vm2623_vm11, %v6232_v54   ;;  %v6352_v52 = vunpack.i.l.bf16 %v7643_v52  ;;  %s2153_s24 = smov 12  ;;  %s2158_s12 = smov 48  ;;  %v6378_v19 = vunpack.i.h.bf16 %v6376_v59  ;;  %v6377_v29 = vunpack.i.l.bf16 %v6376_v59  ;;  %v6363_v57 = vunpack.i.h.bf16 %v7666_v1 }
 0x15c   :  { %6500 = vrot.lane.b32.xlu1 %v6499_v31, %s6518_s17  ;;  %s2087_s17 = smov 3  ;;  %v2203_v31 = vsel %vm2057_vm1, %v2201_v46, %v2198_v9  ;;  %v2101_v18 = vld [vmem:[#allocation1 + $0x100] ss:$16 sm:%s2100_s13]   ;;  %3198 = vst.msk [vmem:[#allocation0 + $0x48] sm:$0xff] %vm3151_vm12, %v6272_v16   ;;  %v6342_v16 = vunpack.i.l.bf16 %v7625_v60  ;;  %v7730_v46 = vpop.permute.xlu1 %6370  ;;  %s2163_s30 = smov 192 }
 0x15d   :  { %v2088_v63 = vld [vmem:[#allocation1 + $0x100] ss:$16 sm:%s2087_s17]   ;;  %v2208_v51 = vsel %vm2061_vm2, %v2206_v27, %v2203_v31  ;;  %3565 = vst.msk [vmem:[#allocation0 + $0x48] sm:$0xff] %vm3518_vm13, %v6312_v40  }
 0x15e   :  { %v2093_v54 = vsel %vm2053_vm0, %v2091_v17, %v2088_v63  ;;  %v2172_v36 = vld [vmem:[#allocation1 + $0x300] ss:$16 sm:%s2171_s14]   ;;  %2211 = vst.msk [vmem:[#allocation0 + $0xa8] sm:$0xff] %vm2063_vm10, %v2208_v51   ;;  %v6367_v63 = vunpack.i.l.bf16 %v7698_v62  ;;  %v6372_v51 = vunpack.i.l.bf16 %v7730_v46 }
 0x15f   :  { %v2098_v50 = vsel %vm2057_vm1, %v2096_v39, %v2093_v54  ;;  %v2175_v58 = vld [vmem:[#allocation1 + $0x300] ss:$16 sm:%s2174_s0]   ;;  %2762 = vst.msk [vmem:[#allocation0 + $0xa8] sm:$0xff] %vm2623_vm11, %v6233_v45   ;;  %v6373_v39 = vunpack.i.h.bf16 %v7730_v46 }
 0x160   :  { %v2180_v44 = vld [vmem:[#allocation1 + $0x300] ss:$16 sm:%s2179_s8]   ;;  %v2103_v30 = vsel %vm2061_vm2, %v2101_v18, %v2098_v50  ;;  %v2177_v45 = vsel %vm2053_vm0, %v2175_v58, %v2172_v36  ;;  %3221 = vst.msk [vmem:[#allocation0 + $0xa8] sm:$0xff] %vm3151_vm12, %v6273_v15   ;;  %v6368_v15 = vunpack.i.h.bf16 %v7698_v62 }
 0x161   :  { %v2185_v33 = vld [vmem:[#allocation1 + $0x300] ss:$16 sm:%s2184_s3]   ;;  %2106 = vst.msk [vmem:[#allocation0 + $0x30] sm:$0xff] %vm2063_vm10, %v2103_v30   ;;  %v2182_v5 = vsel %vm2057_vm1, %v2180_v44, %v2177_v45 }
 0x162   :  { %v2067_v35 = vld [vmem:[#allocation1 + $0x80] ss:$16 sm:%s2066_s4]   ;;  %v2187_v62 = vsel %vm2061_vm2, %v2185_v33, %v2182_v5  ;;  %2808 = vst.msk [vmem:[#allocation0 + $0x30] sm:$0xff] %vm2623_vm11, %v6237_v55  }
 0x163   :  { %v2070_v9 = vld [vmem:[#allocation1 + $0x80] ss:$16 sm:%s2069_s15]   ;;  %2190 = vst.msk [vmem:[#allocation0 + $0x90] sm:$0xff] %vm2063_vm10, %v2187_v62   ;;  %v6381_v37 = vpop.permute.xlu1 %6380 }
 0x164   :  { %v2075_v27 = vld [vmem:[#allocation1 + $0x80] ss:$16 sm:%s2074_s7]   ;;  %v2072_v55 = vsel %vm2053_vm0, %v2070_v9, %v2067_v35  ;;  %3244 = vst.msk [vmem:[#allocation0 + $0x30] sm:$0xff] %vm3151_vm12, %v6277_v56   ;;  %v6362_v56 = vunpack.i.l.bf16 %v7666_v1  ;;  %v6382_v8 = vunpack.i.l.bf16 %v6381_v37 }
 0x165   :  { %v2080_v31 = vld [vmem:[#allocation1 + $0x80] ss:$16 sm:%s2079_s5]   ;;  %v2077_v54 = vsel %vm2057_vm1, %v2075_v27, %v2072_v55  ;;  %2854 = vst.msk [vmem:[#allocation0 + $0x90] sm:$0xff] %vm2623_vm11, %v6238_v23  }
 0x166   :  { %v2151_v17 = vld [vmem:[#allocation1 + $0x280] ss:$16 sm:%s2150_s22]   ;;  %v2082_v32 = vsel %vm2061_vm2, %v2080_v31, %v2077_v54  ;;  %3588 = vst.msk [vmem:[#allocation0 + $0xa8] sm:$0xff] %vm3518_vm13, %v6313_v21   ;;  %3611 = vst.msk [vmem:[#allocation0 + $0x30] sm:$0xff] %vm3518_vm13, %v6317_v11  }
 0x167   :  { %v2154_v18 = vld [vmem:[#allocation1 + $0x280] ss:$16 sm:%s2153_s24]   ;;  %2085 = vst.msk [vmem:[#allocation0 + $0x18] sm:$0xff] %vm2063_vm10, %v2082_v32   ;;  %v6391_v6 = vpop.permute.xlu1 %6390 }
 0x168   :  { %v2159_v36 = vld [vmem:[#allocation1 + $0x280] ss:$16 sm:%s2158_s12]   ;;  %v2156_v23 = vsel %vm2053_vm0, %v2154_v18, %v2151_v17  ;;  %3267 = vst.msk [vmem:[#allocation0 + $0x90] sm:$0xff] %vm3151_vm12, %v6278_v43   ;;  %vm4068_vm0 = vcmask 622040   ;;  %v6393_v43 = vunpack.i.h.bf16 %v6391_v6  ;;  %v6392_v1 = vunpack.i.l.bf16 %v6391_v6 }
 0x169   :  { %v2164_v50 = vld [vmem:[#allocation1 + $0x280] ss:$16 sm:%s2163_s30]   ;;  %v2161_v25 = vsel %vm2057_vm1, %v2159_v36, %v2156_v23  ;;  %3703 = vst.msk [vmem:[#allocation0 + $0x20] sm:$0xff] %vm3701_vm14, %v6327_v28   ;;  %3726 = vst.msk [vmem:[#allocation0 + $0x80] sm:$0xff] %vm3701_vm14, %v6328_v3   ;;  %vm4252_vm1 = vcmask 556440  }
 0x16a   :  { %3749 = vst.msk [vmem:[#allocation0 + $0x8] sm:$0xff] %vm3701_vm14, %v6332_v48   ;;  %3772 = vst.msk [vmem:[#allocation0 + $0x68] sm:$0xff] %vm3701_vm14, %v6333_v12   ;;  %v2166_v13 = vsel %vm2061_vm2, %v2164_v50, %v2161_v25  ;;  %vm4435_vm2 = vcmask 482640  }
 0x16b   :  { %3795 = vst.msk [vmem:[#allocation0 + $0x50] sm:$0xff] %vm3701_vm14, %v6337_v53   ;;  %3818 = vst.msk [vmem:[#allocation0 + $0xb0] sm:$0xff] %vm3701_vm14, %v6338_v38  }
 0x16c   :  { %3841 = vst.msk [vmem:[#allocation0 + $0x38] sm:$0xff] %vm3701_vm14, %v6342_v16   ;;  %3864 = vst.msk [vmem:[#allocation0 + $0x98] sm:$0xff] %vm3701_vm14, %v6343_v20  }
 0x16d   :  { %3886 = vst.msk [vmem:[#allocation0] sm:$0xff] %vm3885_vm15, %v6347_v14   ;;  %3909 = vst.msk [vmem:[#allocation0 + $0x60] sm:$0xff] %vm3885_vm15, %v6348_v10  }
 0x16e   :  { %3932 = vst.msk [vmem:[#allocation0 + $0x48] sm:$0xff] %vm3885_vm15, %v6352_v52   ;;  %3955 = vst.msk [vmem:[#allocation0 + $0xa8] sm:$0xff] %vm3885_vm15, %v6353_v41  }
 0x16f   :  { %3978 = vst.msk [vmem:[#allocation0 + $0x30] sm:$0xff] %vm3885_vm15, %v6357_v26  }
 0x170   :  { %2900 = vst.msk [vmem:[#allocation0 + $0x18] sm:$0xff] %vm2623_vm11, %v6247_v0   ;;  %v6323_v0 = vunpack.i.h.bf16 %v7581_v22  ;;  %v6386_v22 = vpop.permute.xlu0 %6385 }
 0x171   :  { %3634 = vst.msk [vmem:[#allocation0 + $0x90] sm:$0xff] %vm3518_vm13, %v6318_v24   ;;  %v6388_v42 = vunpack.i.h.bf16 %v6386_v22  ;;  %v6387_v60 = vunpack.i.l.bf16 %v6386_v22 }
 0x172   :  { %4070 = vst.msk [vmem:[#allocation0 + $0x20] sm:$0xff] %vm4068_vm0, %v6367_v63   ;;  %4093 = vst.msk [vmem:[#allocation0 + $0x80] sm:$0xff] %vm4068_vm0, %v6368_v15  }
 0x173   :  { %4116 = vst.msk [vmem:[#allocation0 + $0x8] sm:$0xff] %vm4068_vm0, %v6372_v51   ;;  %4139 = vst.msk [vmem:[#allocation0 + $0x68] sm:$0xff] %vm4068_vm0, %v6373_v39  }
 0x174   :  { %2169 = vst.msk [vmem:[#allocation0 + $0x78] sm:$0xff] %vm2063_vm10, %v2166_v13   ;;  %v5474_v13 = vld [vmem:[#allocation0 + $0xa0] sm:$0xff] }
 0x175   :  { %3290 = vst.msk [vmem:[#allocation0 + $0x18] sm:$0xff] %vm3151_vm12, %v6282_v7  }
 0x176   :  { %4001 = vst.msk [vmem:[#allocation0 + $0x90] sm:$0xff] %vm3885_vm15, %v6358_v34  }
 0x177   :  { %4162 = vst.msk [vmem:[#allocation0 + $0x50] sm:$0xff] %vm4068_vm0, %v6377_v29   ;;  %4185 = vst.msk [vmem:[#allocation0 + $0xb0] sm:$0xff] %vm4068_vm0, %v6378_v19   ;;  %v6401_v4 = vpop.permute.xlu1 %6400 }
 0x178   :  { %2946 = vst.msk [vmem:[#allocation0 + $0x78] sm:$0xff] %vm2623_vm11, %v6248_v49   ;;  %v6383_v49 = vunpack.i.h.bf16 %v6381_v37  ;;  %v6403_v21 = vunpack.i.h.bf16 %v6401_v4  ;;  %v6402_v40 = vunpack.i.l.bf16 %v6401_v4  ;;  %v5390_v37 = vld [vmem:[#allocation0 + $0x40] sm:$0xff] }
 0x179   :  { %3657 = vst.msk [vmem:[#allocation0 + $0x18] sm:$0xff] %vm3518_vm13, %v6322_v47  }
 0x17a   :  { %3313 = vst.msk [vmem:[#allocation0 + $0x78] sm:$0xff] %vm3151_vm12, %v6283_v2   ;;  %v6396_v2 = vpop.permute.xlu0 %6395 }
 0x17b   :  { %4024 = vst.msk [vmem:[#allocation0 + $0x18] sm:$0xff] %vm3885_vm15, %v6362_v56   ;;  %v6398_v7 = vunpack.i.h.bf16 %v6396_v2  ;;  %v6397_v61 = vunpack.i.l.bf16 %v6396_v2 }
 0x17c   :  { %3680 = vst.msk [vmem:[#allocation0 + $0x78] sm:$0xff] %vm3518_vm13, %v6323_v0   ;;  %v6411_v3 = vpop.permute.xlu1 %6410 }
 0x17d   :  { %4047 = vst.msk [vmem:[#allocation0 + $0x78] sm:$0xff] %vm3885_vm15, %v6363_v57   ;;  %v6413_v28 = vunpack.i.h.bf16 %v6411_v3  ;;  %v6412_v12 = vunpack.i.l.bf16 %v6411_v3  ;;  %v5453_v3 = vld [vmem:[#allocation0 + $0x88] sm:$0xff] }
 0x17e   :  { %4208 = vst.msk [vmem:[#allocation0 + $0x38] sm:$0xff] %vm4068_vm0, %v6382_v8   ;;  %4231 = vst.msk [vmem:[#allocation0 + $0x98] sm:$0xff] %vm4068_vm0, %v6383_v49   ;;  %v6406_v24 = vpop.permute.xlu0 %6405 }
 0x17f   :  { %4253 = vst.msk [vmem:[#allocation0] sm:$0xff] %vm4252_vm1, %v6387_v60   ;;  %4276 = vst.msk [vmem:[#allocation0 + $0x60] sm:$0xff] %vm4252_vm1, %v6388_v42   ;;  %v6408_v11 = vunpack.i.h.bf16 %v6406_v24  ;;  %v6407_v47 = vunpack.i.l.bf16 %v6406_v24 }
 0x180   :  { %4299 = vst.msk [vmem:[#allocation0 + $0x48] sm:$0xff] %vm4252_vm1, %v6392_v1   ;;  %4322 = vst.msk [vmem:[#allocation0 + $0xa8] sm:$0xff] %vm4252_vm1, %v6393_v43   ;;  %v5432_v1 = vld [vmem:[#allocation0 + $0x70] sm:$0xff] }
 0x181   :  { %4345 = vst.msk [vmem:[#allocation0 + $0x30] sm:$0xff] %vm4252_vm1, %v6397_v61   ;;  %4368 = vst.msk [vmem:[#allocation0 + $0x90] sm:$0xff] %vm4252_vm1, %v6398_v7   ;;  %v5348_v7 = vld [vmem:[#allocation0 + $0x10] sm:$0xff] }
 0x182   :  { %4391 = vst.msk [vmem:[#allocation0 + $0x18] sm:$0xff] %vm4252_vm1, %v6402_v40   ;;  %4414 = vst.msk [vmem:[#allocation0 + $0x78] sm:$0xff] %vm4252_vm1, %v6403_v21   ;;  %v6416_v48 = vpop.permute.xlu0 %6415 }
 0x183   :  { %4437 = vst.msk [vmem:[#allocation0 + $0x20] sm:$0xff] %vm4435_vm2, %v6407_v47   ;;  %4460 = vst.msk [vmem:[#allocation0 + $0x80] sm:$0xff] %vm4435_vm2, %v6408_v11   ;;  %v6418_v38 = vunpack.i.h.bf16 %v6416_v48  ;;  %v6417_v53 = vunpack.i.l.bf16 %v6416_v48  ;;  %v5369_v48 = vld [vmem:[#allocation0 + $0x28] sm:$0xff] }
 0x184   :  { %4483 = vst.msk [vmem:[#allocation0 + $0x8] sm:$0xff] %vm4435_vm2, %v6412_v12   ;;  %4506 = vst.msk [vmem:[#allocation0 + $0x68] sm:$0xff] %vm4435_vm2, %v6413_v28  }
 0x185   :  { %4529 = vst.msk [vmem:[#allocation0 + $0x50] sm:$0xff] %vm4435_vm2, %v6417_v53   ;;  %4552 = vst.msk [vmem:[#allocation0 + $0xb0] sm:$0xff] %vm4435_vm2, %v6418_v38  }
 0x186   :  { %v6426_v16 = vpop.permute.xlu0 %6425 }
 0x187   :  { %v6428_v10 = vunpack.i.h.bf16 %v6426_v16  ;;  %v6427_v14 = vunpack.i.l.bf16 %v6426_v16 }
 0x189   :  { %v6421_v20 = vpop.permute.xlu1 %6420  ;;  %4620 = vst.msk [vmem:[#allocation0] sm:$0xff] %vm4619_vm3, %v6427_v14   ;;  %4643 = vst.msk [vmem:[#allocation0 + $0x60] sm:$0xff] %vm4619_vm3, %v6428_v10  }
 0x18a   :  { %v6423_v58 = vunpack.i.h.bf16 %v6421_v20  ;;  %v6422_v44 = vunpack.i.l.bf16 %v6421_v20 }
 0x18c   :  { %4575 = vst.msk [vmem:[#allocation0 + $0x38] sm:$0xff] %vm4435_vm2, %v6422_v44   ;;  %4598 = vst.msk [vmem:[#allocation0 + $0x98] sm:$0xff] %vm4435_vm2, %v6423_v58  }
 0x18d   :  { %v6431_v30 = vpop.permute.xlu1 %6430 }
 0x18e   :  { %v6433_v45 = vunpack.i.h.bf16 %v6431_v30  ;;  %v6432_v33 = vunpack.i.l.bf16 %v6431_v30 }
 0x190   :  { %4666 = vst.msk [vmem:[#allocation0 + $0x48] sm:$0xff] %vm4619_vm3, %v6432_v33   ;;  %4689 = vst.msk [vmem:[#allocation0 + $0xa8] sm:$0xff] %vm4619_vm3, %v6433_v45  }
 0x192   :  { %v6436_v35 = vpop.permute.xlu0 %6435 }
 0x193   :  { %v6438_v41 = vunpack.i.h.bf16 %v6436_v35  ;;  %v6437_v52 = vunpack.i.l.bf16 %v6436_v35 }
 0x195   :  { %4712 = vst.msk [vmem:[#allocation0 + $0x30] sm:$0xff] %vm4619_vm3, %v6437_v52   ;;  %4735 = vst.msk [vmem:[#allocation0 + $0x90] sm:$0xff] %vm4619_vm3, %v6438_v41   ;;  %v5495_v52 = vld [vmem:[#allocation0 + $0xb8] sm:$0xff] }
 0x196   :  { %v6446_v27 = vpop.permute.xlu0 %6445 }
 0x197   :  { %v6448_v26 = vunpack.i.h.bf16 %v6446_v27  ;;  %v6447_v15 = vunpack.i.l.bf16 %v6446_v27 }
 0x199   :  { %4804 = vst.msk [vmem:[#allocation0 + $0x20] sm:$0xff] %vm4802_vm4, %v6447_v15   ;;  %4827 = vst.msk [vmem:[#allocation0 + $0x80] sm:$0xff] %vm4802_vm4, %v6448_v26  }
 0x19a   :  { %v6441_v46 = vpop.permute.xlu1 %6440 }
 0x19b   :  { %v6443_v5 = vunpack.i.h.bf16 %v6441_v46  ;;  %v6442_v9 = vunpack.i.l.bf16 %v6441_v46  ;;  %v5411_v46 = vld [vmem:[#allocation0 + $0x58] sm:$0xff] }
 0x19d   :  { %4758 = vst.msk [vmem:[#allocation0 + $0x18] sm:$0xff] %vm4619_vm3, %v6442_v9   ;;  %4781 = vst.msk [vmem:[#allocation0 + $0x78] sm:$0xff] %vm4619_vm3, %v6443_v5  }
 0x19f   :  { %v6451_v63 = vpop.permute.xlu1 %6450 }
 0x1a0   :  { %v6453_v62 = vunpack.i.h.bf16 %v6451_v63  ;;  %v6452_v55 = vunpack.i.l.bf16 %v6451_v63 }
 0x1a2   :  { %4850 = vst.msk [vmem:[#allocation0 + $0x8] sm:$0xff] %vm4802_vm4, %v6452_v55   ;;  %4873 = vst.msk [vmem:[#allocation0 + $0x68] sm:$0xff] %vm4802_vm4, %v6453_v62  }
 0x1a3   :  { %v6456_v31 = vpop.permute.xlu0 %6455 }
 0x1a4   :  { %v6458_v17 = vunpack.i.h.bf16 %v6456_v31  ;;  %v6457_v39 = vunpack.i.l.bf16 %v6456_v31 }
 0x1a6   :  { %4896 = vst.msk [vmem:[#allocation0 + $0x50] sm:$0xff] %vm4802_vm4, %v6457_v39   ;;  %4919 = vst.msk [vmem:[#allocation0 + $0xb0] sm:$0xff] %vm4802_vm4, %v6458_v17  }
 0x1a7   :  { %v6466_v36 = vpop.permute.xlu0 %6465 }
 0x1a8   :  { %v6468_v34 = vunpack.i.h.bf16 %v6466_v36  ;;  %v6467_v56 = vunpack.i.l.bf16 %v6466_v36 }
 0x1aa   :  { %4987 = vst.msk [vmem:[#allocation0] sm:$0xff] %vm4986_vm5, %v6467_v56   ;;  %5010 = vst.msk [vmem:[#allocation0 + $0x60] sm:$0xff] %vm4986_vm5, %v6468_v34  }
 0x1ab   :  { %v6461_v51 = vpop.permute.xlu1 %6460 }
 0x1ac   :  { %v6463_v54 = vunpack.i.h.bf16 %v6461_v51  ;;  %v6462_v18 = vunpack.i.l.bf16 %v6461_v51 }
 0x1ae   :  { %4942 = vst.msk [vmem:[#allocation0 + $0x38] sm:$0xff] %vm4802_vm4, %v6462_v18   ;;  %4965 = vst.msk [vmem:[#allocation0 + $0x98] sm:$0xff] %vm4802_vm4, %v6463_v54  }
 0x1af   :  { %v6471_v32 = vpop.permute.xlu1 %6470 }
 0x1b0   :  { %v6473_v23 = vunpack.i.h.bf16 %v6471_v32  ;;  %v6472_v50 = vunpack.i.l.bf16 %v6471_v32 }
 0x1b1   :  { %v5337_v16 = vld [vmem:[#allocation0] sm:$0xff] }
 0x1b2   :  { %5033 = vst.msk [vmem:[#allocation0 + $0x48] sm:$0xff] %vm4986_vm5, %v6472_v50   ;;  %5056 = vst.msk [vmem:[#allocation0 + $0xa8] sm:$0xff] %vm4986_vm5, %v6473_v23   ;;  %v5418_v30 = vld [vmem:[#allocation0 + $0x60] sm:$0xff] }
 0x1b4   :  { %v6476_v59 = vpop.permute.xlu0 %6475 }
 0x1b5   :  { %v6478_v25 = vunpack.i.h.bf16 %v6476_v59  ;;  %v6477_v19 = vunpack.i.l.bf16 %v6476_v59 }
 0x1b7   :  { %5079 = vst.msk [vmem:[#allocation0 + $0x30] sm:$0xff] %vm4986_vm5, %v6477_v19   ;;  %5102 = vst.msk [vmem:[#allocation0 + $0x90] sm:$0xff] %vm4986_vm5, %v6478_v25  }
 0x1b8   :  { %v6486_v60 = vpop.permute.xlu0 %6485 }
 0x1b9   :  { %v5397_v49 = vld [vmem:[#allocation0 + $0x48] sm:$0xff]  ;;  %v6488_v6 = vunpack.i.h.bf16 %v6486_v60  ;;  %v6487_v43 = vunpack.i.l.bf16 %v6486_v60 }
 0x1ba   :  { %v5481_v8 = vld [vmem:[#allocation0 + $0xa8] sm:$0xff]  ;;  %v6078_v22 = vpack.c.bf16 %v5397_v49, %v5390_v37 }
 0x1bb   :  { %v6108_v42 = vpack.c.bf16 %v5481_v8, %v5474_v13  ;;  %5171 = vst.msk [vmem:[#allocation0 + $0x20] sm:$0xff] %vm5169_vm6, %v6487_v43   ;;  %5194 = vst.msk [vmem:[#allocation0 + $0x80] sm:$0xff] %vm5169_vm6, %v6488_v6  }
 0x1bc   :  { %v6481_v29 = vpop.permute.xlu1 %6480  ;;  %6181 = vst [vmem:[%s7919_s1 + $0x20] sm:$0xff] %v6078_v22  }
 0x1bd   :  { %v6483_v0 = vunpack.i.h.bf16 %v6481_v29  ;;  %v6482_v57 = vunpack.i.l.bf16 %v6481_v29  ;;  %6187 = vst [vmem:[%s7919_s1 + $0x50] sm:$0xff] %v6108_v42  }
 0x1be   :  { %v5376_v15 = vld [vmem:[#allocation0 + $0x30] sm:$0xff] }
 0x1bf   :  { %5125 = vst.msk [vmem:[#allocation0 + $0x18] sm:$0xff] %vm4986_vm5, %v6482_v57   ;;  %5148 = vst.msk [vmem:[#allocation0 + $0x78] sm:$0xff] %vm4986_vm5, %v6483_v0   ;;  %v5460_v63 = vld [vmem:[#allocation0 + $0x90] sm:$0xff] }
 0x1c1   :  { %v6491_v2 = vpop.permute.xlu1 %6490 }
 0x1c2   :  { %v6493_v21 = vunpack.i.h.bf16 %v6491_v2  ;;  %v6492_v40 = vunpack.i.l.bf16 %v6491_v2  ;;  %v5362_v38 = vld [vmem:[#allocation0 + $0x20] sm:$0xff] }
 0x1c3   :  { %v5446_v53 = vld [vmem:[#allocation0 + $0x80] sm:$0xff]  ;;  %v6068_v20 = vpack.c.bf16 %v5369_v48, %v5362_v38 }
 0x1c4   :  { %5217 = vst.msk [vmem:[#allocation0 + $0x8] sm:$0xff] %vm5169_vm6, %v6492_v40   ;;  %5240 = vst.msk [vmem:[#allocation0 + $0x68] sm:$0xff] %vm5169_vm6, %v6493_v21   ;;  %v6098_v58 = vpack.c.bf16 %v5453_v3, %v5446_v53 }
 0x1c5   :  { %6179 = vst [vmem:[%s7919_s1 + $0x10] sm:$0xff] %v6068_v20  }
 0x1c6   :  { %v5355_v61 = vld [vmem:[#allocation0 + $0x18] sm:$0xff]  ;;  %v6496_v47 = vpop.permute.xlu0 %6495  ;;  %6185 = vst [vmem:[%s7919_s1 + $0x40] sm:$0xff] %v6098_v58  }
 0x1c7   :  { %v5439_v4 = vld [vmem:[#allocation0 + $0x78] sm:$0xff]  ;;  %v6063_v24 = vpack.c.bf16 %v5355_v61, %v5348_v7  ;;  %v6498_v28 = vunpack.i.h.bf16 %v6496_v47  ;;  %v6497_v12 = vunpack.i.l.bf16 %v6496_v47 }
 0x1c8   :  { %v6093_v11 = vpack.c.bf16 %v5439_v4, %v5432_v1 }
 0x1c9   :  { %6178 = vst [vmem:[%s7919_s1 + $0x8] sm:$0xff] %v6063_v24   ;;  %5263 = vst.msk [vmem:[#allocation0 + $0x50] sm:$0xff] %vm5169_vm6, %v6497_v12  }
 0x1ca   :  { %6184 = vst [vmem:[%s7919_s1 + $0x38] sm:$0xff] %v6093_v11   ;;  %5286 = vst.msk [vmem:[#allocation0 + $0xb0] sm:$0xff] %vm5169_vm6, %v6498_v28  }
 0x1cb   :  { %v5342_v45 = vld [vmem:[#allocation0 + $0x8] sm:$0xff] }
 0x1cc   :  { %v5425_v33 = vld [vmem:[#allocation0 + $0x68] sm:$0xff]  ;;  %v6058_v35 = vpack.c.bf16 %v5342_v45, %v5337_v16 }
 0x1cd   :  { %v6088_v41 = vpack.c.bf16 %v5425_v33, %v5418_v30 }
 0x1ce   :  { %v6501_v44 = vpop.permute.xlu1 %6500  ;;  %6059 = vst [vmem:[%s7919_s1] sm:$0xff] %v6058_v35  }
 0x1cf   :  { %v6503_v10 = vunpack.i.h.bf16 %v6501_v44  ;;  %v6502_v14 = vunpack.i.l.bf16 %v6501_v44  ;;  %6183 = vst [vmem:[%s7919_s1 + $0x30] sm:$0xff] %v6088_v41  }
 0x1d0   :  { %v5404_v5 = vld [vmem:[#allocation0 + $0x50] sm:$0xff] }
 0x1d1   :  { %5309 = vst.msk [vmem:[#allocation0 + $0x38] sm:$0xff] %vm5169_vm6, %v6502_v14   ;;  %5332 = vst.msk [vmem:[#allocation0 + $0x98] sm:$0xff] %vm5169_vm6, %v6503_v10   ;;  %v5488_v9 = vld [vmem:[#allocation0 + $0xb0] sm:$0xff]  ;;  %v6083_v27 = vpack.c.bf16 %v5411_v46, %v5404_v5 }
 0x1d2   :  { %v6113_v26 = vpack.c.bf16 %v5495_v52, %v5488_v9 }
 0x1d3   :  { %6182 = vst [vmem:[%s7919_s1 + $0x28] sm:$0xff] %v6083_v27  }
 0x1d4   :  { %6188 = vst [vmem:[%s7919_s1 + $0x58] sm:$0xff] %v6113_v26  }
 0x1d8   :  { %v5383_v62 = vld [vmem:[#allocation0 + $0x38] sm:$0xff] }
 0x1d9   :  { %v5467_v55 = vld [vmem:[#allocation0 + $0x98] sm:$0xff]  ;;  %v6073_v31 = vpack.c.bf16 %v5383_v62, %v5376_v15 }
 0x1da   :  { %v6103_v17 = vpack.c.bf16 %v5467_v55, %v5460_v63 }
 0x1db   :  { %6180 = vst [vmem:[%s7919_s1 + $0x18] sm:$0xff] %v6073_v31  }
 0x1dc   :  { %6186 = vst [vmem:[%s7919_s1 + $0x48] sm:$0xff] %v6103_v17  }

// kernel: tile.73
= control target key start
LH: loop header
LB: loop body
LE: loop exit
PB: predicated region body
PF: predicated region fallthrough
CT: control target
= control target key end

     0   :  { %s28_s0 = inlined_call_operand.vmem [shape: f32[8], index: 0, kind: input, shape index: {}]   ;;  %s29_s1 = inlined_call_operand.vmem [shape: f32[16,8], index: 1, kind: output, shape index: {}]  }
   0x1   :  { %v4_v0 = vld [vmem:[%s28_s0] ss:$0 sm:$0xff] }
   0x2   :  { %5 = vst [vmem:[%s29_s1] sm:$0xff] %v4_v0  ;;  %8 = vst [vmem:[%s29_s1 + $0x8] sm:$0xff] %v4_v0 }

// kernel: tile.74
= control target key start
LH: loop header
LB: loop body
LE: loop exit
PB: predicated region body
PF: predicated region fallthrough
CT: control target
= control target key end

     0   :  { %s131_s10 = smov 120   ;;  %s132_s11 = smov 104   ;;  %vm3_vm0 = vcmask 64512   ;;  %vm9_vm1 = vcmask 1048512   ;;  %vm15_vm2 = vcmask 982912   ;;  %vm21_vm3 = vcmask 917312   ;;  %s207_s0 = inlined_call_operand.vmem [shape: f32[16,8], index: 0, kind: input, shape index: {}]   ;;  %s208_s1 = inlined_call_operand.vmem [shape: f32[1,128], index: 1, kind: output, shape index: {}]  }
   0x1   :  { %v101_v0 = vld [vmem:[%s207_s0 + $0xf] sm:$0x1]   ;;  %v103_v1 = vld [vmem:[%s207_s0 + $0xd] sm:$0x1]   ;;  %v102_v2 = vld [vmem:[%s207_s0 + $0xe] sm:$0x1]  }
   0x2   :  { %7 = vrot.lane.b32.xlu0 %v101_v0, %s131_s10  ;;  %19 = vrot.lane.b32.xlu1 %v103_v1, %s132_s11  ;;  %v104_v3 = vld [vmem:[%s207_s0 + $0xc] sm:$0x1]   ;;  %s133_s16 = smov 112   ;;  %s134_s17 = smov 96   ;;  %v105_v4 = vld [vmem:[%s207_s0 + $0xb] sm:$0x1]  }
   0x3   :  { %v106_v5 = vld [vmem:[%s207_s0 + $0xa] sm:$0x1]   ;;  %v2_v6 = vld [vmem:[%s207_s0] sm:$0x1]   ;;  %s135_s24 = smov 88   ;;  %s136_s25 = smov 80  }
   0x4   :  { %4 = vst.msk [vmem:[#allocation0] sm:$0x1] %vm3_vm0, %v2_v6   ;;  %v107_v7 = vld [vmem:[%s207_s0 + $0x9] sm:$0x1]   ;;  %v108_v8 = vld [vmem:[%s207_s0 + $0x8] sm:$0x1]  }
   0x5   :  { %s137_s30 = smov 72   ;;  %s138_s2 = smov 64   ;;  %v109_v9 = vld [vmem:[%s207_s0 + $0x7] sm:$0x1]   ;;  %v110_v10 = vld [vmem:[%s207_s0 + $0x6] sm:$0x1]  }
   0x6   :  { %13 = vrot.lane.b32.xlu0 %v102_v2, %s133_s16  ;;  %25 = vrot.lane.b32.xlu1 %v104_v3, %s134_s17  ;;  %s139_s7 = smov 56   ;;  %s140_s8 = smov 48   ;;  %v111_v11 = vld [vmem:[%s207_s0 + $0x5] sm:$0x1]   ;;  %v112_v12 = vld [vmem:[%s207_s0 + $0x4] sm:$0x1]  }
   0x7   :  { %s141_s13 = smov 40   ;;  %s142_s14 = smov 32   ;;  %v113_v13 = vld [vmem:[%s207_s0 + $0x3] sm:$0x1]   ;;  %v114_v14 = vld [vmem:[%s207_s0 + $0x2] sm:$0x1]  }
   0x8   :  { %s143_s19 = smov 24   ;;  %s144_s20 = smov 16   ;;  %v115_v15 = vld [vmem:[%s207_s0 + $0x1] sm:$0x1]   ;;  %vm27_vm4 = vcmask 851712   ;;  %vm33_vm5 = vcmask 786112  }
   0x9   :  { %s145_s0 = smov 8   ;;  %vm39_vm6 = vcmask 720512   ;;  %vm45_vm7 = vcmask 654912   ;;  %vm51_vm8 = vcmask 589312   ;;  %vm57_vm9 = vcmask 523712  }
   0xa   :  { %31 = vrot.lane.b32.xlu0 %v105_v4, %s135_s24  ;;  %37 = vrot.lane.b32.xlu1 %v106_v5, %s136_s25  ;;  %vm63_vm10 = vcmask 458112   ;;  %vm69_vm11 = vcmask 392512   ;;  %vm75_vm12 = vcmask 326912   ;;  %vm81_vm13 = vcmask 261312  }
   0xb   :  { %vm87_vm14 = vcmask 195712   ;;  %vm93_vm15 = vcmask 130112  }
   0xe   :  { %43 = vrot.lane.b32.xlu0 %v107_v7, %s137_s30  ;;  %49 = vrot.lane.b32.xlu1 %v108_v8, %s138_s2 }
  0x12   :  { %55 = vrot.lane.b32.xlu0 %v109_v9, %s139_s7  ;;  %61 = vrot.lane.b32.xlu1 %v110_v10, %s140_s8 }
  0x16   :  { %67 = vrot.lane.b32.xlu0 %v111_v11, %s141_s13  ;;  %73 = vrot.lane.b32.xlu1 %v112_v12, %s142_s14 }
  0x1a   :  { %79 = vrot.lane.b32.xlu0 %v113_v13, %s143_s19  ;;  %85 = vrot.lane.b32.xlu1 %v114_v14, %s144_s20 }
  0x1e   :  { %91 = vrot.lane.b32.xlu0 %v115_v15, %s145_s0 }
  0x74   :  { %v8_v16 = vpop.permute.xlu0 %7   ;;  %v20_v17 = vpop.permute.xlu1 %19  }
  0x75   :  { %10 = vst.msk [vmem:[#allocation0] sm:$0x1] %vm9_vm1, %v8_v16  }
  0x78   :  { %v14_v18 = vpop.permute.xlu0 %13   ;;  %v26_v19 = vpop.permute.xlu1 %25  }
  0x79   :  { %16 = vst.msk [vmem:[#allocation0] sm:$0x1] %vm15_vm2, %v14_v18  }
  0x7a   :  { %22 = vst.msk [vmem:[#allocation0] sm:$0x1] %vm21_vm3, %v20_v17  }
  0x7b   :  { %28 = vst.msk [vmem:[#allocation0] sm:$0x1] %vm27_vm4, %v26_v19  }
  0x7c   :  { %v32_v20 = vpop.permute.xlu0 %31   ;;  %v38_v21 = vpop.permute.xlu1 %37  }
  0x7d   :  { %34 = vst.msk [vmem:[#allocation0] sm:$0x1] %vm33_vm5, %v32_v20  }
  0x7e   :  { %40 = vst.msk [vmem:[#allocation0] sm:$0x1] %vm39_vm6, %v38_v21  }
  0x80   :  { %v44_v22 = vpop.permute.xlu0 %43   ;;  %v50_v23 = vpop.permute.xlu1 %49  }
  0x81   :  { %46 = vst.msk [vmem:[#allocation0] sm:$0x1] %vm45_vm7, %v44_v22  }
  0x82   :  { %52 = vst.msk [vmem:[#allocation0] sm:$0x1] %vm51_vm8, %v50_v23  }
  0x84   :  { %v56_v24 = vpop.permute.xlu0 %55   ;;  %v62_v25 = vpop.permute.xlu1 %61  }
  0x85   :  { %58 = vst.msk [vmem:[#allocation0] sm:$0x1] %vm57_vm9, %v56_v24  }
  0x86   :  { %64 = vst.msk [vmem:[#allocation0] sm:$0x1] %vm63_vm10, %v62_v25  }
  0x88   :  { %v68_v26 = vpop.permute.xlu0 %67   ;;  %v74_v27 = vpop.permute.xlu1 %73  }
  0x89   :  { %70 = vst.msk [vmem:[#allocation0] sm:$0x1] %vm69_vm11, %v68_v26  }
  0x8a   :  { %76 = vst.msk [vmem:[#allocation0] sm:$0x1] %vm75_vm12, %v74_v27  }
  0x8c   :  { %v80_v28 = vpop.permute.xlu0 %79   ;;  %v86_v29 = vpop.permute.xlu1 %85  }
  0x8d   :  { %82 = vst.msk [vmem:[#allocation0] sm:$0x1] %vm81_vm13, %v80_v28  }
  0x8e   :  { %88 = vst.msk [vmem:[#allocation0] sm:$0x1] %vm87_vm14, %v86_v29  }
  0x90   :  { %v92_v30 = vpop.permute.xlu0 %91  }
  0x91   :  { %94 = vst.msk [vmem:[#allocation0] sm:$0x1] %vm93_vm15, %v92_v30  }
  0x98   :  { %v98_v31 = vld [vmem:[#allocation0] sm:$0x1] }
  0x99   :  { %100 = vst [vmem:[%s208_s1] sm:$0x1] %v98_v31 }

// kernel: basic_block_forward.1
= control target key start
LH: loop header
LB: loop body
LE: loop exit
PB: predicated region body
PF: predicated region fallthrough
CT: control target
= control target key end

     0   :  { %v25_v43 = vlaneseq  ;;  %s1530_s1 = inlined_call_operand.vmem [shape: bf16[3,128,128], index: 1, kind: input, shape index: {}]   ;;  %s1531_s0 = inlined_call_operand.vmem [shape: bf16[2,16,128], index: 0, kind: input, shape index: {}]   ;;  %s1532_s3 = inlined_call_operand.vmem [shape: bf16[3,128,128], index: 3, kind: input, shape index: {}]   ;;  %s1533_s2 = inlined_call_operand.vmem [shape: f32[1,128], index: 2, kind: input, shape index: {}]   ;;  %s1534_s4 = inlined_call_operand.vmem [shape: f32[1,128], index: 4, kind: input, shape index: {}]   ;;  %s1535_s5 = inlined_call_operand.vmem [shape: f32[2,16,128], index: 5, kind: output, shape index: {}]  }
   0x1   :  { %v1190_v0 = vld [vmem:[%s1530_s1] sm:$0xff]   ;;  %v1192_v2 = vld [vmem:[%s1530_s1 + $0x8] sm:$0xff]   ;;  %v1194_v4 = vld [vmem:[%s1530_s1 + $0x10] sm:$0xff]  }
   0x2   :  { %v1191_v1 = vld [vmem:[%s1530_s1 + $0x40] sm:$0xff]   ;;  %1070 = vmatprep.subr.bf16.mxu0 %v1190_v0  ;;  %v1193_v3 = vld [vmem:[%s1530_s1 + $0x48] sm:$0xff]   ;;  %v1195_v5 = vld [vmem:[%s1530_s1 + $0x50] sm:$0xff]   ;;  %v1414_v44 = vshrl.u32 %v25_v43, 7 }
   0x3   :  { %1071 = vmatpush3.bf16.msra.mxu0 %v1190_v0  ;;  %1090 = vmatprep.subr.bf16.mxu1 %v1191_v1  ;;  %v1196_v6 = vld [vmem:[%s1530_s1 + $0x18] sm:$0xff]   ;;  %v1198_v8 = vld [vmem:[%s1530_s1 + $0x20] sm:$0xff]   ;;  %v1200_v11 = vld [vmem:[%s1530_s1 + $0x28] sm:$0xff]  }
   0x4   :  { %1072 = vmatprep.subr.bf16.mxu0 %v1192_v2  ;;  %1091 = vmatpush3.bf16.msra.mxu1 %v1191_v1  ;;  %v1197_v7 = vld [vmem:[%s1530_s1 + $0x58] sm:$0xff]   ;;  %v1199_v9 = vld [vmem:[%s1530_s1 + $0x60] sm:$0xff]   ;;  %v1201_v12 = vld [vmem:[%s1530_s1 + $0x68] sm:$0xff]   ;;  %v28_v45 = vadd.s32 16, %v1414_v44  ;;  %v34_v46 = vand.u32 15, %v1414_v44  ;;  %vm443_vm0 = vcmp.lt.s32.totalorder %v1414_v44, 1 }
   0x5   :  { %1092 = vmatprep.subr.bf16.mxu1 %v1193_v3  ;;  %v1305_v10 = vld [vmem:[%s1531_s0] sm:$0xff]   ;;  %v1202_v13 = vld [vmem:[%s1530_s1 + $0x30] sm:$0xff]   ;;  %v1204_v15 = vld [vmem:[%s1530_s1 + $0x38] sm:$0xff]   ;;  %vm456_vm3 = vcmp.lt.s32.totalorder %v1414_v44, 7 }
   0x6   :  { %1086 = vmatprep.mubr.bf16.mxu0 %v1305_v10  ;;  %1106 = vmatprep.mubr.bf16.mxu1 %v1305_v10  ;;  %v1203_v14 = vld [vmem:[%s1530_s1 + $0x70] sm:$0xff]   ;;  %v1206_v16 = vld [vmem:[%s1530_s1 + $0x78] sm:$0xff]   ;;  %v1330_v17 = vld [vmem:[%s1531_s0 + $0x8] sm:$0xff]   ;;  %v48_v48 = vand.u32 15, %v28_v45  ;;  %vm1419_vm1 = vcmp.eq.s32.totalorder %v34_v46, 0 }
   0x7   :  { %1073 = vmatpush3.bf16.msra.mxu0 %v1192_v2  ;;  %v1208_v18 = vld [vmem:[%s1530_s1 + $0x80] sm:$0xff]   ;;  %v1209_v19 = vld [vmem:[%s1530_s1 + $0x88] sm:$0xff]   ;;  %v1210_v20 = vld [vmem:[%s1530_s1 + $0x90] sm:$0xff]  }
   0x8   :  { %1074 = vmatprep.subr.bf16.mxu0 %v1194_v4  ;;  %1093 = vmatpush3.bf16.msra.mxu1 %v1193_v3  ;;  %v1211_v21 = vld [vmem:[%s1530_s1 + $0x98] sm:$0xff]   ;;  %v1212_v22 = vld [vmem:[%s1530_s1 + $0xa0] sm:$0xff]   ;;  %v1213_v23 = vld [vmem:[%s1530_s1 + $0xa8] sm:$0xff]   ;;  %vm1423_vm2 = vcmp.eq.s32.totalorder %v48_v48, 0 }
   0x9   :  { %1094 = vmatprep.subr.bf16.mxu1 %v1195_v5  ;;  %v1214_v24 = vld [vmem:[%s1530_s1 + $0xb0] sm:$0xff]   ;;  %v1215_v25 = vld [vmem:[%s1530_s1 + $0xb8] sm:$0xff]   ;;  %v1216_v26 = vld [vmem:[%s1532_s3] sm:$0xff]  }
   0xa   :  { %v1217_v27 = vld [vmem:[%s1532_s3 + $0x40] sm:$0xff]   ;;  %v1218_v28 = vld [vmem:[%s1532_s3 + $0x8] sm:$0xff]   ;;  %v1220_v30 = vld [vmem:[%s1532_s3 + $0x10] sm:$0xff]  }
   0xb   :  { %1075 = vmatpush3.bf16.msra.mxu0 %v1194_v4  ;;  %v1219_v29 = vld [vmem:[%s1532_s3 + $0x48] sm:$0xff]   ;;  %v1221_v31 = vld [vmem:[%s1532_s3 + $0x50] sm:$0xff]   ;;  %v1222_v32 = vld [vmem:[%s1532_s3 + $0x18] sm:$0xff]  }
   0xc   :  { %1076 = vmatprep.subr.bf16.mxu0 %v1196_v6  ;;  %1095 = vmatpush3.bf16.msra.mxu1 %v1195_v5  ;;  %v1223_v33 = vld [vmem:[%s1532_s3 + $0x58] sm:$0xff]   ;;  %v1224_v34 = vld [vmem:[%s1532_s3 + $0x20] sm:$0xff]   ;;  %v1226_v36 = vld [vmem:[%s1532_s3 + $0x28] sm:$0xff]  }
   0xd   :  { %1096 = vmatprep.subr.bf16.mxu1 %v1197_v7  ;;  %v1225_v35 = vld [vmem:[%s1532_s3 + $0x60] sm:$0xff]   ;;  %v1227_v37 = vld [vmem:[%s1532_s3 + $0x68] sm:$0xff]   ;;  %v1228_v38 = vld [vmem:[%s1532_s3 + $0x30] sm:$0xff]  }
   0xe   :  { %v1229_v39 = vld [vmem:[%s1532_s3 + $0x70] sm:$0xff]   ;;  %v1230_v40 = vld [vmem:[%s1532_s3 + $0x38] sm:$0xff]   ;;  %v1411_v42 = vld [vmem:[%s1532_s3 + $0x80] sm:$0xff]  }
   0xf   :  { %1077 = vmatpush3.bf16.msra.mxu0 %v1196_v6  ;;  %v1231_v41 = vld [vmem:[%s1532_s3 + $0x78] sm:$0xff]   ;;  %v1234_v48 = vld [vmem:[%s1532_s3 + $0x90] sm:$0xff]  }
  0x10   :  { %1078 = vmatprep.subr.bf16.mxu0 %v1198_v8  ;;  %1097 = vmatpush3.bf16.msra.mxu1 %v1197_v7 }
  0x11   :  { %1098 = vmatprep.subr.bf16.mxu1 %v1199_v9 }
  0x13   :  { %1079 = vmatpush3.bf16.msra.mxu0 %v1198_v8  ;;  %v29_v8 = vadd.s32 24, %v1414_v44 }
  0x14   :  { %1080 = vmatprep.subr.bf16.mxu0 %v1200_v11  ;;  %1099 = vmatpush3.bf16.msra.mxu1 %v1199_v9  ;;  %v27_v9 = vadd.s32 8, %v1414_v44 }
  0x15   :  { %1100 = vmatprep.subr.bf16.mxu1 %v1201_v12 }
  0x17   :  { %1081 = vmatpush3.bf16.msra.mxu0 %v1200_v11  ;;  %v55_v11 = vand.u32 15, %v29_v8 }
  0x18   :  { %1082 = vmatprep.subr.bf16.mxu0 %v1202_v13  ;;  %1101 = vmatpush3.bf16.msra.mxu1 %v1201_v12 }
  0x19   :  { %1102 = vmatprep.subr.bf16.mxu1 %v1203_v14  ;;  %vm1442_vm4 = vcmp.eq.s32.totalorder %v55_v11, 15 }
  0x1b   :  { %1083 = vmatpush3.bf16.msra.mxu0 %v1202_v13  ;;  %v41_v13 = vand.u32 15, %v27_v9 }
  0x1c   :  { %1084 = vmatprep.subr.bf16.mxu0 %v1204_v15  ;;  %1103 = vmatpush3.bf16.msra.mxu1 %v1203_v14 }
  0x1d   :  { %1104 = vmatprep.subr.bf16.mxu1 %v1206_v16  ;;  %vm1446_vm5 = vcmp.eq.s32.totalorder %v41_v13, 15 }
  0x1f   :  { %1085 = vmatpush3.bf16.msra.mxu0 %v1204_v15 }
  0x20   :  { %1105 = vmatpush3.bf16.msra.mxu1 %v1206_v16  ;;  %1110 = vmatprep.subr.bf16.mxu0 %v1208_v18 }
  0x21   :  { %1130 = vmatprep.subr.bf16.mxu1 %v1216_v26 }
  0x22   :  { %1087 = vmatmul.mubr.bf16.vlgmr.msra.gmra.mrb[0].mxu0 %v1330_v17 }
  0x23   :  { %1111 = vmatpush3.bf16.msra.mxu0 %v1208_v18  ;;  %1107 = vmatmul.mubr.bf16.vlgmr.msra.gmra.mrb[0].mxu1 %v1330_v17 }
  0x24   :  { %1112 = vmatprep.subr.bf16.mxu0 %v1209_v19  ;;  %1126 = vmatprep.mubr.bf16.mxu0 %v1305_v10 }
  0x25   :  { %1131 = vmatpush3.bf16.msra.mxu1 %v1216_v26  ;;  %v952_v26 = vld [vmem:[%s1533_s2] ss:$0 sm:$0xff] }
  0x26   :  { %1132 = vmatprep.subr.bf16.mxu1 %v1218_v28 }
  0x27   :  { %1113 = vmatpush3.bf16.msra.mxu0 %v1209_v19 }
  0x28   :  { %1114 = vmatprep.subr.bf16.mxu0 %v1210_v20 }
  0x29   :  { %1133 = vmatpush3.bf16.msra.mxu1 %v1218_v28 }
  0x2a   :  { %1134 = vmatprep.subr.bf16.mxu1 %v1220_v30 }
  0x2b   :  { %1115 = vmatpush3.bf16.msra.mxu0 %v1210_v20 }
  0x2c   :  { %1116 = vmatprep.subr.bf16.mxu0 %v1211_v21 }
  0x2d   :  { %1135 = vmatpush3.bf16.msra.mxu1 %v1220_v30 }
  0x2e   :  { %1136 = vmatprep.subr.bf16.mxu1 %v1222_v32 }
  0x2f   :  { %1117 = vmatpush3.bf16.msra.mxu0 %v1211_v21 }
  0x30   :  { %1118 = vmatprep.subr.bf16.mxu0 %v1212_v22 }
  0x31   :  { %1137 = vmatpush3.bf16.msra.mxu1 %v1222_v32 }
  0x32   :  { %1138 = vmatprep.subr.bf16.mxu1 %v1224_v34 }
  0x33   :  { %1119 = vmatpush3.bf16.msra.mxu0 %v1212_v22 }
  0x34   :  { %1120 = vmatprep.subr.bf16.mxu0 %v1213_v23 }
  0x35   :  { %1139 = vmatpush3.bf16.msra.mxu1 %v1224_v34 }
  0x36   :  { %1140 = vmatprep.subr.bf16.mxu1 %v1226_v36 }
  0x37   :  { %1121 = vmatpush3.bf16.msra.mxu0 %v1213_v23 }
  0x38   :  { %1122 = vmatprep.subr.bf16.mxu0 %v1214_v24 }
  0x39   :  { %1141 = vmatpush3.bf16.msra.mxu1 %v1226_v36 }
  0x3a   :  { %1142 = vmatprep.subr.bf16.mxu1 %v1228_v38 }
  0x3b   :  { %1123 = vmatpush3.bf16.msra.mxu0 %v1214_v24 }
  0x3c   :  { %1124 = vmatprep.subr.bf16.mxu0 %v1215_v25 }
  0x3d   :  { %1143 = vmatpush3.bf16.msra.mxu1 %v1228_v38 }
  0x3e   :  { %1144 = vmatprep.subr.bf16.mxu1 %v1230_v40 }
  0x3f   :  { %1125 = vmatpush3.bf16.msra.mxu0 %v1215_v25 }
  0x40   :  { %1150 = vmatprep.subr.bf16.mxu0 %v1217_v27 }
  0x41   :  { %1145 = vmatpush3.bf16.msra.mxu1 %v1230_v40 }
  0x42   :  { %1127 = vmatmul.mubr.bf16.vlgmr.msra.gmra.mrb[4].mxu0 %v1330_v17  ;;  %1170 = vmatprep.subr.bf16.mxu1 %v1411_v42 }
  0x43   :  { %1151 = vmatpush3.bf16.msra.mxu0 %v1217_v27 }
  0x44   :  { %1152 = vmatprep.subr.bf16.mxu0 %v1219_v29 }
  0x47   :  { %1153 = vmatpush3.bf16.msra.mxu0 %v1219_v29 }
  0x48   :  { %1154 = vmatprep.subr.bf16.mxu0 %v1221_v31 }
  0x4b   :  { %1155 = vmatpush3.bf16.msra.mxu0 %v1221_v31 }
  0x4c   :  { %1156 = vmatprep.subr.bf16.mxu0 %v1223_v33 }
  0x4f   :  { %1157 = vmatpush3.bf16.msra.mxu0 %v1223_v33 }
  0x50   :  { %1158 = vmatprep.subr.bf16.mxu0 %v1225_v35 }
  0x53   :  { %1159 = vmatpush3.bf16.msra.mxu0 %v1225_v35 }
  0x54   :  { %1160 = vmatprep.subr.bf16.mxu0 %v1227_v37 }
  0x57   :  { %1161 = vmatpush3.bf16.msra.mxu0 %v1227_v37 }
  0x58   :  { %1162 = vmatprep.subr.bf16.mxu0 %v1229_v39 }
  0x5b   :  { %1163 = vmatpush3.bf16.msra.mxu0 %v1229_v39 }
  0x5c   :  { %1164 = vmatprep.subr.bf16.mxu0 %v1231_v41 }
  0x5f   :  { %1165 = vmatpush3.bf16.msra.mxu0 %v1231_v41 }
  0xf5   :  { %v1088_v47 = vpop.f32.mrb[0].mxu0 }
  0xf6   :  { %v441_v49 = vrot.slane %v1088_v47, 7  ;;  %v196_v50 = vpop.f32.mrb[1].mxu0  ;;  %v1108_v51 = vpop.f32.mrb[0].mxu1  ;;  %v1233_v47 = vld [vmem:[%s1532_s3 + $0x88] sm:$0xff]  }
  0xf7   :  { %v439_v52 = vrot.slane %v196_v50, 7  ;;  %v1089_v53 = vpop.f32.mrb[2].mxu0  ;;  %v310_v54 = vpop.f32.mrb[1].mxu1  ;;  %v1236_v50 = vld [vmem:[%s1532_s3 + $0xa0] sm:$0xff]  }
  0xf8   :  { %v442_v55 = vrot.slane %v1089_v53, 7  ;;  %v199_v56 = vpop.f32.mrb[3].mxu0  ;;  %v1109_v58 = vpop.f32.mrb[2].mxu1 }
  0xf9   :  { %v440_v59 = vrot.slane %v199_v56, 7  ;;  %v313_v61 = vpop.f32.mrb[3].mxu1 }
  0xfa   :  { %v447_v62 = vsel %vm443_vm0, %v442_v55, %v439_v52  ;;  %v444_v63 = vsel %vm443_vm0, %v441_v49, %v442_v55 }
  0xfb   :  { %v445_v0 = vsel %vm443_vm0, %v440_v59, %v441_v49  ;;  %v448_v1 = vsel %vm1419_vm1, 0.0, %v447_v62  ;;  %v468_v2 = vadd.f32 %v1109_v58, %v444_v63  ;;  %v446_v3 = vsel %vm443_vm0, %v439_v52, %v440_v59  ;;  %v1235_v49 = vld [vmem:[%s1532_s3 + $0x98] sm:$0xff]  }
  0xfc   :  { %v450_v4 = vsel %vm1423_vm2, 0.0, %v445_v0  ;;  %v465_v5 = vadd.f32 %v448_v1, %v310_v54  ;;  %v466_v6 = vadd.f32 %v446_v3, %v313_v61  ;;  %v1239_v52 = vld [vmem:[%s1532_s3 + $0xb8] sm:$0xff]  }
  0xfd   :  { %v467_v7 = vadd.f32 %v1108_v51, %v450_v4  ;;  %v1238_v51 = vld [vmem:[%s1532_s3 + $0xb0] sm:$0xff]  }
 0x115   :  { %v1128_v12 = vpop.f32.mrb[4].mxu0 }
 0x116   :  { %v424_v14 = vpop.f32.mrb[5].mxu0  ;;  %v454_v18 = vrot.slane %v1128_v12, 1 }
 0x117   :  { %v452_v15 = vrot.slane %v424_v14, 1  ;;  %v1129_v16 = vpop.f32.mrb[6].mxu0 }
 0x118   :  { %v455_v20 = vrot.slane %v1129_v16, 1  ;;  %v427_v21 = vpop.f32.mrb[7].mxu0 }
 0x119   :  { %v453_v23 = vrot.slane %v427_v21, 1 }
 0x11a   :  { %v457_v24 = vsel %vm456_vm3, %v454_v18, %v455_v20  ;;  %v460_v25 = vsel %vm456_vm3, %v455_v20, %v452_v15 }
 0x11b   :  { %v464_v27 = vsel %vm1442_vm4, 0.0, %v460_v25  ;;  %v471_v28 = vadd.f32 %v467_v7, %v457_v24  ;;  %v458_v29 = vsel %vm456_vm3, %v453_v23, %v454_v18  ;;  %v459_v30 = vsel %vm456_vm3, %v452_v15, %v453_v23 }
 0x11c   :  { %v472_v31 = vadd.f32 %v468_v2, %v464_v27  ;;  %v462_v32 = vsel %vm1446_vm5, 0.0, %v458_v29  ;;  %v469_v33 = vadd.f32 %v465_v5, %v459_v30  ;;  %v874_v24 = vunpack.c.l.bf16 %v1305_v10  ;;  %v1009_v27 = vld [vmem:[%s1534_s4] ss:$0 sm:$0xff] }
 0x11d   :  { %v482_v34 = vadd.f32 %v952_v26, %v471_v28  ;;  %v470_v35 = vadd.f32 %v466_v6, %v462_v32  ;;  %v876_v25 = vunpack.c.l.bf16 %v1330_v17  ;;  %v877_v32 = vunpack.c.h.bf16 %v1330_v17 }
 0x11e   :  { %v483_v36 = vadd.f32 %v952_v26, %v472_v31  ;;  %v480_v37 = vadd.f32 %v952_v26, %v469_v33 }
 0x11f   :  { %v486_v38 = vmax.f32 %v482_v34, 0.0  ;;  %v481_v39 = vadd.f32 %v952_v26, %v470_v35 }
 0x120   :  { %v484_v40 = vmax.f32 %v480_v37, 0.0  ;;  %v487_v41 = vmax.f32 %v483_v36, 0.0  ;;  %v875_v36 = vunpack.c.h.bf16 %v1305_v10 }
 0x121   :  { %v485_v43 = vmax.f32 %v481_v39, 0.0 }
 0x122   :  { %v489_v45 = vpack.c.bf16 %v487_v41, %v486_v38 }
 0x123   :  { %v488_v46 = vpack.c.bf16 %v485_v43, %v484_v40 }
 0x125   :  { %1146 = vmatprep.mubr.bf16.mxu1 %v488_v46  ;;  %1166 = vmatprep.mubr.bf16.mxu0 %v488_v46 }
 0x126   :  { %1147 = vmatmul.mubr.bf16.vlgmr.msra.gmra.mrb[4].mxu1 %v489_v45  ;;  %1167 = vmatmul.mubr.bf16.vlgmr.msra.gmra.mrb[8].mxu0 %v489_v45 }
 0x127   :  { %1171 = vmatpush3.bf16.msra.mxu1 %v1411_v42  ;;  %1186 = vmatprep.mubr.bf16.mxu1 %v488_v46  ;;  %v1237_v42 = vld [vmem:[%s1532_s3 + $0xa8] sm:$0xff]  }
 0x128   :  { %1172 = vmatprep.subr.bf16.mxu1 %v1233_v47 }
 0x12b   :  { %1173 = vmatpush3.bf16.msra.mxu1 %v1233_v47 }
 0x12c   :  { %1174 = vmatprep.subr.bf16.mxu1 %v1234_v48 }
 0x12f   :  { %1175 = vmatpush3.bf16.msra.mxu1 %v1234_v48 }
 0x130   :  { %1176 = vmatprep.subr.bf16.mxu1 %v1235_v49 }
 0x133   :  { %1177 = vmatpush3.bf16.msra.mxu1 %v1235_v49 }
 0x134   :  { %1178 = vmatprep.subr.bf16.mxu1 %v1236_v50 }
 0x137   :  { %1179 = vmatpush3.bf16.msra.mxu1 %v1236_v50 }
 0x138   :  { %1180 = vmatprep.subr.bf16.mxu1 %v1237_v42 }
 0x13b   :  { %1181 = vmatpush3.bf16.msra.mxu1 %v1237_v42 }
 0x13c   :  { %1182 = vmatprep.subr.bf16.mxu1 %v1238_v51 }
 0x13f   :  { %1183 = vmatpush3.bf16.msra.mxu1 %v1238_v51 }
 0x140   :  { %1184 = vmatprep.subr.bf16.mxu1 %v1239_v52 }
 0x143   :  { %1185 = vmatpush3.bf16.msra.mxu1 %v1239_v52 }
 0x146   :  { %1187 = vmatmul.mubr.bf16.vlgmr.msra.gmra.mrb[8].mxu1 %v489_v45 }
 0x1f9   :  { %v1148_v53 = vpop.f32.mrb[4].mxu1  ;;  %v1168_v54 = vpop.f32.mrb[8].mxu0 }
 0x1fa   :  { %v588_v55 = vpop.f32.mrb[5].mxu1  ;;  %v702_v56 = vpop.f32.mrb[9].mxu0  ;;  %v833_v62 = vrot.slane %v1148_v53, 7 }
 0x1fb   :  { %v831_v58 = vrot.slane %v588_v55, 7  ;;  %v1149_v59 = vpop.f32.mrb[6].mxu1  ;;  %v1169_v61 = vpop.f32.mrb[10].mxu0 }
 0x1fc   :  { %v834_v63 = vrot.slane %v1149_v59, 7  ;;  %v591_v0 = vpop.f32.mrb[7].mxu1  ;;  %v705_v1 = vpop.f32.mrb[11].mxu0 }
 0x1fd   :  { %v832_v2 = vrot.slane %v591_v0, 7 }
 0x1fe   :  { %v838_v3 = vsel %vm443_vm0, %v834_v63, %v831_v58  ;;  %v835_v4 = vsel %vm443_vm0, %v833_v62, %v834_v63 }
 0x1ff   :  { %v839_v5 = vsel %vm1419_vm1, 0.0, %v838_v3  ;;  %v858_v6 = vadd.f32 %v1169_v61, %v835_v4  ;;  %v836_v7 = vsel %vm443_vm0, %v832_v2, %v833_v62  ;;  %v837_v8 = vsel %vm443_vm0, %v831_v58, %v832_v2 }
 0x200   :  { %v855_v9 = vadd.f32 %v839_v5, %v702_v56  ;;  %v841_v11 = vsel %vm1423_vm2, 0.0, %v836_v7  ;;  %v856_v12 = vadd.f32 %v837_v8, %v705_v1 }
 0x201   :  { %v857_v13 = vadd.f32 %v1168_v54, %v841_v11 }
 0x219   :  { %v1188_v14 = vpop.f32.mrb[8].mxu1 }
 0x21a   :  { %v816_v15 = vpop.f32.mrb[9].mxu1  ;;  %v845_v20 = vrot.slane %v1188_v14, 1 }
 0x21b   :  { %v843_v16 = vrot.slane %v816_v15, 1  ;;  %v1189_v18 = vpop.f32.mrb[10].mxu1 }
 0x21c   :  { %v846_v57 = vrot.slane %v1189_v18, 1  ;;  %v819_v21 = vpop.f32.mrb[11].mxu1 }
 0x21d   :  { %v844_v23 = vrot.slane %v819_v21, 1 }
 0x21e   :  { %v847_v26 = vsel %vm456_vm3, %v845_v20, %v846_v57  ;;  %v850_v60 = vsel %vm456_vm3, %v846_v57, %v843_v16 }
 0x21f   :  { %v854_v28 = vsel %vm1442_vm4, 0.0, %v850_v60  ;;  %v861_v29 = vadd.f32 %v857_v13, %v847_v26  ;;  %v848_v30 = vsel %vm456_vm3, %v844_v23, %v845_v20  ;;  %v849_v31 = vsel %vm456_vm3, %v843_v16, %v844_v23 }
 0x220   :  { %v862_v33 = vadd.f32 %v858_v6, %v854_v28  ;;  %v852_v34 = vsel %vm1446_vm5, 0.0, %v848_v30  ;;  %v859_v35 = vadd.f32 %v855_v9, %v849_v31 }
 0x221   :  { %v872_v37 = vadd.f32 %v1009_v27, %v861_v29  ;;  %v860_v38 = vadd.f32 %v856_v12, %v852_v34 }
 0x222   :  { %v873_v19 = vadd.f32 %v1009_v27, %v862_v33  ;;  %v870_v39 = vadd.f32 %v1009_v27, %v859_v35 }
 0x223   :  { %v880_v40 = vadd.f32 %v876_v25, %v872_v37  ;;  %v871_v41 = vadd.f32 %v1009_v27, %v860_v38 }
 0x224   :  { %v881_v43 = vadd.f32 %v877_v32, %v873_v19  ;;  %v878_v45 = vadd.f32 %v874_v24, %v870_v39 }
 0x225   :  { %v884_v46 = vmax.f32 %v880_v40, 0.0  ;;  %v879_v44 = vadd.f32 %v875_v36, %v871_v41 }
 0x226   :  { %v885_v47 = vmax.f32 %v881_v43, 0.0  ;;  %v882_v48 = vmax.f32 %v878_v45, 0.0 }
 0x227   :  { %888 = vst [vmem:[%s1535_s5 + $0x10] sm:$0xff] %v884_v46  ;;  %v883_v17 = vmax.f32 %v879_v44, 0.0 }
 0x228   :  { %889 = vst [vmem:[%s1535_s5 + $0x18] sm:$0xff] %v885_v47  ;;  %886 = vst [vmem:[%s1535_s5] sm:$0xff] %v882_v48 }
 0x229   :  { %887 = vst [vmem:[%s1535_s5 + $0x8] sm:$0xff] %v883_v17 }

</bundles_post_ra>
